<compile_context>
chip_gen: v7x
topology: tpu7x:2x2x1
jax: 0.10.0
libtpu: 0.0.40
codegen_flags: <defaults>
</compile_context>

<pallas_src>
import math
import functools

import jax
import jax.numpy as jnp
from jax.experimental import pallas as pl
from jax.experimental.pallas import tpu as pltpu

MAX_TILE_M = 512        # row tile for the blocked matmul/LN/FFN kernels
ATTN_TQ = 256           # query tile when T is large (keeps VMEM O(TQ*T), v7x safe)
ATTN_TQ_FULL = 512      # below this seq length use a single query block
LN_EPS = 1e-5           # torch layer_norm default
NEG_INF = -1e4          # matches masked_fill(-1e4) in the reference
ACT_DT = jnp.bfloat16   # activation / weight dtype at matmul boundaries


# --------------------------------------------------------------------------
# Small helpers
# --------------------------------------------------------------------------
def _round_up(x, m):
    return ((x + m - 1) // m) * m


def _row_tile(M):
    return min(MAX_TILE_M, _round_up(M, 8))


def _pad_rows(x2d, Mp):
    M = x2d.shape[0]
    if Mp == M:
        return x2d
    return jnp.pad(x2d, ((0, Mp - M), (0, 0)))


def _act(y, act):
    if act == "relu":
        return jnp.maximum(y, 0.0)
    if act == "leaky_relu":
        return jnp.where(y >= 0.0, y, 0.1 * y)
    return y


# --------------------------------------------------------------------------
# Row-blocked kernels (bf16 matmul, f32 accumulation, fused epilogues)
# --------------------------------------------------------------------------
def _mm_kernel(x_ref, w_ref, b_ref, o_ref, *, act):
    """y = act(x @ w + b)"""
    y = jnp.dot(x_ref[...], w_ref[...], preferred_element_type=jnp.float32)
    y = _act(y + b_ref[...], act)
    o_ref[...] = y.astype(o_ref.dtype)


def _mm_mask_kernel(x_ref, m_ref, w_ref, b_ref, o_ref, *, act, mask_in, mask_out):
    """y = act((x [*m]) @ w + b) [*m]   with m a per-row mask [tile, 1]."""
    x = x_ref[...]
    m = m_ref[...]
    if mask_in:
        x = x * m
    y = jnp.dot(x, w_ref[...], preferred_element_type=jnp.float32)
    y = _act(y + b_ref[...], act)
    if mask_out:
        y = y * m.astype(jnp.float32)
    o_ref[...] = y.astype(o_ref.dtype)


def _mm_res_ln_kernel(x_ref, m_ref, res_ref, w_ref, b_ref, g_ref, be_ref, o_ref,
                      *, mask_in, mask_out, eps):
    """out = LayerNorm(res + ((x [*m]) @ w + b) [*m]) -- matmul+mask+residual+LN fused."""
    x = x_ref[...]
    m = m_ref[...]
    if mask_in:
        x = x * m
    y = jnp.dot(x, w_ref[...], preferred_element_type=jnp.float32) + b_ref[...]
    if mask_out:
        y = y * m.astype(jnp.float32)
    z = res_ref[...].astype(jnp.float32) + y
    mean = jnp.mean(z, axis=-1, keepdims=True)
    zc = z - mean
    var = jnp.mean(zc * zc, axis=-1, keepdims=True)
    o_ref[...] = (zc * jax.lax.rsqrt(var + eps) * g_ref[...] + be_ref[...]).astype(o_ref.dtype)


def _embed_kernel(ph_ref, pe_ref, m_ref, w_ref, b_ref, o_ref, *, scale):
    """out = LeakyReLU_0.1((phone @ W + b + pitch_emb) * sqrt(H)) * mask   (fused embed)."""
    y = jnp.dot(ph_ref[...], w_ref[...], preferred_element_type=jnp.float32)
    y = (y + b_ref[...] + pe_ref[...].astype(jnp.float32)) * scale
    y = jnp.where(y >= 0.0, y, 0.1 * y)
    o_ref[...] = (y * m_ref[...].astype(jnp.float32)).astype(o_ref.dtype)


def _call_rows(kernel_fn, rows, consts, n_out, out_dtype, tile):
    """Row-blocked Pallas call.  `rows` are [Mp, Ci] (already padded to Mp % tile == 0),
    `consts` are whole-array (resident) blocks."""
    Mp = rows[0].shape[0]
    in_specs = [pl.BlockSpec((tile, r.shape[1]), lambda i: (i, 0)) for r in rows]
    in_specs += [pl.BlockSpec(c.shape, lambda i: (0, 0)) for c in consts]
    cin = rows[0].shape[1]
    flops = 2 * Mp * cin * n_out
    bytes_acc = (sum(int(r.size) * r.dtype.itemsize for r in rows)
                 + sum(int(c.size) * c.dtype.itemsize for c in consts)
                 + Mp * n_out * jnp.dtype(out_dtype).itemsize)
    return pl.pallas_call(
        kernel_fn,
        out_shape=jax.ShapeDtypeStruct((Mp, n_out), out_dtype),
        grid=(Mp // tile,),
        in_specs=in_specs,
        out_specs=pl.BlockSpec((tile, n_out), lambda i: (i, 0)),
        compiler_params=pltpu.CompilerParams(dimension_semantics=("parallel",)),
        cost_estimate=pl.CostEstimate(flops=flops, transcendentals=0,
                                      bytes_accessed=bytes_acc),
    )(*rows, *consts)


# --------------------------------------------------------------------------
# Fully fused relative-position multi-head attention kernel.
# One grid step = (batch b, query tile qi).  Heads are iterated in-kernel over a
# lane-dense [T, 3H] QKV slab; relative-key bias and relative-value contribution
# use the windowed band formulation (no skew tensors, nothing extra in HBM).
# --------------------------------------------------------------------------
def _attn_kernel(qrows_ref, kvrows_ref, kmask_ref, ek_ref, ev_ref, o_ref,
                 *, n_heads, dk, window, t_q, t_kv):
    qi = pl.program_id(1)
    hh = n_heads * dk

    qrows = qrows_ref[0]                       # [TQ, 3H]  bf16 (q part pre-scaled)
    kvrows = kvrows_ref[0]                     # [T , 3H]  bf16
    kmask = kmask_ref[0]                       # [1 , T ]  f32 key mask
    ek = ek_ref[...]                           # [2W+1, dk] bf16
    ev = ev_ref[...].astype(jnp.float32)       # [2W+1, dk] f32

    row = jax.lax.broadcasted_iota(jnp.int32, (t_q, t_kv), 0) + qi * t_q
    col = jax.lax.broadcasted_iota(jnp.int32, (t_q, t_kv), 1)
    dji = col - row                            # relative offset j - i

    D = min(window, t_kv - 1)                  # static window extent actually used

    for h in range(n_heads):
        q = qrows[:, h * dk:(h + 1) * dk]                      # [TQ, dk]
        k = kvrows[:, hh + h * dk: hh + (h + 1) * dk]          # [T , dk]
        v = kvrows[:, 2 * hh + h * dk: 2 * hh + (h + 1) * dk]  # [T , dk]

        s = jax.lax.dot_general(q, k, (((1,), (1,)), ((), ())),
                                preferred_element_type=jnp.float32)      # [TQ, T]
        rl = jax.lax.dot_general(q, ek, (((1,), (1,)), ((), ())),
                                 preferred_element_type=jnp.float32)     # [TQ, 2W+1]

        # relative-key bias: place rl column (d+W) on diagonal j-i == d
        for d in range(-D, D + 1):
            s = s + jnp.where(dji == d, rl[:, d + window:d + window + 1], 0.0)

        # key-only padding mask (masked_fill semantics)
        s = jnp.where(kmask == 0.0, NEG_INF, s)

        smax = jnp.max(s, axis=-1, keepdims=True)
        e = jnp.exp(s - smax)
        den = jnp.sum(e, axis=-1, keepdims=True)
        p = e * pl.reciprocal(den, approx=True)                 # softmax (EUP reciprocal)

        o = jnp.dot(p.astype(v.dtype), v, preferred_element_type=jnp.float32)  # [TQ, dk]

        # relative-value contribution: sum of each banded diagonal of p times emb_v row
        for d in range(-D, D + 1):
            pw = jnp.sum(jnp.where(dji == d, p, 0.0), axis=-1, keepdims=True)   # [TQ, 1]
            o = o + pw * ev[d + window:d + window + 1, :]

        o_ref[0, :, h * dk:(h + 1) * dk] = o.astype(o_ref.dtype)


def attention(qkv_bt, kmask, ek, ev, *, n_heads, dk, window, out_dtype):
    B, T, three_h = qkv_bt.shape
    H = n_heads * dk

    if T <= ATTN_TQ_FULL:
        TQ, Tp = T, T
    else:
        TQ = ATTN_TQ
        Tp = _round_up(T, TQ)
    if Tp != T:
        qkv_bt = jnp.pad(qkv_bt, ((0, 0), (0, Tp - T), (0, 0)))
        kmask = jnp.pad(kmask, ((0, 0), (0, 0), (0, Tp - T)))
    nq = Tp // TQ

    kernel = functools.partial(_attn_kernel, n_heads=n_heads, dk=dk, window=window,
                               t_q=TQ, t_kv=Tp)

    flops = 2 * B * n_heads * Tp * (2 * Tp * dk + (2 * window + 1) * dk)
    trans = B * n_heads * Tp * Tp
    bytes_acc = 2 * int(qkv_bt.size) * 2 + int(kmask.size) * 4 + B * Tp * H * 2

    # explicit VMEM budget: double-buffered blocks + in-kernel [TQ, T] f32 temporaries
    need = (2 * (TQ * three_h * 2 + Tp * three_h * 2 + Tp * 4 + TQ * H * 2)
            + 8 * TQ * Tp * 4 + (2 * window + 5) * dk * 4)
    vlim = int(min(max(need * 5 // 4, 32 * 2 ** 20), 100 * 2 ** 20))

    out = pl.pallas_call(
        kernel,
        out_shape=jax.ShapeDtypeStruct((B, Tp, H), out_dtype),
        grid=(B, nq),
        in_specs=[
            pl.BlockSpec((1, TQ, three_h), lambda b, qi: (b, qi, 0)),   # q rows
            pl.BlockSpec((1, Tp, three_h), lambda b, qi: (b, 0, 0)),    # k/v rows
            pl.BlockSpec((1, 1, Tp), lambda b, qi: (b, 0, 0)),          # key mask
            pl.BlockSpec(ek.shape, lambda b, qi: (0, 0)),               # rel-key emb
            pl.BlockSpec(ev.shape, lambda b, qi: (0, 0)),               # rel-value emb
        ],
        out_specs=pl.BlockSpec((1, TQ, H), lambda b, qi: (b, qi, 0)),
        compiler_params=pltpu.CompilerParams(
            dimension_semantics=("parallel", "parallel"),
            vmem_limit_bytes=vlim),
        cost_estimate=pl.CostEstimate(flops=flops, transcendentals=trans,
                                      bytes_accessed=bytes_acc),
    )(qkv_bt, qkv_bt, kmask, ek, ev)
    return out[:, :T, :]


# --------------------------------------------------------------------------
# FFN glue for kernel_size > 1 (Encoder default is kernel_size == 1)
# --------------------------------------------------------------------------
def _im2col(x, K):
    # TODO(synk): for kernel_size > 1 this materializes K shifted copies in HBM;
    # a K-shifted accumulating matmul kernel would keep traffic at 1x.
    if K == 1:
        return x
    pad_l = (K - 1) // 2
    pad_r = K // 2
    T = x.shape[1]
    xp = jnp.pad(x, ((0, 0), (pad_l, pad_r), (0, 0)))
    return jnp.concatenate([xp[:, k:k + T, :] for k in range(K)], axis=-1)


# --------------------------------------------------------------------------
# Parameter preprocessing (outside the traced forward):
#  - fold 1/sqrt(dk) into Wq/bq and pre-concatenate the fused QKV weight,
#  - cast matmul weights / embeddings to bf16 (biases / LN params stay f32),
#  - reshape biases to [1, C] const blocks.
# --------------------------------------------------------------------------
def prepare_params(params, *, n_heads):
    H = params["emb_phone_w"].shape[1]
    dk = H // n_heads
    inv = 1.0 / math.sqrt(dk)
    bf = ACT_DT
    f32 = jnp.float32

    prepared = {
        "emb_phone_w": params["emb_phone_w"].astype(bf),
        "emb_phone_b": params["emb_phone_b"].reshape(1, -1).astype(f32),
        "emb_pitch": params["emb_pitch"].astype(bf),
        "proj_w": params["proj_w"].astype(bf),
        "proj_b": params["proj_b"].reshape(1, -1).astype(f32),
        "layers": [],
    }
    for lp in params["layers"]:
        prepared["layers"].append({
            "wqkv": jnp.concatenate([lp["wq"] * inv, lp["wk"], lp["wv"]], axis=1).astype(bf),
            "bqkv": jnp.concatenate([lp["bq"] * inv, lp["bk"], lp["bv"]]).reshape(1, -1).astype(f32),
            "wo": lp["wo"].astype(bf), "bo": lp["bo"].reshape(1, -1).astype(f32),
            "emb_rel_k": lp["emb_rel_k"].astype(bf),
            "emb_rel_v": lp["emb_rel_v"].astype(bf),
            "ln1_g": lp["ln1_g"].reshape(1, -1).astype(f32),
            "ln1_b": lp["ln1_b"].reshape(1, -1).astype(f32),
            "ffn_w1": lp["ffn_w1"].astype(bf), "ffn_b1": lp["ffn_b1"].reshape(1, -1).astype(f32),
            "ffn_w2": lp["ffn_w2"].astype(bf), "ffn_b2": lp["ffn_b2"].reshape(1, -1).astype(f32),
            "ln2_g": lp["ln2_g"].reshape(1, -1).astype(f32),
            "ln2_b": lp["ln2_b"].reshape(1, -1).astype(f32),
        })
    return prepared


# --------------------------------------------------------------------------
# Full TextEncoder forward
# --------------------------------------------------------------------------
def text_encoder_forward(prepared, phone, pitch, lengths, energy=None, *,
                         hidden_channels, n_heads, n_layers, kernel_size,
                         out_channels, window_size):
    # TODO(synk): emb_energy branch omitted -- module constructed with energy=False.
    B, T, E = phone.shape
    H = hidden_channels
    dk = H // n_heads
    M = B * T

    tile = _row_tile(M)
    Mp = _round_up(M, tile)

    # masks
    mask_f = (jnp.arange(T)[None, :] < lengths[:, None]).astype(jnp.float32)   # [B, T]
    xm_rows = _pad_rows(mask_f.reshape(M, 1).astype(ACT_DT), Mp)               # [Mp, 1]
    kmask = mask_f[:, None, :]                                                 # [B, 1, T]

    # emb_phone(phone) + emb_pitch(pitch), * sqrt(H), LeakyReLU(0.1), * x_mask (fused)
    pitch_emb = prepared["emb_pitch"][pitch]                                   # XLA gather
    ph_rows = _pad_rows(phone.reshape(M, E).astype(ACT_DT), Mp)
    pe_rows = _pad_rows(pitch_emb.reshape(M, H), Mp)
    x2d = _call_rows(
        functools.partial(_embed_kernel, scale=math.sqrt(H)),
        rows=[ph_rows, pe_rows, xm_rows],
        consts=[prepared["emb_phone_w"], prepared["emb_phone_b"]],
        n_out=H, out_dtype=ACT_DT, tile=tile)                                  # [Mp, H]

    for lp in prepared["layers"]:
        # ---------------- attention ----------------
        qkv = _call_rows(functools.partial(_mm_kernel, act=None),
                         rows=[x2d], consts=[lp["wqkv"], lp["bqkv"]],
                         n_out=3 * H, out_dtype=ACT_DT, tile=tile)             # [Mp, 3H]
        qkv_bt = qkv[:M].reshape(B, T, 3 * H)

        attn_o = attention(qkv_bt, kmask, lp["emb_rel_k"], lp["emb_rel_v"],
                           n_heads=n_heads, dk=dk, window=window_size,
                           out_dtype=ACT_DT)                                   # [B, T, H]
        o_rows = _pad_rows(attn_o.reshape(M, H), Mp)

        # output projection + residual + LayerNorm (fused)
        x2d = _call_rows(
            functools.partial(_mm_res_ln_kernel, mask_in=False, mask_out=False, eps=LN_EPS),
            rows=[o_rows, xm_rows, x2d],
            consts=[lp["wo"], lp["bo"], lp["ln1_g"], lp["ln1_b"]],
            n_out=H, out_dtype=ACT_DT, tile=tile)

        # ---------------- FFN ----------------
        Fdim = lp["ffn_w1"].shape[1]
        if kernel_size == 1:
            h = _call_rows(
                functools.partial(_mm_mask_kernel, act="relu", mask_in=True, mask_out=False),
                rows=[x2d, xm_rows],
                consts=[lp["ffn_w1"], lp["ffn_b1"]],
                n_out=Fdim, out_dtype=ACT_DT, tile=tile)
            x2d = _call_rows(
                functools.partial(_mm_res_ln_kernel, mask_in=True, mask_out=True, eps=LN_EPS),
                rows=[h, xm_rows, x2d],
                consts=[lp["ffn_w2"], lp["ffn_b2"], lp["ln2_g"], lp["ln2_b"]],
                n_out=H, out_dtype=ACT_DT, tile=tile)
        else:
            # kernel_size > 1 fallback (Encoder default is 1): im2col glue + matmul kernels
            x3 = (x2d[:M].reshape(B, T, H).astype(jnp.float32)
                  * mask_f[:, :, None]).astype(ACT_DT)
            xi = _pad_rows(_im2col(x3, kernel_size).reshape(M, kernel_size * H), Mp)
            h = _call_rows(functools.partial(_mm_kernel, act="relu"),
                           rows=[xi], consts=[lp["ffn_w1"], lp["ffn_b1"]],
                           n_out=Fdim, out_dtype=ACT_DT, tile=tile)
            h3 = (h[:M].reshape(B, T, Fdim).astype(jnp.float32)
                  * mask_f[:, :, None]).astype(ACT_DT)
            hi = _pad_rows(_im2col(h3, kernel_size).reshape(M, kernel_size * Fdim), Mp)
            x2d = _call_rows(
                functools.partial(_mm_res_ln_kernel, mask_in=False, mask_out=True, eps=LN_EPS),
                rows=[hi, xm_rows, x2d],
                consts=[lp["ffn_w2"], lp["ffn_b2"], lp["ln2_g"], lp["ln2_b"]],
                n_out=H, out_dtype=ACT_DT, tile=tile)

    # Encoder tail mask + proj (1x1 conv) + output mask, fused into one matmul kernel
    stats = _call_rows(
        functools.partial(_mm_mask_kernel, act=None, mask_in=True, mask_out=True),
        rows=[x2d, xm_rows],
        consts=[prepared["proj_w"], prepared["proj_b"]],
        n_out=2 * out_channels, out_dtype=jnp.float32, tile=tile)
    stats = stats[:M].reshape(B, T, 2 * out_channels)

    m_out = jnp.transpose(stats[..., :out_channels], (0, 2, 1))                # [B, out, T]
    logs = jnp.transpose(stats[..., out_channels:], (0, 2, 1))                 # [B, out, T]
    x_mask = mask_f[:, None, :]                                                # [B, 1, T]
    return m_out, logs, x_mask


# --------------------------------------------------------------------------
# Deterministic parameter init (shapes follow the PyTorch __init__)
# --------------------------------------------------------------------------
def init_params(key, E, H, F, n_heads, n_layers, K, out_ch, window):
    dk = H // n_heads
    it = iter(jax.random.split(key, 8 + 20 * n_layers))

    def nrm(shape, scale):
        return jax.random.normal(next(it), shape, jnp.float32) * scale

    params = {
        "emb_phone_w": nrm((E, H), 1.0 / math.sqrt(E)),      # Linear(E, H) weight^T
        "emb_phone_b": nrm((H,), 0.02),
        "emb_pitch": nrm((256, H), 1.0),                     # Embedding(256, H)
        "proj_w": nrm((H, 2 * out_ch), 1.0 / math.sqrt(H)),  # Conv1d(H, 2*out, 1) weight^T
        "proj_b": nrm((2 * out_ch,), 0.02),
        "layers": [],
    }
    for _ in range(n_layers):
        lp = {
            "wq": nrm((H, H), 1.0 / math.sqrt(H)), "bq": nrm((H,), 0.02),
            "wk": nrm((H, H), 1.0 / math.sqrt(H)), "bk": nrm((H,), 0.02),
            "wv": nrm((H, H), 1.0 / math.sqrt(H)), "bv": nrm((H,), 0.02),
            "wo": nrm((H, H), 1.0 / math.sqrt(H)), "bo": nrm((H,), 0.02),
            "emb_rel_k": nrm((2 * window + 1, dk), dk ** -0.5),
            "emb_rel_v": nrm((2 * window + 1, dk), dk ** -0.5),
            "ln1_g": jnp.ones((H,), jnp.float32), "ln1_b": jnp.zeros((H,), jnp.float32),
            # ffn_w1[k*Cin + c, f] == torch conv_1.weight[f, c, k]
            "ffn_w1": nrm((K * H, F), 1.0 / math.sqrt(K * H)), "ffn_b1": nrm((F,), 0.02),
            "ffn_w2": nrm((K * F, H), 1.0 / math.sqrt(K * F)), "ffn_b2": nrm((H,), 0.02),
            "ln2_g": jnp.ones((H,), jnp.float32), "ln2_b": jnp.zeros((H,), jnp.float32),
        }
        params["layers"].append(lp)
    return params


if __name__ == "__main__":
    B, T = 2, 8
    embedding_dim = 24
    hidden_channels = 32
    filter_channels = 64
    n_heads = 2
    n_layers = 2
    kernel_size = 1          # Encoder default
    p_dropout = 0.0          # dropout is identity
    out_channels = 8
    window_size = 10         # Encoder default

    key = jax.random.PRNGKey(0)
    kp, kpi, kparams = jax.random.split(key, 3)
    phone = jax.random.normal(kp, (B, T, embedding_dim), jnp.float32)
    pitch = jax.random.randint(kpi, (B, T), 0, 256)
    lengths = jnp.array([T, T - 3], dtype=jnp.int32)

    params = init_params(kparams, embedding_dim, hidden_channels, filter_channels,
                         n_heads, n_layers, kernel_size, out_channels, window_size)
    prepared = prepare_params(params, n_heads=n_heads)

    fwd = jax.jit(functools.partial(
        text_encoder_forward,
        hidden_channels=hidden_channels, n_heads=n_heads, n_layers=n_layers,
        kernel_size=kernel_size, out_channels=out_channels, window_size=window_size))

    m, logs, x_mask = fwd(prepared, phone, pitch, lengths, None)

    jax.block_until_ready((m, logs, x_mask))
    assert m.shape == (B, out_channels, T)
    assert logs.shape == (B, out_channels, T)
    assert x_mask.shape == (B, 1, T)
    assert bool(jnp.isfinite(m).all()) and bool(jnp.isfinite(logs).all())
    print("KERNEL_OK")
</pallas_src>

<mosaic_0001>
module attributes {stable_mosaic.version = 11 : i64} {
  func.func @_mm_kernel(%arg0: i32, %arg1: memref<16x32xbf16, #tpu.memory_space<vmem>>, %arg2: memref<32x96xbf16, #tpu.memory_space<vmem>>, %arg3: memref<1x96xf32, #tpu.memory_space<vmem>>, %arg4: memref<16x96xbf16, #tpu.memory_space<vmem>>) attributes {dimension_semantics = [#tpu.dimension_semantics<parallel>], iteration_bounds = array<i64: 1>, scalar_prefetch = 0 : i64, scratch_operands = 0 : i64, tpu.core_type = #tpu.core_type<tc>, window_params = [{transform_indices = @transform_0, window_bounds = array<i64: 16, 32>}, {pipeline_mode = #tpu.pipeline_mode<synchronous>, transform_indices = @transform_1, window_bounds = array<i64: 32, 96>}, {pipeline_mode = #tpu.pipeline_mode<synchronous>, transform_indices = @transform_2, window_bounds = array<i64: 1, 96>}, {transform_indices = @transform_3, window_bounds = array<i64: 16, 96>}]} {
    %c0 = arith.constant 0 : index
    %c0_0 = arith.constant 0 : index
    %0 = vector.load %arg1[%c0, %c0_0] : memref<16x32xbf16, #tpu.memory_space<vmem>>, vector<16x32xbf16>
    %c0_1 = arith.constant 0 : index
    %c0_2 = arith.constant 0 : index
    %1 = vector.load %arg2[%c0_1, %c0_2] : memref<32x96xbf16, #tpu.memory_space<vmem>>, vector<32x96xbf16>
    %cst = arith.constant dense<0.000000e+00> : vector<16x96xf32>
    %2 = tpu.matmul %0, %1, %cst {dimension_numbers = #tpu.dot_dimension_numbers<[1], [0], [0], [1], [0, 0, 1, 1], [], []>} : vector<16x32xbf16>, vector<32x96xbf16>, vector<16x96xf32> -> vector<16x96xf32>
    %c0_3 = arith.constant 0 : index
    %c0_4 = arith.constant 0 : index
    %3 = vector.load %arg3[%c0_3, %c0_4] : memref<1x96xf32, #tpu.memory_space<vmem>>, vector<1x96xf32>
    %4 = vector.broadcast %3 : vector<1x96xf32> to vector<16x96xf32>
    %5 = arith.addf %2, %4 : vector<16x96xf32>
    %6 = arith.truncf %5 : vector<16x96xf32> to vector<16x96xbf16>
    %c0_5 = arith.constant 0 : index
    %c0_6 = arith.constant 0 : index
    %7 = vector.load %arg4[%c0_5, %c0_6] : memref<16x96xbf16, #tpu.memory_space<vmem>>, vector<16x96xbf16>
    tpu.vector_store %arg4[%c0_5, %c0_6], %6 {strides = array<i32>} : memref<16x96xbf16, #tpu.memory_space<vmem>>, vector<16x96xbf16>,
    return
  }
  func.func @transform_0(%arg0: i32) -> (i32, i32) {
    %c0_i32 = arith.constant 0 : i32
    %c0_i32_0 = arith.constant 0 : i32
    return %arg0, %c0_i32 : i32, i32
  }
  func.func @transform_1(%arg0: i32) -> (i32, i32) {
    %c0_i32 = arith.constant 0 : i32
    %c0_i32_0 = arith.constant 0 : i32
    %c0_i32_1 = arith.constant 0 : i32
    return %c0_i32, %c0_i32_0 : i32, i32
  }
  func.func @transform_2(%arg0: i32) -> (i32, i32) {
    %c0_i32 = arith.constant 0 : i32
    %c0_i32_0 = arith.constant 0 : i32
    %c0_i32_1 = arith.constant 0 : i32
    return %c0_i32, %c0_i32_0 : i32, i32
  }
  func.func @transform_3(%arg0: i32) -> (i32, i32) {
    %c0_i32 = arith.constant 0 : i32
    %c0_i32_0 = arith.constant 0 : i32
    return %arg0, %c0_i32 : i32, i32
  }
}

module attributes {stable_mosaic.version = 11 : i64} {
  func.func @_embed_kernel(%arg0: i32, %arg1: memref<16x24xbf16, #tpu.memory_space<vmem>>, %arg2: memref<16x32xbf16, #tpu.memory_space<vmem>>, %arg3: memref<16x1xbf16, #tpu.memory_space<vmem>>, %arg4: memref<24x32xbf16, #tpu.memory_space<vmem>>, %arg5: memref<1x32xf32, #tpu.memory_space<vmem>>, %arg6: memref<16x32xbf16, #tpu.memory_space<vmem>>) attributes {dimension_semantics = [#tpu.dimension_semantics<parallel>], iteration_bounds = array<i64: 1>, scalar_prefetch = 0 : i64, scratch_operands = 0 : i64, tpu.core_type = #tpu.core_type<tc>, window_params = [{transform_indices = @transform_0, window_bounds = array<i64: 16, 24>}, {transform_indices = @transform_1, window_bounds = array<i64: 16, 32>}, {transform_indices = @transform_2, window_bounds = array<i64: 16, 1>}, {pipeline_mode = #tpu.pipeline_mode<synchronous>, transform_indices = @transform_3, window_bounds = array<i64: 24, 32>}, {pipeline_mode = #tpu.pipeline_mode<synchronous>, transform_indices = @transform_4, window_bounds = array<i64: 1, 32>}, {transform_indices = @transform_5, window_bounds = array<i64: 16, 32>}]} {
    %c0 = arith.constant 0 : index
    %c0_0 = arith.constant 0 : index
    %0 = vector.load %arg1[%c0, %c0_0] : memref<16x24xbf16, #tpu.memory_space<vmem>>, vector<16x24xbf16>
    %c0_1 = arith.constant 0 : index
    %c0_2 = arith.constant 0 : index
    %1 = vector.load %arg4[%c0_1, %c0_2] : memref<24x32xbf16, #tpu.memory_space<vmem>>, vector<24x32xbf16>
    %cst = arith.constant dense<0.000000e+00> : vector<16x32xf32>
    %2 = tpu.matmul %0, %1, %cst {dimension_numbers = #tpu.dot_dimension_numbers<[1], [0], [0], [1], [0, 0, 1, 1], [], []>} : vector<16x24xbf16>, vector<24x32xbf16>, vector<16x32xf32> -> vector<16x32xf32>
    %c0_3 = arith.constant 0 : index
    %c0_4 = arith.constant 0 : index
    %3 = vector.load %arg5[%c0_3, %c0_4] : memref<1x32xf32, #tpu.memory_space<vmem>>, vector<1x32xf32>
    %4 = vector.broadcast %3 : vector<1x32xf32> to vector<16x32xf32>
    %5 = arith.addf %2, %4 : vector<16x32xf32>
    %c0_5 = arith.constant 0 : index
    %c0_6 = arith.constant 0 : index
    %6 = vector.load %arg2[%c0_5, %c0_6] : memref<16x32xbf16, #tpu.memory_space<vmem>>, vector<16x32xbf16>
    %7 = arith.extf %6 : vector<16x32xbf16> to vector<16x32xf32>
    %8 = arith.addf %5, %7 : vector<16x32xf32>
    %cst_7 = arith.constant 5.65685415 : f32
    %9 = vector.broadcast %cst_7 : f32 to vector<16x32xf32>
    %10 = arith.mulf %8, %9 : vector<16x32xf32>
    %cst_8 = arith.constant 0.000000e+00 : f32
    %11 = vector.broadcast %cst_8 : f32 to vector<16x32xf32>
    %12 = arith.cmpf oge, %10, %11 : vector<16x32xf32>
    %cst_9 = arith.constant 1.000000e-01 : f32
    %13 = vector.broadcast %cst_9 : f32 to vector<16x32xf32>
    %14 = arith.mulf %13, %10 : vector<16x32xf32>
    %15 = arith.select %12, %10, %14 : vector<16x32xi1>, vector<16x32xf32>
    %c0_10 = arith.constant 0 : index
    %c0_11 = arith.constant 0 : index
    %16 = vector.load %arg3[%c0_10, %c0_11] : memref<16x1xbf16, #tpu.memory_space<vmem>>, vector<16x1xbf16>
    %17 = arith.extf %16 : vector<16x1xbf16> to vector<16x1xf32>
    %18 = vector.broadcast %17 : vector<16x1xf32> to vector<16x32xf32>
    %19 = arith.mulf %15, %18 : vector<16x32xf32>
    %20 = arith.truncf %19 : vector<16x32xf32> to vector<16x32xbf16>
    %c0_12 = arith.constant 0 : index
    %c0_13 = arith.constant 0 : index
    %21 = vector.load %arg6[%c0_12, %c0_13] : memref<16x32xbf16, #tpu.memory_space<vmem>>, vector<16x32xbf16>
    tpu.vector_store %arg6[%c0_12, %c0_13], %20 {strides = array<i32>} : memref<16x32xbf16, #tpu.memory_space<vmem>>, vector<16x32xbf16>,
    return
  }
  func.func @transform_0(%arg0: i32) -> (i32, i32) {
    %c0_i32 = arith.constant 0 : i32
    %c0_i32_0 = arith.constant 0 : i32
    return %arg0, %c0_i32 : i32, i32
  }
  func.func @transform_1(%arg0: i32) -> (i32, i32) {
    %c0_i32 = arith.constant 0 : i32
    %c0_i32_0 = arith.constant 0 : i32
    return %arg0, %c0_i32 : i32, i32
  }
  func.func @transform_2(%arg0: i32) -> (i32, i32) {
    %c0_i32 = arith.constant 0 : i32
    %c0_i32_0 = arith.constant 0 : i32
    return %arg0, %c0_i32 : i32, i32
  }
  func.func @transform_3(%arg0: i32) -> (i32, i32) {
    %c0_i32 = arith.constant 0 : i32
    %c0_i32_0 = arith.constant 0 : i32
    %c0_i32_1 = arith.constant 0 : i32
    return %c0_i32, %c0_i32_0 : i32, i32
  }
  func.func @transform_4(%arg0: i32) -> (i32, i32) {
    %c0_i32 = arith.constant 0 : i32
    %c0_i32_0 = arith.constant 0 : i32
    %c0_i32_1 = arith.constant 0 : i32
    return %c0_i32, %c0_i32_0 : i32, i32
  }
  func.func @transform_5(%arg0: i32) -> (i32, i32) {
    %c0_i32 = arith.constant 0 : i32
    %c0_i32_0 = arith.constant 0 : i32
    return %arg0, %c0_i32 : i32, i32
  }
}

module attributes {stable_mosaic.version = 11 : i64} {
  func.func @_mm_res_ln_kernel(%arg0: i32, %arg1: memref<16x32xbf16, #tpu.memory_space<vmem>>, %arg2: memref<16x1xbf16, #tpu.memory_space<vmem>>, %arg3: memref<16x32xbf16, #tpu.memory_space<vmem>>, %arg4: memref<32x32xbf16, #tpu.memory_space<vmem>>, %arg5: memref<1x32xf32, #tpu.memory_space<vmem>>, %arg6: memref<1x32xf32, #tpu.memory_space<vmem>>, %arg7: memref<1x32xf32, #tpu.memory_space<vmem>>, %arg8: memref<16x32xbf16, #tpu.memory_space<vmem>>) attributes {dimension_semantics = [#tpu.dimension_semantics<parallel>], iteration_bounds = array<i64: 1>, scalar_prefetch = 0 : i64, scratch_operands = 0 : i64, tpu.core_type = #tpu.core_type<tc>, window_params = [{transform_indices = @transform_0, window_bounds = array<i64: 16, 32>}, {transform_indices = @transform_1, window_bounds = array<i64: 16, 1>}, {transform_indices = @transform_2, window_bounds = array<i64: 16, 32>}, {pipeline_mode = #tpu.pipeline_mode<synchronous>, transform_indices = @transform_3, window_bounds = array<i64: 32, 32>}, {pipeline_mode = #tpu.pipeline_mode<synchronous>, transform_indices = @transform_4, window_bounds = array<i64: 1, 32>}, {pipeline_mode = #tpu.pipeline_mode<synchronous>, transform_indices = @transform_5, window_bounds = array<i64: 1, 32>}, {pipeline_mode = #tpu.pipeline_mode<synchronous>, transform_indices = @transform_6, window_bounds = array<i64: 1, 32>}, {transform_indices = @transform_7, window_bounds = array<i64: 16, 32>}]} {
    %c0 = arith.constant 0 : index
    %c0_0 = arith.constant 0 : index
    %0 = vector.load %arg1[%c0, %c0_0] : memref<16x32xbf16, #tpu.memory_space<vmem>>, vector<16x32xbf16>
    %c0_1 = arith.constant 0 : index
    %c0_2 = arith.constant 0 : index
    %1 = vector.load %arg4[%c0_1, %c0_2] : memref<32x32xbf16, #tpu.memory_space<vmem>>, vector<32x32xbf16>
    %cst = arith.constant dense<0.000000e+00> : vector<16x32xf32>
    %2 = tpu.matmul %0, %1, %cst {dimension_numbers = #tpu.dot_dimension_numbers<[1], [0], [0], [1], [0, 0, 1, 1], [], []>} : vector<16x32xbf16>, vector<32x32xbf16>, vector<16x32xf32> -> vector<16x32xf32>
    %c0_3 = arith.constant 0 : index
    %c0_4 = arith.constant 0 : index
    %3 = vector.load %arg5[%c0_3, %c0_4] : memref<1x32xf32, #tpu.memory_space<vmem>>, vector<1x32xf32>
    %4 = vector.broadcast %3 : vector<1x32xf32> to vector<16x32xf32>
    %5 = arith.addf %2, %4 : vector<16x32xf32>
    %c0_5 = arith.constant 0 : index
    %c0_6 = arith.constant 0 : index
    %6 = vector.load %arg3[%c0_5, %c0_6] : memref<16x32xbf16, #tpu.memory_space<vmem>>, vector<16x32xbf16>
    %7 = arith.extf %6 : vector<16x32xbf16> to vector<16x32xf32>
    %8 = arith.addf %7, %5 : vector<16x32xf32>
    %cst_7 = arith.constant dense<0.000000e+00> : vector<16xf32>
    %9 = vector.multi_reduction <add>, %8, %cst_7 [1] : vector<16x32xf32> to vector<16xf32>
    %10 = vector.shape_cast %9 : vector<16xf32> to vector<16x1xf32>
    %cst_8 = arith.constant 3.200000e+01 : f32
    %11 = vector.broadcast %cst_8 : f32 to vector<16x1xf32>
    %12 = arith.divf %10, %11 : vector<16x1xf32>
    %13 = vector.broadcast %12 : vector<16x1xf32> to vector<16x32xf32>
    %14 = arith.subf %8, %13 : vector<16x32xf32>
    %15 = arith.mulf %14, %14 : vector<16x32xf32>
    %cst_9 = arith.constant dense<0.000000e+00> : vector<16xf32>
    %16 = vector.multi_reduction <add>, %15, %cst_9 [1] : vector<16x32xf32> to vector<16xf32>
    %17 = vector.shape_cast %16 : vector<16xf32> to vector<16x1xf32>
    %cst_10 = arith.constant 3.200000e+01 : f32
    %18 = vector.broadcast %cst_10 : f32 to vector<16x1xf32>
    %19 = arith.divf %17, %18 : vector<16x1xf32>
    %cst_11 = arith.constant 9.99999974E-6 : f32
    %20 = vector.broadcast %cst_11 : f32 to vector<16x1xf32>
    %21 = arith.addf %19, %20 : vector<16x1xf32>
    %22 = math.rsqrt %21 : vector<16x1xf32>
    %23 = vector.broadcast %22 : vector<16x1xf32> to vector<16x32xf32>
    %24 = arith.mulf %14, %23 : vector<16x32xf32>
    %c0_12 = arith.constant 0 : index
    %c0_13 = arith.constant 0 : index
    %25 = vector.load %arg6[%c0_12, %c0_13] : memref<1x32xf32, #tpu.memory_space<vmem>>, vector<1x32xf32>
    %26 = vector.broadcast %25 : vector<1x32xf32> to vector<16x32xf32>
    %27 = arith.mulf %24, %26 : vector<16x32xf32>
    %c0_14 = arith.constant 0 : index
    %c0_15 = arith.constant 0 : index
    %28 = vector.load %arg7[%c0_14, %c0_15] : memref<1x32xf32, #tpu.memory_space<vmem>>, vector<1x32xf32>
    %29 = vector.broadcast %28 : vector<1x32xf32> to vector<16x32xf32>
    %30 = arith.addf %27, %29 : vector<16x32xf32>
    %31 = arith.truncf %30 : vector<16x32xf32> to vector<16x32xbf16>
    %c0_16 = arith.constant 0 : index
    %c0_17 = arith.constant 0 : index
    %32 = vector.load %arg8[%c0_16, %c0_17] : memref<16x32xbf16, #tpu.memory_space<vmem>>, vector<16x32xbf16>
    tpu.vector_store %arg8[%c0_16, %c0_17], %31 {strides = array<i32>} : memref<16x32xbf16, #tpu.memory_space<vmem>>, vector<16x32xbf16>,
    return
  }
  func.func @transform_0(%arg0: i32) -> (i32, i32) {
    %c0_i32 = arith.constant 0 : i32
    %c0_i32_0 = arith.constant 0 : i32
    return %arg0, %c0_i32 : i32, i32
  }
  func.func @transform_1(%arg0: i32) -> (i32, i32) {
    %c0_i32 = arith.constant 0 : i32
    %c0_i32_0 = arith.constant 0 : i32
    return %arg0, %c0_i32 : i32, i32
  }
  func.func @transform_2(%arg0: i32) -> (i32, i32) {
    %c0_i32 = arith.constant 0 : i32
    %c0_i32_0 = arith.constant 0 : i32
    return %arg0, %c0_i32 : i32, i32
  }
  func.func @transform_3(%arg0: i32) -> (i32, i32) {
    %c0_i32 = arith.constant 0 : i32
    %c0_i32_0 = arith.constant 0 : i32
    %c0_i32_1 = arith.constant 0 : i32
    return %c0_i32, %c0_i32_0 : i32, i32
  }
  func.func @transform_4(%arg0: i32) -> (i32, i32) {
    %c0_i32 = arith.constant 0 : i32
    %c0_i32_0 = arith.constant 0 : i32
    %c0_i32_1 = arith.constant 0 : i32
    return %c0_i32, %c0_i32_0 : i32, i32
  }
  func.func @transform_5(%arg0: i32) -> (i32, i32) {
    %c0_i32 = arith.constant 0 : i32
    %c0_i32_0 = arith.constant 0 : i32
    %c0_i32_1 = arith.constant 0 : i32
    return %c0_i32, %c0_i32_0 : i32, i32
  }
  func.func @transform_6(%arg0: i32) -> (i32, i32) {
    %c0_i32 = arith.constant 0 : i32
    %c0_i32_0 = arith.constant 0 : i32
    %c0_i32_1 = arith.constant 0 : i32
    return %c0_i32, %c0_i32_0 : i32, i32
  }
  func.func @transform_7(%arg0: i32) -> (i32, i32) {
    %c0_i32 = arith.constant 0 : i32
    %c0_i32_0 = arith.constant 0 : i32
    return %arg0, %c0_i32 : i32, i32
  }
}

module attributes {stable_mosaic.version = 11 : i64} {
  func.func @_attn_kernel(%arg0: i32, %arg1: i32, %arg2: memref<1x8x96xbf16, #tpu.memory_space<vmem>>, %arg3: memref<1x8x96xbf16, #tpu.memory_space<vmem>>, %arg4: memref<1x1x8xf32, #tpu.memory_space<vmem>>, %arg5: memref<21x16xbf16, #tpu.memory_space<vmem>>, %arg6: memref<21x16xbf16, #tpu.memory_space<vmem>>, %arg7: memref<1x8x32xbf16, #tpu.memory_space<vmem>>) attributes {dimension_semantics = [#tpu.dimension_semantics<parallel>, #tpu.dimension_semantics<parallel>], iteration_bounds = array<i64: 2, 1>, scalar_prefetch = 0 : i64, scratch_operands = 0 : i64, tpu.core_type = #tpu.core_type<tc>, window_params = [{transform_indices = @transform_0, window_bounds = array<i64: 1, 8, 96>}, {transform_indices = @transform_1, window_bounds = array<i64: 1, 8, 96>}, {transform_indices = @transform_2, window_bounds = array<i64: 1, 1, 8>}, {pipeline_mode = #tpu.pipeline_mode<synchronous>, transform_indices = @transform_3, window_bounds = array<i64: 21, 16>}, {pipeline_mode = #tpu.pipeline_mode<synchronous>, transform_indices = @transform_4, window_bounds = array<i64: 21, 16>}, {transform_indices = @transform_5, window_bounds = array<i64: 1, 8, 32>}]} {
    %c0 = arith.constant 0 : index
    %c0_0 = arith.constant 0 : index
    %c0_1 = arith.constant 0 : index
    %0 = vector.load %arg2[%c0, %c0_0, %c0_1] : memref<1x8x96xbf16, #tpu.memory_space<vmem>>, vector<1x8x96xbf16>
    %1 = vector.shape_cast %0 : vector<1x8x96xbf16> to vector<8x96xbf16>
    %c0_2 = arith.constant 0 : index
    %c0_3 = arith.constant 0 : index
    %c0_4 = arith.constant 0 : index
    %2 = vector.load %arg3[%c0_2, %c0_3, %c0_4] : memref<1x8x96xbf16, #tpu.memory_space<vmem>>, vector<1x8x96xbf16>
    %3 = vector.shape_cast %2 : vector<1x8x96xbf16> to vector<8x96xbf16>
    %c0_5 = arith.constant 0 : index
    %c0_6 = arith.constant 0 : index
    %c0_7 = arith.constant 0 : index
    %4 = vector.load %arg4[%c0_5, %c0_6, %c0_7] : memref<1x1x8xf32, #tpu.memory_space<vmem>>, vector<1x1x8xf32>
    %5 = vector.shape_cast %4 : vector<1x1x8xf32> to vector<1x8xf32>
    %c0_8 = arith.constant 0 : index
    %c0_9 = arith.constant 0 : index
    %6 = vector.load %arg5[%c0_8, %c0_9] : memref<21x16xbf16, #tpu.memory_space<vmem>>, vector<21x16xbf16>
    %c0_10 = arith.constant 0 : index
    %c0_11 = arith.constant 0 : index
    %7 = vector.load %arg6[%c0_10, %c0_11] : memref<21x16xbf16, #tpu.memory_space<vmem>>, vector<21x16xbf16>
    %8 = arith.extf %7 : vector<21x16xbf16> to vector<21x16xf32>
    %9 = tpu.iota {dimensions = array<i32: 0>} : vector<8x8xi32>
    %c8_i32 = arith.constant 8 : i32
    %10 = arith.muli %arg1, %c8_i32 : i32
    %11 = vector.broadcast %10 : i32 to vector<8x8xi32>
    %12 = arith.addi %9, %11 : vector<8x8xi32>
    %13 = tpu.iota {dimensions = array<i32: 1>} : vector<8x8xi32>
    %14 = arith.subi %13, %12 : vector<8x8xi32>
    %15 = vector.extract_strided_slice %1 {offsets = [0, 0], sizes = [8, 16], strides = [1, 1]} : vector<8x96xbf16> to vector<8x16xbf16>
    %16 = vector.extract_strided_slice %3 {offsets = [0, 32], sizes = [8, 16], strides = [1, 1]} : vector<8x96xbf16> to vector<8x16xbf16>
    %17 = vector.extract_strided_slice %3 {offsets = [0, 64], sizes = [8, 16], strides = [1, 1]} : vector<8x96xbf16> to vector<8x16xbf16>
    %cst = arith.constant dense<0.000000e+00> : vector<8x8xf32>
    %18 = tpu.matmul %15, %16, %cst {dimension_numbers = #tpu.dot_dimension_numbers<[1], [1], [0], [0], [0, 0, 1, 0], [], []>} : vector<8x16xbf16>, vector<8x16xbf16>, vector<8x8xf32> -> vector<8x8xf32>
    %cst_12 = arith.constant dense<0.000000e+00> : vector<8x21xf32>
    %19 = tpu.matmul %15, %6, %cst_12 {dimension_numbers = #tpu.dot_dimension_numbers<[1], [1], [0], [0], [0, 0, 1, 0], [], []>} : vector<8x16xbf16>, vector<21x16xbf16>, vector<8x21xf32> -> vector<8x21xf32>
    %c-7_i32 = arith.constant -7 : i32
    %20 = vector.broadcast %c-7_i32 : i32 to vector<8x8xi32>
    %21 = arith.cmpi eq, %14, %20 : vector<8x8xi32>
    %22 = vector.extract_strided_slice %19 {offsets = [0, 3], sizes = [8, 1], strides = [1, 1]} : vector<8x21xf32> to vector<8x1xf32>
    %cst_13 = arith.constant 0.000000e+00 : f32
    %23 = vector.shape_cast %22 : vector<8x1xf32> to vector<8x1xf32>
    %24 = vector.broadcast %23 : vector<8x1xf32> to vector<8x8xf32>
    %25 = vector.broadcast %cst_13 : f32 to vector<8x8xf32>
    %26 = arith.select %21, %24, %25 : vector<8x8xi1>, vector<8x8xf32>
    %27 = arith.addf %18, %26 : vector<8x8xf32>
    %c-6_i32 = arith.constant -6 : i32
    %28 = vector.broadcast %c-6_i32 : i32 to vector<8x8xi32>
    %29 = arith.cmpi eq, %14, %28 : vector<8x8xi32>
    %30 = vector.extract_strided_slice %19 {offsets = [0, 4], sizes = [8, 1], strides = [1, 1]} : vector<8x21xf32> to vector<8x1xf32>
    %cst_14 = arith.constant 0.000000e+00 : f32
    %31 = vector.shape_cast %30 : vector<8x1xf32> to vector<8x1xf32>
    %32 = vector.broadcast %31 : vector<8x1xf32> to vector<8x8xf32>
    %33 = vector.broadcast %cst_14 : f32 to vector<8x8xf32>
    %34 = arith.select %29, %32, %33 : vector<8x8xi1>, vector<8x8xf32>
    %35 = arith.addf %27, %34 : vector<8x8xf32>
    %c-5_i32 = arith.constant -5 : i32
    %36 = vector.broadcast %c-5_i32 : i32 to vector<8x8xi32>
    %37 = arith.cmpi eq, %14, %36 : vector<8x8xi32>
    %38 = vector.extract_strided_slice %19 {offsets = [0, 5], sizes = [8, 1], strides = [1, 1]} : vector<8x21xf32> to vector<8x1xf32>
    %cst_15 = arith.constant 0.000000e+00 : f32
    %39 = vector.shape_cast %38 : vector<8x1xf32> to vector<8x1xf32>
    %40 = vector.broadcast %39 : vector<8x1xf32> to vector<8x8xf32>
    %41 = vector.broadcast %cst_15 : f32 to vector<8x8xf32>
    %42 = arith.select %37, %40, %41 : vector<8x8xi1>, vector<8x8xf32>
    %43 = arith.addf %35, %42 : vector<8x8xf32>
    %c-4_i32 = arith.constant -4 : i32
    %44 = vector.broadcast %c-4_i32 : i32 to vector<8x8xi32>
    %45 = arith.cmpi eq, %14, %44 : vector<8x8xi32>
    %46 = vector.extract_strided_slice %19 {offsets = [0, 6], sizes = [8, 1], strides = [1, 1]} : vector<8x21xf32> to vector<8x1xf32>
    %cst_16 = arith.constant 0.000000e+00 : f32
    %47 = vector.shape_cast %46 : vector<8x1xf32> to vector<8x1xf32>
    %48 = vector.broadcast %47 : vector<8x1xf32> to vector<8x8xf32>
    %49 = vector.broadcast %cst_16 : f32 to vector<8x8xf32>
    %50 = arith.select %45, %48, %49 : vector<8x8xi1>, vector<8x8xf32>
    %51 = arith.addf %43, %50 : vector<8x8xf32>
    %c-3_i32 = arith.constant -3 : i32
    %52 = vector.broadcast %c-3_i32 : i32 to vector<8x8xi32>
    %53 = arith.cmpi eq, %14, %52 : vector<8x8xi32>
    %54 = vector.extract_strided_slice %19 {offsets = [0, 7], sizes = [8, 1], strides = [1, 1]} : vector<8x21xf32> to vector<8x1xf32>
    %cst_17 = arith.constant 0.000000e+00 : f32
    %55 = vector.shape_cast %54 : vector<8x1xf32> to vector<8x1xf32>
    %56 = vector.broadcast %55 : vector<8x1xf32> to vector<8x8xf32>
    %57 = vector.broadcast %cst_17 : f32 to vector<8x8xf32>
    %58 = arith.select %53, %56, %57 : vector<8x8xi1>, vector<8x8xf32>
    %59 = arith.addf %51, %58 : vector<8x8xf32>
    %c-2_i32 = arith.constant -2 : i32
    %60 = vector.broadcast %c-2_i32 : i32 to vector<8x8xi32>
    %61 = arith.cmpi eq, %14, %60 : vector<8x8xi32>
    %62 = vector.extract_strided_slice %19 {offsets = [0, 8], sizes = [8, 1], strides = [1, 1]} : vector<8x21xf32> to vector<8x1xf32>
    %cst_18 = arith.constant 0.000000e+00 : f32
    %63 = vector.shape_cast %62 : vector<8x1xf32> to vector<8x1xf32>
    %64 = vector.broadcast %63 : vector<8x1xf32> to vector<8x8xf32>
    %65 = vector.broadcast %cst_18 : f32 to vector<8x8xf32>
    %66 = arith.select %61, %64, %65 : vector<8x8xi1>, vector<8x8xf32>
    %67 = arith.addf %59, %66 : vector<8x8xf32>
    %c-1_i32 = arith.constant -1 : i32
    %68 = vector.broadcast %c-1_i32 : i32 to vector<8x8xi32>
    %69 = arith.cmpi eq, %14, %68 : vector<8x8xi32>
    %70 = vector.extract_strided_slice %19 {offsets = [0, 9], sizes = [8, 1], strides = [1, 1]} : vector<8x21xf32> to vector<8x1xf32>
    %cst_19 = arith.constant 0.000000e+00 : f32
    %71 = vector.shape_cast %70 : vector<8x1xf32> to vector<8x1xf32>
    %72 = vector.broadcast %71 : vector<8x1xf32> to vector<8x8xf32>
    %73 = vector.broadcast %cst_19 : f32 to vector<8x8xf32>
    %74 = arith.select %69, %72, %73 : vector<8x8xi1>, vector<8x8xf32>
    %75 = arith.addf %67, %74 : vector<8x8xf32>
    %c0_i32 = arith.constant 0 : i32
    %76 = vector.broadcast %c0_i32 : i32 to vector<8x8xi32>
    %77 = arith.cmpi eq, %14, %76 : vector<8x8xi32>
    %78 = vector.extract_strided_slice %19 {offsets = [0, 10], sizes = [8, 1], strides = [1, 1]} : vector<8x21xf32> to vector<8x1xf32>
    %cst_20 = arith.constant 0.000000e+00 : f32
    %79 = vector.shape_cast %78 : vector<8x1xf32> to vector<8x1xf32>
    %80 = vector.broadcast %79 : vector<8x1xf32> to vector<8x8xf32>
    %81 = vector.broadcast %cst_20 : f32 to vector<8x8xf32>
    %82 = arith.select %77, %80, %81 : vector<8x8xi1>, vector<8x8xf32>
    %83 = arith.addf %75, %82 : vector<8x8xf32>
    %c1_i32 = arith.constant 1 : i32
    %84 = vector.broadcast %c1_i32 : i32 to vector<8x8xi32>
    %85 = arith.cmpi eq, %14, %84 : vector<8x8xi32>
    %86 = vector.extract_strided_slice %19 {offsets = [0, 11], sizes = [8, 1], strides = [1, 1]} : vector<8x21xf32> to vector<8x1xf32>
    %cst_21 = arith.constant 0.000000e+00 : f32
    %87 = vector.shape_cast %86 : vector<8x1xf32> to vector<8x1xf32>
    %88 = vector.broadcast %87 : vector<8x1xf32> to vector<8x8xf32>
    %89 = vector.broadcast %cst_21 : f32 to vector<8x8xf32>
    %90 = arith.select %85, %88, %89 : vector<8x8xi1>, vector<8x8xf32>
    %91 = arith.addf %83, %90 : vector<8x8xf32>
    %c2_i32 = arith.constant 2 : i32
    %92 = vector.broadcast %c2_i32 : i32 to vector<8x8xi32>
    %93 = arith.cmpi eq, %14, %92 : vector<8x8xi32>
    %94 = vector.extract_strided_slice %19 {offsets = [0, 12], sizes = [8, 1], strides = [1, 1]} : vector<8x21xf32> to vector<8x1xf32>
    %cst_22 = arith.constant 0.000000e+00 : f32
    %95 = vector.shape_cast %94 : vector<8x1xf32> to vector<8x1xf32>
    %96 = vector.broadcast %95 : vector<8x1xf32> to vector<8x8xf32>
    %97 = vector.broadcast %cst_22 : f32 to vector<8x8xf32>
    %98 = arith.select %93, %96, %97 : vector<8x8xi1>, vector<8x8xf32>
    %99 = arith.addf %91, %98 : vector<8x8xf32>
    %c3_i32 = arith.constant 3 : i32
    %100 = vector.broadcast %c3_i32 : i32 to vector<8x8xi32>
    %101 = arith.cmpi eq, %14, %100 : vector<8x8xi32>
    %102 = vector.extract_strided_slice %19 {offsets = [0, 13], sizes = [8, 1], strides = [1, 1]} : vector<8x21xf32> to vector<8x1xf32>
    %cst_23 = arith.constant 0.000000e+00 : f32
    %103 = vector.shape_cast %102 : vector<8x1xf32> to vector<8x1xf32>
    %104 = vector.broadcast %103 : vector<8x1xf32> to vector<8x8xf32>
    %105 = vector.broadcast %cst_23 : f32 to vector<8x8xf32>
    %106 = arith.select %101, %104, %105 : vector<8x8xi1>, vector<8x8xf32>
    %107 = arith.addf %99, %106 : vector<8x8xf32>
    %c4_i32 = arith.constant 4 : i32
    %108 = vector.broadcast %c4_i32 : i32 to vector<8x8xi32>
    %109 = arith.cmpi eq, %14, %108 : vector<8x8xi32>
    %110 = vector.extract_strided_slice %19 {offsets = [0, 14], sizes = [8, 1], strides = [1, 1]} : vector<8x21xf32> to vector<8x1xf32>
    %cst_24 = arith.constant 0.000000e+00 : f32
    %111 = vector.shape_cast %110 : vector<8x1xf32> to vector<8x1xf32>
    %112 = vector.broadcast %111 : vector<8x1xf32> to vector<8x8xf32>
    %113 = vector.broadcast %cst_24 : f32 to vector<8x8xf32>
    %114 = arith.select %109, %112, %113 : vector<8x8xi1>, vector<8x8xf32>
    %115 = arith.addf %107, %114 : vector<8x8xf32>
    %c5_i32 = arith.constant 5 : i32
    %116 = vector.broadcast %c5_i32 : i32 to vector<8x8xi32>
    %117 = arith.cmpi eq, %14, %116 : vector<8x8xi32>
    %118 = vector.extract_strided_slice %19 {offsets = [0, 15], sizes = [8, 1], strides = [1, 1]} : vector<8x21xf32> to vector<8x1xf32>
    %cst_25 = arith.constant 0.000000e+00 : f32
    %119 = vector.shape_cast %118 : vector<8x1xf32> to vector<8x1xf32>
    %120 = vector.broadcast %119 : vector<8x1xf32> to vector<8x8xf32>
    %121 = vector.broadcast %cst_25 : f32 to vector<8x8xf32>
    %122 = arith.select %117, %120, %121 : vector<8x8xi1>, vector<8x8xf32>
    %123 = arith.addf %115, %122 : vector<8x8xf32>
    %c6_i32 = arith.constant 6 : i32
    %124 = vector.broadcast %c6_i32 : i32 to vector<8x8xi32>
    %125 = arith.cmpi eq, %14, %124 : vector<8x8xi32>
    %126 = vector.extract_strided_slice %19 {offsets = [0, 16], sizes = [8, 1], strides = [1, 1]} : vector<8x21xf32> to vector<8x1xf32>
    %cst_26 = arith.constant 0.000000e+00 : f32
    %127 = vector.shape_cast %126 : vector<8x1xf32> to vector<8x1xf32>
    %128 = vector.broadcast %127 : vector<8x1xf32> to vector<8x8xf32>
    %129 = vector.broadcast %cst_26 : f32 to vector<8x8xf32>
    %130 = arith.select %125, %128, %129 : vector<8x8xi1>, vector<8x8xf32>
    %131 = arith.addf %123, %130 : vector<8x8xf32>
    %c7_i32 = arith.constant 7 : i32
    %132 = vector.broadcast %c7_i32 : i32 to vector<8x8xi32>
    %133 = arith.cmpi eq, %14, %132 : vector<8x8xi32>
    %134 = vector.extract_strided_slice %19 {offsets = [0, 17], sizes = [8, 1], strides = [1, 1]} : vector<8x21xf32> to vector<8x1xf32>
    %cst_27 = arith.constant 0.000000e+00 : f32
    %135 = vector.shape_cast %134 : vector<8x1xf32> to vector<8x1xf32>
    %136 = vector.broadcast %135 : vector<8x1xf32> to vector<8x8xf32>
    %137 = vector.broadcast %cst_27 : f32 to vector<8x8xf32>
    %138 = arith.select %133, %136, %137 : vector<8x8xi1>, vector<8x8xf32>
    %139 = arith.addf %131, %138 : vector<8x8xf32>
    %cst_28 = arith.constant 0.000000e+00 : f32
    %140 = vector.broadcast %cst_28 : f32 to vector<1x8xf32>
    %141 = arith.cmpf oeq, %5, %140 : vector<1x8xf32>
    %cst_29 = arith.constant -1.000000e+04 : f32
    %142 = vector.shape_cast %141 : vector<1x8xi1> to vector<1x8xi1>
    %143 = vector.broadcast %142 : vector<1x8xi1> to vector<8x8xi1>
    %144 = vector.broadcast %cst_29 : f32 to vector<8x8xf32>
    %145 = arith.select %143, %144, %139 : vector<8x8xi1>, vector<8x8xf32>
    %cst_30 = arith.constant dense<0xFF800000> : vector<8xf32>
    %146 = vector.multi_reduction <maximumf>, %145, %cst_30 [1] : vector<8x8xf32> to vector<8xf32>
    %147 = vector.shape_cast %146 : vector<8xf32> to vector<8x1xf32>
    %148 = vector.broadcast %147 : vector<8x1xf32> to vector<8x8xf32>
    %149 = arith.subf %145, %148 : vector<8x8xf32>
    %150 = math.exp %149 : vector<8x8xf32>
    %cst_31 = arith.constant dense<0.000000e+00> : vector<8xf32>
    %151 = vector.multi_reduction <add>, %150, %cst_31 [1] : vector<8x8xf32> to vector<8xf32>
    %152 = vector.shape_cast %151 : vector<8xf32> to vector<8x1xf32>
    %153 = tpu.reciprocal %152 {approx = true} : vector<8x1xf32> -> vector<8x1xf32>
    %154 = vector.broadcast %153 : vector<8x1xf32> to vector<8x8xf32>
    %155 = arith.mulf %150, %154 : vector<8x8xf32>
    %156 = arith.truncf %155 : vector<8x8xf32> to vector<8x8xbf16>
    %cst_32 = arith.constant dense<0.000000e+00> : vector<8x16xf32>
    %157 = tpu.matmul %156, %17, %cst_32 {dimension_numbers = #tpu.dot_dimension_numbers<[1], [0], [0], [1], [0, 0, 1, 1], [], []>} : vector<8x8xbf16>, vector<8x16xbf16>, vector<8x16xf32> -> vector<8x16xf32>
    %c-7_i32_33 = arith.constant -7 : i32
    %158 = vector.broadcast %c-7_i32_33 : i32 to vector<8x8xi32>
    %159 = arith.cmpi eq, %14, %158 : vector<8x8xi32>
    %cst_34 = arith.constant 0.000000e+00 : f32
    %160 = vector.broadcast %cst_34 : f32 to vector<8x8xf32>
    %161 = arith.select %159, %155, %160 : vector<8x8xi1>, vector<8x8xf32>
    %cst_35 = arith.constant dense<0.000000e+00> : vector<8xf32>
    %162 = vector.multi_reduction <add>, %161, %cst_35 [1] : vector<8x8xf32> to vector<8xf32>
    %163 = vector.shape_cast %162 : vector<8xf32> to vector<8x1xf32>
    %164 = vector.extract_strided_slice %8 {offsets = [3, 0], sizes = [1, 16], strides = [1, 1]} : vector<21x16xf32> to vector<1x16xf32>
    %165 = vector.broadcast %163 : vector<8x1xf32> to vector<8x16xf32>
    %166 = vector.broadcast %164 : vector<1x16xf32> to vector<8x16xf32>
    %167 = arith.mulf %165, %166 : vector<8x16xf32>
    %168 = arith.addf %157, %167 : vector<8x16xf32>
    %c-6_i32_36 = arith.constant -6 : i32
    %169 = vector.broadcast %c-6_i32_36 : i32 to vector<8x8xi32>
    %170 = arith.cmpi eq, %14, %169 : vector<8x8xi32>
    %cst_37 = arith.constant 0.000000e+00 : f32
    %171 = vector.broadcast %cst_37 : f32 to vector<8x8xf32>
    %172 = arith.select %170, %155, %171 : vector<8x8xi1>, vector<8x8xf32>
    %cst_38 = arith.constant dense<0.000000e+00> : vector<8xf32>
    %173 = vector.multi_reduction <add>, %172, %cst_38 [1] : vector<8x8xf32> to vector<8xf32>
    %174 = vector.shape_cast %173 : vector<8xf32> to vector<8x1xf32>
    %175 = vector.extract_strided_slice %8 {offsets = [4, 0], sizes = [1, 16], strides = [1, 1]} : vector<21x16xf32> to vector<1x16xf32>
    %176 = vector.broadcast %174 : vector<8x1xf32> to vector<8x16xf32>
    %177 = vector.broadcast %175 : vector<1x16xf32> to vector<8x16xf32>
    %178 = arith.mulf %176, %177 : vector<8x16xf32>
    %179 = arith.addf %168, %178 : vector<8x16xf32>
    %c-5_i32_39 = arith.constant -5 : i32
    %180 = vector.broadcast %c-5_i32_39 : i32 to vector<8x8xi32>
    %181 = arith.cmpi eq, %14, %180 : vector<8x8xi32>
    %cst_40 = arith.constant 0.000000e+00 : f32
    %182 = vector.broadcast %cst_40 : f32 to vector<8x8xf32>
    %183 = arith.select %181, %155, %182 : vector<8x8xi1>, vector<8x8xf32>
    %cst_41 = arith.constant dense<0.000000e+00> : vector<8xf32>
    %184 = vector.multi_reduction <add>, %183, %cst_41 [1] : vector<8x8xf32> to vector<8xf32>
    %185 = vector.shape_cast %184 : vector<8xf32> to vector<8x1xf32>
    %186 = vector.extract_strided_slice %8 {offsets = [5, 0], sizes = [1, 16], strides = [1, 1]} : vector<21x16xf32> to vector<1x16xf32>
    %187 = vector.broadcast %185 : vector<8x1xf32> to vector<8x16xf32>
    %188 = vector.broadcast %186 : vector<1x16xf32> to vector<8x16xf32>
    %189 = arith.mulf %187, %188 : vector<8x16xf32>
    %190 = arith.addf %179, %189 : vector<8x16xf32>
    %c-4_i32_42 = arith.constant -4 : i32
    %191 = vector.broadcast %c-4_i32_42 : i32 to vector<8x8xi32>
    %192 = arith.cmpi eq, %14, %191 : vector<8x8xi32>
    %cst_43 = arith.constant 0.000000e+00 : f32
    %193 = vector.broadcast %cst_43 : f32 to vector<8x8xf32>
    %194 = arith.select %192, %155, %193 : vector<8x8xi1>, vector<8x8xf32>
    %cst_44 = arith.constant dense<0.000000e+00> : vector<8xf32>
    %195 = vector.multi_reduction <add>, %194, %cst_44 [1] : vector<8x8xf32> to vector<8xf32>
    %196 = vector.shape_cast %195 : vector<8xf32> to vector<8x1xf32>
    %197 = vector.extract_strided_slice %8 {offsets = [6, 0], sizes = [1, 16], strides = [1, 1]} : vector<21x16xf32> to vector<1x16xf32>
    %198 = vector.broadcast %196 : vector<8x1xf32> to vector<8x16xf32>
    %199 = vector.broadcast %197 : vector<1x16xf32> to vector<8x16xf32>
    %200 = arith.mulf %198, %199 : vector<8x16xf32>
    %201 = arith.addf %190, %200 : vector<8x16xf32>
    %c-3_i32_45 = arith.constant -3 : i32
    %202 = vector.broadcast %c-3_i32_45 : i32 to vector<8x8xi32>
    %203 = arith.cmpi eq, %14, %202 : vector<8x8xi32>
    %cst_46 = arith.constant 0.000000e+00 : f32
    %204 = vector.broadcast %cst_46 : f32 to vector<8x8xf32>
    %205 = arith.select %203, %155, %204 : vector<8x8xi1>, vector<8x8xf32>
    %cst_47 = arith.constant dense<0.000000e+00> : vector<8xf32>
    %206 = vector.multi_reduction <add>, %205, %cst_47 [1] : vector<8x8xf32> to vector<8xf32>
    %207 = vector.shape_cast %206 : vector<8xf32> to vector<8x1xf32>
    %208 = vector.extract_strided_slice %8 {offsets = [7, 0], sizes = [1, 16], strides = [1, 1]} : vector<21x16xf32> to vector<1x16xf32>
    %209 = vector.broadcast %207 : vector<8x1xf32> to vector<8x16xf32>
    %210 = vector.broadcast %208 : vector<1x16xf32> to vector<8x16xf32>
    %211 = arith.mulf %209, %210 : vector<8x16xf32>
    %212 = arith.addf %201, %211 : vector<8x16xf32>
    %c-2_i32_48 = arith.constant -2 : i32
    %213 = vector.broadcast %c-2_i32_48 : i32 to vector<8x8xi32>
    %214 = arith.cmpi eq, %14, %213 : vector<8x8xi32>
    %cst_49 = arith.constant 0.000000e+00 : f32
    %215 = vector.broadcast %cst_49 : f32 to vector<8x8xf32>
    %216 = arith.select %214, %155, %215 : vector<8x8xi1>, vector<8x8xf32>
    %cst_50 = arith.constant dense<0.000000e+00> : vector<8xf32>
    %217 = vector.multi_reduction <add>, %216, %cst_50 [1] : vector<8x8xf32> to vector<8xf32>
    %218 = vector.shape_cast %217 : vector<8xf32> to vector<8x1xf32>
    %219 = vector.extract_strided_slice %8 {offsets = [8, 0], sizes = [1, 16], strides = [1, 1]} : vector<21x16xf32> to vector<1x16xf32>
    %220 = vector.broadcast %218 : vector<8x1xf32> to vector<8x16xf32>
    %221 = vector.broadcast %219 : vector<1x16xf32> to vector<8x16xf32>
    %222 = arith.mulf %220, %221 : vector<8x16xf32>
    %223 = arith.addf %212, %222 : vector<8x16xf32>
    %c-1_i32_51 = arith.constant -1 : i32
    %224 = vector.broadcast %c-1_i32_51 : i32 to vector<8x8xi32>
    %225 = arith.cmpi eq, %14, %224 : vector<8x8xi32>
    %cst_52 = arith.constant 0.000000e+00 : f32
    %226 = vector.broadcast %cst_52 : f32 to vector<8x8xf32>
    %227 = arith.select %225, %155, %226 : vector<8x8xi1>, vector<8x8xf32>
    %cst_53 = arith.constant dense<0.000000e+00> : vector<8xf32>
    %228 = vector.multi_reduction <add>, %227, %cst_53 [1] : vector<8x8xf32> to vector<8xf32>
    %229 = vector.shape_cast %228 : vector<8xf32> to vector<8x1xf32>
    %230 = vector.extract_strided_slice %8 {offsets = [9, 0], sizes = [1, 16], strides = [1, 1]} : vector<21x16xf32> to vector<1x16xf32>
    %231 = vector.broadcast %229 : vector<8x1xf32> to vector<8x16xf32>
    %232 = vector.broadcast %230 : vector<1x16xf32> to vector<8x16xf32>
    %233 = arith.mulf %231, %232 : vector<8x16xf32>
    %234 = arith.addf %223, %233 : vector<8x16xf32>
    %c0_i32_54 = arith.constant 0 : i32
    %235 = vector.broadcast %c0_i32_54 : i32 to vector<8x8xi32>
    %236 = arith.cmpi eq, %14, %235 : vector<8x8xi32>
    %cst_55 = arith.constant 0.000000e+00 : f32
    %237 = vector.broadcast %cst_55 : f32 to vector<8x8xf32>
    %238 = arith.select %236, %155, %237 : vector<8x8xi1>, vector<8x8xf32>
    %cst_56 = arith.constant dense<0.000000e+00> : vector<8xf32>
    %239 = vector.multi_reduction <add>, %238, %cst_56 [1] : vector<8x8xf32> to vector<8xf32>
    %240 = vector.shape_cast %239 : vector<8xf32> to vector<8x1xf32>
    %241 = vector.extract_strided_slice %8 {offsets = [10, 0], sizes = [1, 16], strides = [1, 1]} : vector<21x16xf32> to vector<1x16xf32>
    %242 = vector.broadcast %240 : vector<8x1xf32> to vector<8x16xf32>
    %243 = vector.broadcast %241 : vector<1x16xf32> to vector<8x16xf32>
    %244 = arith.mulf %242, %243 : vector<8x16xf32>
    %245 = arith.addf %234, %244 : vector<8x16xf32>
    %c1_i32_57 = arith.constant 1 : i32
    %246 = vector.broadcast %c1_i32_57 : i32 to vector<8x8xi32>
    %247 = arith.cmpi eq, %14, %246 : vector<8x8xi32>
    %cst_58 = arith.constant 0.000000e+00 : f32
    %248 = vector.broadcast %cst_58 : f32 to vector<8x8xf32>
    %249 = arith.select %247, %155, %248 : vector<8x8xi1>, vector<8x8xf32>
    %cst_59 = arith.constant dense<0.000000e+00> : vector<8xf32>
    %250 = vector.multi_reduction <add>, %249, %cst_59 [1] : vector<8x8xf32> to vector<8xf32>
    %251 = vector.shape_cast %250 : vector<8xf32> to vector<8x1xf32>
    %252 = vector.extract_strided_slice %8 {offsets = [11, 0], sizes = [1, 16], strides = [1, 1]} : vector<21x16xf32> to vector<1x16xf32>
    %253 = vector.broadcast %251 : vector<8x1xf32> to vector<8x16xf32>
    %254 = vector.broadcast %252 : vector<1x16xf32> to vector<8x16xf32>
    %255 = arith.mulf %253, %254 : vector<8x16xf32>
    %256 = arith.addf %245, %255 : vector<8x16xf32>
    %c2_i32_60 = arith.constant 2 : i32
    %257 = vector.broadcast %c2_i32_60 : i32 to vector<8x8xi32>
    %258 = arith.cmpi eq, %14, %257 : vector<8x8xi32>
    %cst_61 = arith.constant 0.000000e+00 : f32
    %259 = vector.broadcast %cst_61 : f32 to vector<8x8xf32>
    %260 = arith.select %258, %155, %259 : vector<8x8xi1>, vector<8x8xf32>
    %cst_62 = arith.constant dense<0.000000e+00> : vector<8xf32>
    %261 = vector.multi_reduction <add>, %260, %cst_62 [1] : vector<8x8xf32> to vector<8xf32>
    %262 = vector.shape_cast %261 : vector<8xf32> to vector<8x1xf32>
    %263 = vector.extract_strided_slice %8 {offsets = [12, 0], sizes = [1, 16], strides = [1, 1]} : vector<21x16xf32> to vector<1x16xf32>
    %264 = vector.broadcast %262 : vector<8x1xf32> to vector<8x16xf32>
    %265 = vector.broadcast %263 : vector<1x16xf32> to vector<8x16xf32>
    %266 = arith.mulf %264, %265 : vector<8x16xf32>
    %267 = arith.addf %256, %266 : vector<8x16xf32>
    %c3_i32_63 = arith.constant 3 : i32
    %268 = vector.broadcast %c3_i32_63 : i32 to vector<8x8xi32>
    %269 = arith.cmpi eq, %14, %268 : vector<8x8xi32>
    %cst_64 = arith.constant 0.000000e+00 : f32
    %270 = vector.broadcast %cst_64 : f32 to vector<8x8xf32>
    %271 = arith.select %269, %155, %270 : vector<8x8xi1>, vector<8x8xf32>
    %cst_65 = arith.constant dense<0.000000e+00> : vector<8xf32>
    %272 = vector.multi_reduction <add>, %271, %cst_65 [1] : vector<8x8xf32> to vector<8xf32>
    %273 = vector.shape_cast %272 : vector<8xf32> to vector<8x1xf32>
    %274 = vector.extract_strided_slice %8 {offsets = [13, 0], sizes = [1, 16], strides = [1, 1]} : vector<21x16xf32> to vector<1x16xf32>
    %275 = vector.broadcast %273 : vector<8x1xf32> to vector<8x16xf32>
    %276 = vector.broadcast %274 : vector<1x16xf32> to vector<8x16xf32>
    %277 = arith.mulf %275, %276 : vector<8x16xf32>
    %278 = arith.addf %267, %277 : vector<8x16xf32>
    %c4_i32_66 = arith.constant 4 : i32
    %279 = vector.broadcast %c4_i32_66 : i32 to vector<8x8xi32>
    %280 = arith.cmpi eq, %14, %279 : vector<8x8xi32>
    %cst_67 = arith.constant 0.000000e+00 : f32
    %281 = vector.broadcast %cst_67 : f32 to vector<8x8xf32>
    %282 = arith.select %280, %155, %281 : vector<8x8xi1>, vector<8x8xf32>
    %cst_68 = arith.constant dense<0.000000e+00> : vector<8xf32>
    %283 = vector.multi_reduction <add>, %282, %cst_68 [1] : vector<8x8xf32> to vector<8xf32>
    %284 = vector.shape_cast %283 : vector<8xf32> to vector<8x1xf32>
    %285 = vector.extract_strided_slice %8 {offsets = [14, 0], sizes = [1, 16], strides = [1, 1]} : vector<21x16xf32> to vector<1x16xf32>
    %286 = vector.broadcast %284 : vector<8x1xf32> to vector<8x16xf32>
    %287 = vector.broadcast %285 : vector<1x16xf32> to vector<8x16xf32>
    %288 = arith.mulf %286, %287 : vector<8x16xf32>
    %289 = arith.addf %278, %288 : vector<8x16xf32>
    %c5_i32_69 = arith.constant 5 : i32
    %290 = vector.broadcast %c5_i32_69 : i32 to vector<8x8xi32>
    %291 = arith.cmpi eq, %14, %290 : vector<8x8xi32>
    %cst_70 = arith.constant 0.000000e+00 : f32
    %292 = vector.broadcast %cst_70 : f32 to vector<8x8xf32>
    %293 = arith.select %291, %155, %292 : vector<8x8xi1>, vector<8x8xf32>
    %cst_71 = arith.constant dense<0.000000e+00> : vector<8xf32>
    %294 = vector.multi_reduction <add>, %293, %cst_71 [1] : vector<8x8xf32> to vector<8xf32>
    %295 = vector.shape_cast %294 : vector<8xf32> to vector<8x1xf32>
    %296 = vector.extract_strided_slice %8 {offsets = [15, 0], sizes = [1, 16], strides = [1, 1]} : vector<21x16xf32> to vector<1x16xf32>
    %297 = vector.broadcast %295 : vector<8x1xf32> to vector<8x16xf32>
    %298 = vector.broadcast %296 : vector<1x16xf32> to vector<8x16xf32>
    %299 = arith.mulf %297, %298 : vector<8x16xf32>
    %300 = arith.addf %289, %299 : vector<8x16xf32>
    %c6_i32_72 = arith.constant 6 : i32
    %301 = vector.broadcast %c6_i32_72 : i32 to vector<8x8xi32>
    %302 = arith.cmpi eq, %14, %301 : vector<8x8xi32>
    %cst_73 = arith.constant 0.000000e+00 : f32
    %303 = vector.broadcast %cst_73 : f32 to vector<8x8xf32>
    %304 = arith.select %302, %155, %303 : vector<8x8xi1>, vector<8x8xf32>
    %cst_74 = arith.constant dense<0.000000e+00> : vector<8xf32>
    %305 = vector.multi_reduction <add>, %304, %cst_74 [1] : vector<8x8xf32> to vector<8xf32>
    %306 = vector.shape_cast %305 : vector<8xf32> to vector<8x1xf32>
    %307 = vector.extract_strided_slice %8 {offsets = [16, 0], sizes = [1, 16], strides = [1, 1]} : vector<21x16xf32> to vector<1x16xf32>
    %308 = vector.broadcast %306 : vector<8x1xf32> to vector<8x16xf32>
    %309 = vector.broadcast %307 : vector<1x16xf32> to vector<8x16xf32>
    %310 = arith.mulf %308, %309 : vector<8x16xf32>
    %311 = arith.addf %300, %310 : vector<8x16xf32>
    %c7_i32_75 = arith.constant 7 : i32
    %312 = vector.broadcast %c7_i32_75 : i32 to vector<8x8xi32>
    %313 = arith.cmpi eq, %14, %312 : vector<8x8xi32>
    %cst_76 = arith.constant 0.000000e+00 : f32
    %314 = vector.broadcast %cst_76 : f32 to vector<8x8xf32>
    %315 = arith.select %313, %155, %314 : vector<8x8xi1>, vector<8x8xf32>
    %cst_77 = arith.constant dense<0.000000e+00> : vector<8xf32>
    %316 = vector.multi_reduction <add>, %315, %cst_77 [1] : vector<8x8xf32> to vector<8xf32>
    %317 = vector.shape_cast %316 : vector<8xf32> to vector<8x1xf32>
    %318 = vector.extract_strided_slice %8 {offsets = [17, 0], sizes = [1, 16], strides = [1, 1]} : vector<21x16xf32> to vector<1x16xf32>
    %319 = vector.broadcast %317 : vector<8x1xf32> to vector<8x16xf32>
    %320 = vector.broadcast %318 : vector<1x16xf32> to vector<8x16xf32>
    %321 = arith.mulf %319, %320 : vector<8x16xf32>
    %322 = arith.addf %311, %321 : vector<8x16xf32>
    %323 = arith.truncf %322 : vector<8x16xf32> to vector<8x16xbf16>
    %c0_78 = arith.constant 0 : index
    %c0_79 = arith.constant 0 : index
    %c0_80 = arith.constant 0 : index
    %324 = vector.load %arg7[%c0_78, %c0_79, %c0_80] : memref<1x8x32xbf16, #tpu.memory_space<vmem>>, vector<1x8x16xbf16>
    %325 = vector.shape_cast %324 : vector<1x8x16xbf16> to vector<8x16xbf16>
    %326 = vector.shape_cast %323 : vector<8x16xbf16> to vector<1x8x16xbf16>
    tpu.vector_store %arg7[%c0_78, %c0_79, %c0_80], %326 {strides = array<i32>} : memref<1x8x32xbf16, #tpu.memory_space<vmem>>, vector<1x8x16xbf16>,
    %327 = vector.extract_strided_slice %1 {offsets = [0, 16], sizes = [8, 16], strides = [1, 1]} : vector<8x96xbf16> to vector<8x16xbf16>
    %328 = vector.extract_strided_slice %3 {offsets = [0, 48], sizes = [8, 16], strides = [1, 1]} : vector<8x96xbf16> to vector<8x16xbf16>
    %329 = vector.extract_strided_slice %3 {offsets = [0, 80], sizes = [8, 16], strides = [1, 1]} : vector<8x96xbf16> to vector<8x16xbf16>
    %cst_81 = arith.constant dense<0.000000e+00> : vector<8x8xf32>
    %330 = tpu.matmul %327, %328, %cst_81 {dimension_numbers = #tpu.dot_dimension_numbers<[1], [1], [0], [0], [0, 0, 1, 0], [], []>} : vector<8x16xbf16>, vector<8x16xbf16>, vector<8x8xf32> -> vector<8x8xf32>
    %cst_82 = arith.constant dense<0.000000e+00> : vector<8x21xf32>
    %331 = tpu.matmul %327, %6, %cst_82 {dimension_numbers = #tpu.dot_dimension_numbers<[1], [1], [0], [0], [0, 0, 1, 0], [], []>} : vector<8x16xbf16>, vector<21x16xbf16>, vector<8x21xf32> -> vector<8x21xf32>
    %c-7_i32_83 = arith.constant -7 : i32
    %332 = vector.broadcast %c-7_i32_83 : i32 to vector<8x8xi32>
    %333 = arith.cmpi eq, %14, %332 : vector<8x8xi32>
    %334 = vector.extract_strided_slice %331 {offsets = [0, 3], sizes = [8, 1], strides = [1, 1]} : vector<8x21xf32> to vector<8x1xf32>
    %cst_84 = arith.constant 0.000000e+00 : f32
    %335 = vector.shape_cast %334 : vector<8x1xf32> to vector<8x1xf32>
    %336 = vector.broadcast %335 : vector<8x1xf32> to vector<8x8xf32>
    %337 = vector.broadcast %cst_84 : f32 to vector<8x8xf32>
    %338 = arith.select %333, %336, %337 : vector<8x8xi1>, vector<8x8xf32>
    %339 = arith.addf %330, %338 : vector<8x8xf32>
    %c-6_i32_85 = arith.constant -6 : i32
    %340 = vector.broadcast %c-6_i32_85 : i32 to vector<8x8xi32>
    %341 = arith.cmpi eq, %14, %340 : vector<8x8xi32>
    %342 = vector.extract_strided_slice %331 {offsets = [0, 4], sizes = [8, 1], strides = [1, 1]} : vector<8x21xf32> to vector<8x1xf32>
    %cst_86 = arith.constant 0.000000e+00 : f32
    %343 = vector.shape_cast %342 : vector<8x1xf32> to vector<8x1xf32>
    %344 = vector.broadcast %343 : vector<8x1xf32> to vector<8x8xf32>
    %345 = vector.broadcast %cst_86 : f32 to vector<8x8xf32>
    %346 = arith.select %341, %344, %345 : vector<8x8xi1>, vector<8x8xf32>
    %347 = arith.addf %339, %346 : vector<8x8xf32>
    %c-5_i32_87 = arith.constant -5 : i32
    %348 = vector.broadcast %c-5_i32_87 : i32 to vector<8x8xi32>
    %349 = arith.cmpi eq, %14, %348 : vector<8x8xi32>
    %350 = vector.extract_strided_slice %331 {offsets = [0, 5], sizes = [8, 1], strides = [1, 1]} : vector<8x21xf32> to vector<8x1xf32>
    %cst_88 = arith.constant 0.000000e+00 : f32
    %351 = vector.shape_cast %350 : vector<8x1xf32> to vector<8x1xf32>
    %352 = vector.broadcast %351 : vector<8x1xf32> to vector<8x8xf32>
    %353 = vector.broadcast %cst_88 : f32 to vector<8x8xf32>
    %354 = arith.select %349, %352, %353 : vector<8x8xi1>, vector<8x8xf32>
    %355 = arith.addf %347, %354 : vector<8x8xf32>
    %c-4_i32_89 = arith.constant -4 : i32
    %356 = vector.broadcast %c-4_i32_89 : i32 to vector<8x8xi32>
    %357 = arith.cmpi eq, %14, %356 : vector<8x8xi32>
    %358 = vector.extract_strided_slice %331 {offsets = [0, 6], sizes = [8, 1], strides = [1, 1]} : vector<8x21xf32> to vector<8x1xf32>
    %cst_90 = arith.constant 0.000000e+00 : f32
    %359 = vector.shape_cast %358 : vector<8x1xf32> to vector<8x1xf32>
    %360 = vector.broadcast %359 : vector<8x1xf32> to vector<8x8xf32>
    %361 = vector.broadcast %cst_90 : f32 to vector<8x8xf32>
    %362 = arith.select %357, %360, %361 : vector<8x8xi1>, vector<8x8xf32>
    %363 = arith.addf %355, %362 : vector<8x8xf32>
    %c-3_i32_91 = arith.constant -3 : i32
    %364 = vector.broadcast %c-3_i32_91 : i32 to vector<8x8xi32>
    %365 = arith.cmpi eq, %14, %364 : vector<8x8xi32>
    %366 = vector.extract_strided_slice %331 {offsets = [0, 7], sizes = [8, 1], strides = [1, 1]} : vector<8x21xf32> to vector<8x1xf32>
    %cst_92 = arith.constant 0.000000e+00 : f32
    %367 = vector.shape_cast %366 : vector<8x1xf32> to vector<8x1xf32>
    %368 = vector.broadcast %367 : vector<8x1xf32> to vector<8x8xf32>
    %369 = vector.broadcast %cst_92 : f32 to vector<8x8xf32>
    %370 = arith.select %365, %368, %369 : vector<8x8xi1>, vector<8x8xf32>
    %371 = arith.addf %363, %370 : vector<8x8xf32>
    %c-2_i32_93 = arith.constant -2 : i32
    %372 = vector.broadcast %c-2_i32_93 : i32 to vector<8x8xi32>
    %373 = arith.cmpi eq, %14, %372 : vector<8x8xi32>
    %374 = vector.extract_strided_slice %331 {offsets = [0, 8], sizes = [8, 1], strides = [1, 1]} : vector<8x21xf32> to vector<8x1xf32>
    %cst_94 = arith.constant 0.000000e+00 : f32
    %375 = vector.shape_cast %374 : vector<8x1xf32> to vector<8x1xf32>
    %376 = vector.broadcast %375 : vector<8x1xf32> to vector<8x8xf32>
    %377 = vector.broadcast %cst_94 : f32 to vector<8x8xf32>
    %378 = arith.select %373, %376, %377 : vector<8x8xi1>, vector<8x8xf32>
    %379 = arith.addf %371, %378 : vector<8x8xf32>
    %c-1_i32_95 = arith.constant -1 : i32
    %380 = vector.broadcast %c-1_i32_95 : i32 to vector<8x8xi32>
    %381 = arith.cmpi eq, %14, %380 : vector<8x8xi32>
    %382 = vector.extract_strided_slice %331 {offsets = [0, 9], sizes = [8, 1], strides = [1, 1]} : vector<8x21xf32> to vector<8x1xf32>
    %cst_96 = arith.constant 0.000000e+00 : f32
    %383 = vector.shape_cast %382 : vector<8x1xf32> to vector<8x1xf32>
    %384 = vector.broadcast %383 : vector<8x1xf32> to vector<8x8xf32>
    %385 = vector.broadcast %cst_96 : f32 to vector<8x8xf32>
    %386 = arith.select %381, %384, %385 : vector<8x8xi1>, vector<8x8xf32>
    %387 = arith.addf %379, %386 : vector<8x8xf32>
    %c0_i32_97 = arith.constant 0 : i32
    %388 = vector.broadcast %c0_i32_97 : i32 to vector<8x8xi32>
    %389 = arith.cmpi eq, %14, %388 : vector<8x8xi32>
    %390 = vector.extract_strided_slice %331 {offsets = [0, 10], sizes = [8, 1], strides = [1, 1]} : vector<8x21xf32> to vector<8x1xf32>
    %cst_98 = arith.constant 0.000000e+00 : f32
    %391 = vector.shape_cast %390 : vector<8x1xf32> to vector<8x1xf32>
    %392 = vector.broadcast %391 : vector<8x1xf32> to vector<8x8xf32>
    %393 = vector.broadcast %cst_98 : f32 to vector<8x8xf32>
    %394 = arith.select %389, %392, %393 : vector<8x8xi1>, vector<8x8xf32>
    %395 = arith.addf %387, %394 : vector<8x8xf32>
    %c1_i32_99 = arith.constant 1 : i32
    %396 = vector.broadcast %c1_i32_99 : i32 to vector<8x8xi32>
    %397 = arith.cmpi eq, %14, %396 : vector<8x8xi32>
    %398 = vector.extract_strided_slice %331 {offsets = [0, 11], sizes = [8, 1], strides = [1, 1]} : vector<8x21xf32> to vector<8x1xf32>
    %cst_100 = arith.constant 0.000000e+00 : f32
    %399 = vector.shape_cast %398 : vector<8x1xf32> to vector<8x1xf32>
    %400 = vector.broadcast %399 : vector<8x1xf32> to vector<8x8xf32>
    %401 = vector.broadcast %cst_100 : f32 to vector<8x8xf32>
    %402 = arith.select %397, %400, %401 : vector<8x8xi1>, vector<8x8xf32>
    %403 = arith.addf %395, %402 : vector<8x8xf32>
    %c2_i32_101 = arith.constant 2 : i32
    %404 = vector.broadcast %c2_i32_101 : i32 to vector<8x8xi32>
    %405 = arith.cmpi eq, %14, %404 : vector<8x8xi32>
    %406 = vector.extract_strided_slice %331 {offsets = [0, 12], sizes = [8, 1], strides = [1, 1]} : vector<8x21xf32> to vector<8x1xf32>
    %cst_102 = arith.constant 0.000000e+00 : f32
    %407 = vector.shape_cast %406 : vector<8x1xf32> to vector<8x1xf32>
    %408 = vector.broadcast %407 : vector<8x1xf32> to vector<8x8xf32>
    %409 = vector.broadcast %cst_102 : f32 to vector<8x8xf32>
    %410 = arith.select %405, %408, %409 : vector<8x8xi1>, vector<8x8xf32>
    %411 = arith.addf %403, %410 : vector<8x8xf32>
    %c3_i32_103 = arith.constant 3 : i32
    %412 = vector.broadcast %c3_i32_103 : i32 to vector<8x8xi32>
    %413 = arith.cmpi eq, %14, %412 : vector<8x8xi32>
    %414 = vector.extract_strided_slice %331 {offsets = [0, 13], sizes = [8, 1], strides = [1, 1]} : vector<8x21xf32> to vector<8x1xf32>
    %cst_104 = arith.constant 0.000000e+00 : f32
    %415 = vector.shape_cast %414 : vector<8x1xf32> to vector<8x1xf32>
    %416 = vector.broadcast %415 : vector<8x1xf32> to vector<8x8xf32>
    %417 = vector.broadcast %cst_104 : f32 to vector<8x8xf32>
    %418 = arith.select %413, %416, %417 : vector<8x8xi1>, vector<8x8xf32>
    %419 = arith.addf %411, %418 : vector<8x8xf32>
    %c4_i32_105 = arith.constant 4 : i32
    %420 = vector.broadcast %c4_i32_105 : i32 to vector<8x8xi32>
    %421 = arith.cmpi eq, %14, %420 : vector<8x8xi32>
    %422 = vector.extract_strided_slice %331 {offsets = [0, 14], sizes = [8, 1], strides = [1, 1]} : vector<8x21xf32> to vector<8x1xf32>
    %cst_106 = arith.constant 0.000000e+00 : f32
    %423 = vector.shape_cast %422 : vector<8x1xf32> to vector<8x1xf32>
    %424 = vector.broadcast %423 : vector<8x1xf32> to vector<8x8xf32>
    %425 = vector.broadcast %cst_106 : f32 to vector<8x8xf32>
    %426 = arith.select %421, %424, %425 : vector<8x8xi1>, vector<8x8xf32>
    %427 = arith.addf %419, %426 : vector<8x8xf32>
    %c5_i32_107 = arith.constant 5 : i32
    %428 = vector.broadcast %c5_i32_107 : i32 to vector<8x8xi32>
    %429 = arith.cmpi eq, %14, %428 : vector<8x8xi32>
    %430 = vector.extract_strided_slice %331 {offsets = [0, 15], sizes = [8, 1], strides = [1, 1]} : vector<8x21xf32> to vector<8x1xf32>
    %cst_108 = arith.constant 0.000000e+00 : f32
    %431 = vector.shape_cast %430 : vector<8x1xf32> to vector<8x1xf32>
    %432 = vector.broadcast %431 : vector<8x1xf32> to vector<8x8xf32>
    %433 = vector.broadcast %cst_108 : f32 to vector<8x8xf32>
    %434 = arith.select %429, %432, %433 : vector<8x8xi1>, vector<8x8xf32>
    %435 = arith.addf %427, %434 : vector<8x8xf32>
    %c6_i32_109 = arith.constant 6 : i32
    %436 = vector.broadcast %c6_i32_109 : i32 to vector<8x8xi32>
    %437 = arith.cmpi eq, %14, %436 : vector<8x8xi32>
    %438 = vector.extract_strided_slice %331 {offsets = [0, 16], sizes = [8, 1], strides = [1, 1]} : vector<8x21xf32> to vector<8x1xf32>
    %cst_110 = arith.constant 0.000000e+00 : f32
    %439 = vector.shape_cast %438 : vector<8x1xf32> to vector<8x1xf32>
    %440 = vector.broadcast %439 : vector<8x1xf32> to vector<8x8xf32>
    %441 = vector.broadcast %cst_110 : f32 to vector<8x8xf32>
    %442 = arith.select %437, %440, %441 : vector<8x8xi1>, vector<8x8xf32>
    %443 = arith.addf %435, %442 : vector<8x8xf32>
    %c7_i32_111 = arith.constant 7 : i32
    %444 = vector.broadcast %c7_i32_111 : i32 to vector<8x8xi32>
    %445 = arith.cmpi eq, %14, %444 : vector<8x8xi32>
    %446 = vector.extract_strided_slice %331 {offsets = [0, 17], sizes = [8, 1], strides = [1, 1]} : vector<8x21xf32> to vector<8x1xf32>
    %cst_112 = arith.constant 0.000000e+00 : f32
    %447 = vector.shape_cast %446 : vector<8x1xf32> to vector<8x1xf32>
    %448 = vector.broadcast %447 : vector<8x1xf32> to vector<8x8xf32>
    %449 = vector.broadcast %cst_112 : f32 to vector<8x8xf32>
    %450 = arith.select %445, %448, %449 : vector<8x8xi1>, vector<8x8xf32>
    %451 = arith.addf %443, %450 : vector<8x8xf32>
    %cst_113 = arith.constant 0.000000e+00 : f32
    %452 = vector.broadcast %cst_113 : f32 to vector<1x8xf32>
    %453 = arith.cmpf oeq, %5, %452 : vector<1x8xf32>
    %cst_114 = arith.constant -1.000000e+04 : f32
    %454 = vector.shape_cast %453 : vector<1x8xi1> to vector<1x8xi1>
    %455 = vector.broadcast %454 : vector<1x8xi1> to vector<8x8xi1>
    %456 = vector.broadcast %cst_114 : f32 to vector<8x8xf32>
    %457 = arith.select %455, %456, %451 : vector<8x8xi1>, vector<8x8xf32>
    %cst_115 = arith.constant dense<0xFF800000> : vector<8xf32>
    %458 = vector.multi_reduction <maximumf>, %457, %cst_115 [1] : vector<8x8xf32> to vector<8xf32>
    %459 = vector.shape_cast %458 : vector<8xf32> to vector<8x1xf32>
    %460 = vector.broadcast %459 : vector<8x1xf32> to vector<8x8xf32>
    %461 = arith.subf %457, %460 : vector<8x8xf32>
    %462 = math.exp %461 : vector<8x8xf32>
    %cst_116 = arith.constant dense<0.000000e+00> : vector<8xf32>
    %463 = vector.multi_reduction <add>, %462, %cst_116 [1] : vector<8x8xf32> to vector<8xf32>
    %464 = vector.shape_cast %463 : vector<8xf32> to vector<8x1xf32>
    %465 = tpu.reciprocal %464 {approx = true} : vector<8x1xf32> -> vector<8x1xf32>
    %466 = vector.broadcast %465 : vector<8x1xf32> to vector<8x8xf32>
    %467 = arith.mulf %462, %466 : vector<8x8xf32>
    %468 = arith.truncf %467 : vector<8x8xf32> to vector<8x8xbf16>
    %cst_117 = arith.constant dense<0.000000e+00> : vector<8x16xf32>
    %469 = tpu.matmul %468, %329, %cst_117 {dimension_numbers = #tpu.dot_dimension_numbers<[1], [0], [0], [1], [0, 0, 1, 1], [], []>} : vector<8x8xbf16>, vector<8x16xbf16>, vector<8x16xf32> -> vector<8x16xf32>
    %c-7_i32_118 = arith.constant -7 : i32
    %470 = vector.broadcast %c-7_i32_118 : i32 to vector<8x8xi32>
    %471 = arith.cmpi eq, %14, %470 : vector<8x8xi32>
    %cst_119 = arith.constant 0.000000e+00 : f32
    %472 = vector.broadcast %cst_119 : f32 to vector<8x8xf32>
    %473 = arith.select %471, %467, %472 : vector<8x8xi1>, vector<8x8xf32>
    %cst_120 = arith.constant dense<0.000000e+00> : vector<8xf32>
    %474 = vector.multi_reduction <add>, %473, %cst_120 [1] : vector<8x8xf32> to vector<8xf32>
    %475 = vector.shape_cast %474 : vector<8xf32> to vector<8x1xf32>
    %476 = vector.extract_strided_slice %8 {offsets = [3, 0], sizes = [1, 16], strides = [1, 1]} : vector<21x16xf32> to vector<1x16xf32>
    %477 = vector.broadcast %475 : vector<8x1xf32> to vector<8x16xf32>
    %478 = vector.broadcast %476 : vector<1x16xf32> to vector<8x16xf32>
    %479 = arith.mulf %477, %478 : vector<8x16xf32>
    %480 = arith.addf %469, %479 : vector<8x16xf32>
    %c-6_i32_121 = arith.constant -6 : i32
    %481 = vector.broadcast %c-6_i32_121 : i32 to vector<8x8xi32>
    %482 = arith.cmpi eq, %14, %481 : vector<8x8xi32>
    %cst_122 = arith.constant 0.000000e+00 : f32
    %483 = vector.broadcast %cst_122 : f32 to vector<8x8xf32>
    %484 = arith.select %482, %467, %483 : vector<8x8xi1>, vector<8x8xf32>
    %cst_123 = arith.constant dense<0.000000e+00> : vector<8xf32>
    %485 = vector.multi_reduction <add>, %484, %cst_123 [1] : vector<8x8xf32> to vector<8xf32>
    %486 = vector.shape_cast %485 : vector<8xf32> to vector<8x1xf32>
    %487 = vector.extract_strided_slice %8 {offsets = [4, 0], sizes = [1, 16], strides = [1, 1]} : vector<21x16xf32> to vector<1x16xf32>
    %488 = vector.broadcast %486 : vector<8x1xf32> to vector<8x16xf32>
    %489 = vector.broadcast %487 : vector<1x16xf32> to vector<8x16xf32>
    %490 = arith.mulf %488, %489 : vector<8x16xf32>
    %491 = arith.addf %480, %490 : vector<8x16xf32>
    %c-5_i32_124 = arith.constant -5 : i32
    %492 = vector.broadcast %c-5_i32_124 : i32 to vector<8x8xi32>
    %493 = arith.cmpi eq, %14, %492 : vector<8x8xi32>
    %cst_125 = arith.constant 0.000000e+00 : f32
    %494 = vector.broadcast %cst_125 : f32 to vector<8x8xf32>
    %495 = arith.select %493, %467, %494 : vector<8x8xi1>, vector<8x8xf32>
    %cst_126 = arith.constant dense<0.000000e+00> : vector<8xf32>
    %496 = vector.multi_reduction <add>, %495, %cst_126 [1] : vector<8x8xf32> to vector<8xf32>
    %497 = vector.shape_cast %496 : vector<8xf32> to vector<8x1xf32>
    %498 = vector.extract_strided_slice %8 {offsets = [5, 0], sizes = [1, 16], strides = [1, 1]} : vector<21x16xf32> to vector<1x16xf32>
    %499 = vector.broadcast %497 : vector<8x1xf32> to vector<8x16xf32>
    %500 = vector.broadcast %498 : vector<1x16xf32> to vector<8x16xf32>
    %501 = arith.mulf %499, %500 : vector<8x16xf32>
    %502 = arith.addf %491, %501 : vector<8x16xf32>
    %c-4_i32_127 = arith.constant -4 : i32
    %503 = vector.broadcast %c-4_i32_127 : i32 to vector<8x8xi32>
    %504 = arith.cmpi eq, %14, %503 : vector<8x8xi32>
    %cst_128 = arith.constant 0.000000e+00 : f32
    %505 = vector.broadcast %cst_128 : f32 to vector<8x8xf32>
    %506 = arith.select %504, %467, %505 : vector<8x8xi1>, vector<8x8xf32>
    %cst_129 = arith.constant dense<0.000000e+00> : vector<8xf32>
    %507 = vector.multi_reduction <add>, %506, %cst_129 [1] : vector<8x8xf32> to vector<8xf32>
    %508 = vector.shape_cast %507 : vector<8xf32> to vector<8x1xf32>
    %509 = vector.extract_strided_slice %8 {offsets = [6, 0], sizes = [1, 16], strides = [1, 1]} : vector<21x16xf32> to vector<1x16xf32>
    %510 = vector.broadcast %508 : vector<8x1xf32> to vector<8x16xf32>
    %511 = vector.broadcast %509 : vector<1x16xf32> to vector<8x16xf32>
    %512 = arith.mulf %510, %511 : vector<8x16xf32>
    %513 = arith.addf %502, %512 : vector<8x16xf32>
    %c-3_i32_130 = arith.constant -3 : i32
    %514 = vector.broadcast %c-3_i32_130 : i32 to vector<8x8xi32>
    %515 = arith.cmpi eq, %14, %514 : vector<8x8xi32>
    %cst_131 = arith.constant 0.000000e+00 : f32
    %516 = vector.broadcast %cst_131 : f32 to vector<8x8xf32>
    %517 = arith.select %515, %467, %516 : vector<8x8xi1>, vector<8x8xf32>
    %cst_132 = arith.constant dense<0.000000e+00> : vector<8xf32>
    %518 = vector.multi_reduction <add>, %517, %cst_132 [1] : vector<8x8xf32> to vector<8xf32>
    %519 = vector.shape_cast %518 : vector<8xf32> to vector<8x1xf32>
    %520 = vector.extract_strided_slice %8 {offsets = [7, 0], sizes = [1, 16], strides = [1, 1]} : vector<21x16xf32> to vector<1x16xf32>
    %521 = vector.broadcast %519 : vector<8x1xf32> to vector<8x16xf32>
    %522 = vector.broadcast %520 : vector<1x16xf32> to vector<8x16xf32>
    %523 = arith.mulf %521, %522 : vector<8x16xf32>
    %524 = arith.addf %513, %523 : vector<8x16xf32>
    %c-2_i32_133 = arith.constant -2 : i32
    %525 = vector.broadcast %c-2_i32_133 : i32 to vector<8x8xi32>
    %526 = arith.cmpi eq, %14, %525 : vector<8x8xi32>
    %cst_134 = arith.constant 0.000000e+00 : f32
    %527 = vector.broadcast %cst_134 : f32 to vector<8x8xf32>
    %528 = arith.select %526, %467, %527 : vector<8x8xi1>, vector<8x8xf32>
    %cst_135 = arith.constant dense<0.000000e+00> : vector<8xf32>
    %529 = vector.multi_reduction <add>, %528, %cst_135 [1] : vector<8x8xf32> to vector<8xf32>
    %530 = vector.shape_cast %529 : vector<8xf32> to vector<8x1xf32>
    %531 = vector.extract_strided_slice %8 {offsets = [8, 0], sizes = [1, 16], strides = [1, 1]} : vector<21x16xf32> to vector<1x16xf32>
    %532 = vector.broadcast %530 : vector<8x1xf32> to vector<8x16xf32>
    %533 = vector.broadcast %531 : vector<1x16xf32> to vector<8x16xf32>
    %534 = arith.mulf %532, %533 : vector<8x16xf32>
    %535 = arith.addf %524, %534 : vector<8x16xf32>
    %c-1_i32_136 = arith.constant -1 : i32
    %536 = vector.broadcast %c-1_i32_136 : i32 to vector<8x8xi32>
    %537 = arith.cmpi eq, %14, %536 : vector<8x8xi32>
    %cst_137 = arith.constant 0.000000e+00 : f32
    %538 = vector.broadcast %cst_137 : f32 to vector<8x8xf32>
    %539 = arith.select %537, %467, %538 : vector<8x8xi1>, vector<8x8xf32>
    %cst_138 = arith.constant dense<0.000000e+00> : vector<8xf32>
    %540 = vector.multi_reduction <add>, %539, %cst_138 [1] : vector<8x8xf32> to vector<8xf32>
    %541 = vector.shape_cast %540 : vector<8xf32> to vector<8x1xf32>
    %542 = vector.extract_strided_slice %8 {offsets = [9, 0], sizes = [1, 16], strides = [1, 1]} : vector<21x16xf32> to vector<1x16xf32>
    %543 = vector.broadcast %541 : vector<8x1xf32> to vector<8x16xf32>
    %544 = vector.broadcast %542 : vector<1x16xf32> to vector<8x16xf32>
    %545 = arith.mulf %543, %544 : vector<8x16xf32>
    %546 = arith.addf %535, %545 : vector<8x16xf32>
    %c0_i32_139 = arith.constant 0 : i32
    %547 = vector.broadcast %c0_i32_139 : i32 to vector<8x8xi32>
    %548 = arith.cmpi eq, %14, %547 : vector<8x8xi32>
    %cst_140 = arith.constant 0.000000e+00 : f32
    %549 = vector.broadcast %cst_140 : f32 to vector<8x8xf32>
    %550 = arith.select %548, %467, %549 : vector<8x8xi1>, vector<8x8xf32>
    %cst_141 = arith.constant dense<0.000000e+00> : vector<8xf32>
    %551 = vector.multi_reduction <add>, %550, %cst_141 [1] : vector<8x8xf32> to vector<8xf32>
    %552 = vector.shape_cast %551 : vector<8xf32> to vector<8x1xf32>
    %553 = vector.extract_strided_slice %8 {offsets = [10, 0], sizes = [1, 16], strides = [1, 1]} : vector<21x16xf32> to vector<1x16xf32>
    %554 = vector.broadcast %552 : vector<8x1xf32> to vector<8x16xf32>
    %555 = vector.broadcast %553 : vector<1x16xf32> to vector<8x16xf32>
    %556 = arith.mulf %554, %555 : vector<8x16xf32>
    %557 = arith.addf %546, %556 : vector<8x16xf32>
    %c1_i32_142 = arith.constant 1 : i32
    %558 = vector.broadcast %c1_i32_142 : i32 to vector<8x8xi32>
    %559 = arith.cmpi eq, %14, %558 : vector<8x8xi32>
    %cst_143 = arith.constant 0.000000e+00 : f32
    %560 = vector.broadcast %cst_143 : f32 to vector<8x8xf32>
    %561 = arith.select %559, %467, %560 : vector<8x8xi1>, vector<8x8xf32>
    %cst_144 = arith.constant dense<0.000000e+00> : vector<8xf32>
    %562 = vector.multi_reduction <add>, %561, %cst_144 [1] : vector<8x8xf32> to vector<8xf32>
    %563 = vector.shape_cast %562 : vector<8xf32> to vector<8x1xf32>
    %564 = vector.extract_strided_slice %8 {offsets = [11, 0], sizes = [1, 16], strides = [1, 1]} : vector<21x16xf32> to vector<1x16xf32>
    %565 = vector.broadcast %563 : vector<8x1xf32> to vector<8x16xf32>
    %566 = vector.broadcast %564 : vector<1x16xf32> to vector<8x16xf32>
    %567 = arith.mulf %565, %566 : vector<8x16xf32>
    %568 = arith.addf %557, %567 : vector<8x16xf32>
    %c2_i32_145 = arith.constant 2 : i32
    %569 = vector.broadcast %c2_i32_145 : i32 to vector<8x8xi32>
    %570 = arith.cmpi eq, %14, %569 : vector<8x8xi32>
    %cst_146 = arith.constant 0.000000e+00 : f32
    %571 = vector.broadcast %cst_146 : f32 to vector<8x8xf32>
    %572 = arith.select %570, %467, %571 : vector<8x8xi1>, vector<8x8xf32>
    %cst_147 = arith.constant dense<0.000000e+00> : vector<8xf32>
    %573 = vector.multi_reduction <add>, %572, %cst_147 [1] : vector<8x8xf32> to vector<8xf32>
    %574 = vector.shape_cast %573 : vector<8xf32> to vector<8x1xf32>
    %575 = vector.extract_strided_slice %8 {offsets = [12, 0], sizes = [1, 16], strides = [1, 1]} : vector<21x16xf32> to vector<1x16xf32>
    %576 = vector.broadcast %574 : vector<8x1xf32> to vector<8x16xf32>
    %577 = vector.broadcast %575 : vector<1x16xf32> to vector<8x16xf32>
    %578 = arith.mulf %576, %577 : vector<8x16xf32>
    %579 = arith.addf %568, %578 : vector<8x16xf32>
    %c3_i32_148 = arith.constant 3 : i32
    %580 = vector.broadcast %c3_i32_148 : i32 to vector<8x8xi32>
    %581 = arith.cmpi eq, %14, %580 : vector<8x8xi32>
    %cst_149 = arith.constant 0.000000e+00 : f32
    %582 = vector.broadcast %cst_149 : f32 to vector<8x8xf32>
    %583 = arith.select %581, %467, %582 : vector<8x8xi1>, vector<8x8xf32>
    %cst_150 = arith.constant dense<0.000000e+00> : vector<8xf32>
    %584 = vector.multi_reduction <add>, %583, %cst_150 [1] : vector<8x8xf32> to vector<8xf32>
    %585 = vector.shape_cast %584 : vector<8xf32> to vector<8x1xf32>
    %586 = vector.extract_strided_slice %8 {offsets = [13, 0], sizes = [1, 16], strides = [1, 1]} : vector<21x16xf32> to vector<1x16xf32>
    %587 = vector.broadcast %585 : vector<8x1xf32> to vector<8x16xf32>
    %588 = vector.broadcast %586 : vector<1x16xf32> to vector<8x16xf32>
    %589 = arith.mulf %587, %588 : vector<8x16xf32>
    %590 = arith.addf %579, %589 : vector<8x16xf32>
    %c4_i32_151 = arith.constant 4 : i32
    %591 = vector.broadcast %c4_i32_151 : i32 to vector<8x8xi32>
    %592 = arith.cmpi eq, %14, %591 : vector<8x8xi32>
    %cst_152 = arith.constant 0.000000e+00 : f32
    %593 = vector.broadcast %cst_152 : f32 to vector<8x8xf32>
    %594 = arith.select %592, %467, %593 : vector<8x8xi1>, vector<8x8xf32>
    %cst_153 = arith.constant dense<0.000000e+00> : vector<8xf32>
    %595 = vector.multi_reduction <add>, %594, %cst_153 [1] : vector<8x8xf32> to vector<8xf32>
    %596 = vector.shape_cast %595 : vector<8xf32> to vector<8x1xf32>
    %597 = vector.extract_strided_slice %8 {offsets = [14, 0], sizes = [1, 16], strides = [1, 1]} : vector<21x16xf32> to vector<1x16xf32>
    %598 = vector.broadcast %596 : vector<8x1xf32> to vector<8x16xf32>
    %599 = vector.broadcast %597 : vector<1x16xf32> to vector<8x16xf32>
    %600 = arith.mulf %598, %599 : vector<8x16xf32>
    %601 = arith.addf %590, %600 : vector<8x16xf32>
    %c5_i32_154 = arith.constant 5 : i32
    %602 = vector.broadcast %c5_i32_154 : i32 to vector<8x8xi32>
    %603 = arith.cmpi eq, %14, %602 : vector<8x8xi32>
    %cst_155 = arith.constant 0.000000e+00 : f32
    %604 = vector.broadcast %cst_155 : f32 to vector<8x8xf32>
    %605 = arith.select %603, %467, %604 : vector<8x8xi1>, vector<8x8xf32>
    %cst_156 = arith.constant dense<0.000000e+00> : vector<8xf32>
    %606 = vector.multi_reduction <add>, %605, %cst_156 [1] : vector<8x8xf32> to vector<8xf32>
    %607 = vector.shape_cast %606 : vector<8xf32> to vector<8x1xf32>
    %608 = vector.extract_strided_slice %8 {offsets = [15, 0], sizes = [1, 16], strides = [1, 1]} : vector<21x16xf32> to vector<1x16xf32>
    %609 = vector.broadcast %607 : vector<8x1xf32> to vector<8x16xf32>
    %610 = vector.broadcast %608 : vector<1x16xf32> to vector<8x16xf32>
    %611 = arith.mulf %609, %610 : vector<8x16xf32>
    %612 = arith.addf %601, %611 : vector<8x16xf32>
    %c6_i32_157 = arith.constant 6 : i32
    %613 = vector.broadcast %c6_i32_157 : i32 to vector<8x8xi32>
    %614 = arith.cmpi eq, %14, %613 : vector<8x8xi32>
    %cst_158 = arith.constant 0.000000e+00 : f32
    %615 = vector.broadcast %cst_158 : f32 to vector<8x8xf32>
    %616 = arith.select %614, %467, %615 : vector<8x8xi1>, vector<8x8xf32>
    %cst_159 = arith.constant dense<0.000000e+00> : vector<8xf32>
    %617 = vector.multi_reduction <add>, %616, %cst_159 [1] : vector<8x8xf32> to vector<8xf32>
    %618 = vector.shape_cast %617 : vector<8xf32> to vector<8x1xf32>
    %619 = vector.extract_strided_slice %8 {offsets = [16, 0], sizes = [1, 16], strides = [1, 1]} : vector<21x16xf32> to vector<1x16xf32>
    %620 = vector.broadcast %618 : vector<8x1xf32> to vector<8x16xf32>
    %621 = vector.broadcast %619 : vector<1x16xf32> to vector<8x16xf32>
    %622 = arith.mulf %620, %621 : vector<8x16xf32>
    %623 = arith.addf %612, %622 : vector<8x16xf32>
    %c7_i32_160 = arith.constant 7 : i32
    %624 = vector.broadcast %c7_i32_160 : i32 to vector<8x8xi32>
    %625 = arith.cmpi eq, %14, %624 : vector<8x8xi32>
    %cst_161 = arith.constant 0.000000e+00 : f32
    %626 = vector.broadcast %cst_161 : f32 to vector<8x8xf32>
    %627 = arith.select %625, %467, %626 : vector<8x8xi1>, vector<8x8xf32>
    %cst_162 = arith.constant dense<0.000000e+00> : vector<8xf32>
    %628 = vector.multi_reduction <add>, %627, %cst_162 [1] : vector<8x8xf32> to vector<8xf32>
    %629 = vector.shape_cast %628 : vector<8xf32> to vector<8x1xf32>
    %630 = vector.extract_strided_slice %8 {offsets = [17, 0], sizes = [1, 16], strides = [1, 1]} : vector<21x16xf32> to vector<1x16xf32>
    %631 = vector.broadcast %629 : vector<8x1xf32> to vector<8x16xf32>
    %632 = vector.broadcast %630 : vector<1x16xf32> to vector<8x16xf32>
    %633 = arith.mulf %631, %632 : vector<8x16xf32>
    %634 = arith.addf %623, %633 : vector<8x16xf32>
    %635 = arith.truncf %634 : vector<8x16xf32> to vector<8x16xbf16>
    %c0_163 = arith.constant 0 : index
    %c0_164 = arith.constant 0 : index
    %c16 = arith.constant 16 : index
    %636 = vector.load %arg7[%c0_163, %c0_164, %c16] : memref<1x8x32xbf16, #tpu.memory_space<vmem>>, vector<1x8x16xbf16>
    %637 = vector.shape_cast %636 : vector<1x8x16xbf16> to vector<8x16xbf16>
    %638 = vector.shape_cast %635 : vector<8x16xbf16> to vector<1x8x16xbf16>
    tpu.vector_store %arg7[%c0_163, %c0_164, %c16], %638 {strides = array<i32>} : memref<1x8x32xbf16, #tpu.memory_space<vmem>>, vector<1x8x16xbf16>,
    return
  }
  func.func @transform_0(%arg0: i32, %arg1: i32) -> (i32, i32, i32) {
    %c0_i32 = arith.constant 0 : i32
    %c0_i32_0 = arith.constant 0 : i32
    return %arg0, %arg1, %c0_i32 : i32, i32, i32
  }
  func.func @transform_1(%arg0: i32, %arg1: i32) -> (i32, i32, i32) {
    %c0_i32 = arith.constant 0 : i32
    %c0_i32_0 = arith.constant 0 : i32
    %c0_i32_1 = arith.constant 0 : i32
    return %arg0, %c0_i32, %c0_i32_0 : i32, i32, i32
  }
  func.func @transform_2(%arg0: i32, %arg1: i32) -> (i32, i32, i32) {
    %c0_i32 = arith.constant 0 : i32
    %c0_i32_0 = arith.constant 0 : i32
    %c0_i32_1 = arith.constant 0 : i32
    return %arg0, %c0_i32, %c0_i32_0 : i32, i32, i32
  }
  func.func @transform_3(%arg0: i32, %arg1: i32) -> (i32, i32) {
    %c0_i32 = arith.constant 0 : i32
    %c0_i32_0 = arith.constant 0 : i32
    %c0_i32_1 = arith.constant 0 : i32
    return %c0_i32, %c0_i32_0 : i32, i32
  }
  func.func @transform_4(%arg0: i32, %arg1: i32) -> (i32, i32) {
    %c0_i32 = arith.constant 0 : i32
    %c0_i32_0 = arith.constant 0 : i32
    %c0_i32_1 = arith.constant 0 : i32
    return %c0_i32, %c0_i32_0 : i32, i32
  }
  func.func @transform_5(%arg0: i32, %arg1: i32) -> (i32, i32, i32) {
    %c0_i32 = arith.constant 0 : i32
    %c0_i32_0 = arith.constant 0 : i32
    return %arg0, %arg1, %c0_i32 : i32, i32, i32
  }
}

module attributes {stable_mosaic.version = 11 : i64} {
  func.func @_mm_mask_kernel(%arg0: i32, %arg1: memref<16x32xbf16, #tpu.memory_space<vmem>>, %arg2: memref<16x1xbf16, #tpu.memory_space<vmem>>, %arg3: memref<32x64xbf16, #tpu.memory_space<vmem>>, %arg4: memref<1x64xf32, #tpu.memory_space<vmem>>, %arg5: memref<16x64xbf16, #tpu.memory_space<vmem>>) attributes {dimension_semantics = [#tpu.dimension_semantics<parallel>], iteration_bounds = array<i64: 1>, scalar_prefetch = 0 : i64, scratch_operands = 0 : i64, tpu.core_type = #tpu.core_type<tc>, window_params = [{transform_indices = @transform_0, window_bounds = array<i64: 16, 32>}, {transform_indices = @transform_1, window_bounds = array<i64: 16, 1>}, {pipeline_mode = #tpu.pipeline_mode<synchronous>, transform_indices = @transform_2, window_bounds = array<i64: 32, 64>}, {pipeline_mode = #tpu.pipeline_mode<synchronous>, transform_indices = @transform_3, window_bounds = array<i64: 1, 64>}, {transform_indices = @transform_4, window_bounds = array<i64: 16, 64>}]} {
    %c0 = arith.constant 0 : index
    %c0_0 = arith.constant 0 : index
    %0 = vector.load %arg1[%c0, %c0_0] : memref<16x32xbf16, #tpu.memory_space<vmem>>, vector<16x32xbf16>
    %c0_1 = arith.constant 0 : index
    %c0_2 = arith.constant 0 : index
    %1 = vector.load %arg2[%c0_1, %c0_2] : memref<16x1xbf16, #tpu.memory_space<vmem>>, vector<16x1xbf16>
    %2 = vector.broadcast %1 : vector<16x1xbf16> to vector<16x32xbf16>
    %3 = arith.mulf %0, %2 : vector<16x32xbf16>
    %c0_3 = arith.constant 0 : index
    %c0_4 = arith.constant 0 : index
    %4 = vector.load %arg3[%c0_3, %c0_4] : memref<32x64xbf16, #tpu.memory_space<vmem>>, vector<32x64xbf16>
    %cst = arith.constant dense<0.000000e+00> : vector<16x64xf32>
    %5 = tpu.matmul %3, %4, %cst {dimension_numbers = #tpu.dot_dimension_numbers<[1], [0], [0], [1], [0, 0, 1, 1], [], []>} : vector<16x32xbf16>, vector<32x64xbf16>, vector<16x64xf32> -> vector<16x64xf32>
    %c0_5 = arith.constant 0 : index
    %c0_6 = arith.constant 0 : index
    %6 = vector.load %arg4[%c0_5, %c0_6] : memref<1x64xf32, #tpu.memory_space<vmem>>, vector<1x64xf32>
    %7 = vector.broadcast %6 : vector<1x64xf32> to vector<16x64xf32>
    %8 = arith.addf %5, %7 : vector<16x64xf32>
    %cst_7 = arith.constant 0.000000e+00 : f32
    %9 = vector.broadcast %cst_7 : f32 to vector<16x64xf32>
    %10 = arith.maximumf %8, %9 : vector<16x64xf32>
    %11 = arith.truncf %10 : vector<16x64xf32> to vector<16x64xbf16>
    %c0_8 = arith.constant 0 : index
    %c0_9 = arith.constant 0 : index
    %12 = vector.load %arg5[%c0_8, %c0_9] : memref<16x64xbf16, #tpu.memory_space<vmem>>, vector<16x64xbf16>
    tpu.vector_store %arg5[%c0_8, %c0_9], %11 {strides = array<i32>} : memref<16x64xbf16, #tpu.memory_space<vmem>>, vector<16x64xbf16>,
    return
  }
  func.func @transform_0(%arg0: i32) -> (i32, i32) {
    %c0_i32 = arith.constant 0 : i32
    %c0_i32_0 = arith.constant 0 : i32
    return %arg0, %c0_i32 : i32, i32
  }
  func.func @transform_1(%arg0: i32) -> (i32, i32) {
    %c0_i32 = arith.constant 0 : i32
    %c0_i32_0 = arith.constant 0 : i32
    return %arg0, %c0_i32 : i32, i32
  }
  func.func @transform_2(%arg0: i32) -> (i32, i32) {
    %c0_i32 = arith.constant 0 : i32
    %c0_i32_0 = arith.constant 0 : i32
    %c0_i32_1 = arith.constant 0 : i32
    return %c0_i32, %c0_i32_0 : i32, i32
  }
  func.func @transform_3(%arg0: i32) -> (i32, i32) {
    %c0_i32 = arith.constant 0 : i32
    %c0_i32_0 = arith.constant 0 : i32
    %c0_i32_1 = arith.constant 0 : i32
    return %c0_i32, %c0_i32_0 : i32, i32
  }
  func.func @transform_4(%arg0: i32) -> (i32, i32) {
    %c0_i32 = arith.constant 0 : i32
    %c0_i32_0 = arith.constant 0 : i32
    return %arg0, %c0_i32 : i32, i32
  }
}

module attributes {stable_mosaic.version = 11 : i64} {
  func.func @_mm_mask_kernel(%arg0: i32, %arg1: memref<16x32xbf16, #tpu.memory_space<vmem>>, %arg2: memref<16x1xbf16, #tpu.memory_space<vmem>>, %arg3: memref<32x16xbf16, #tpu.memory_space<vmem>>, %arg4: memref<1x16xf32, #tpu.memory_space<vmem>>, %arg5: memref<16x16xf32, #tpu.memory_space<vmem>>) attributes {dimension_semantics = [#tpu.dimension_semantics<parallel>], iteration_bounds = array<i64: 1>, scalar_prefetch = 0 : i64, scratch_operands = 0 : i64, tpu.core_type = #tpu.core_type<tc>, window_params = [{transform_indices = @transform_0, window_bounds = array<i64: 16, 32>}, {transform_indices = @transform_1, window_bounds = array<i64: 16, 1>}, {pipeline_mode = #tpu.pipeline_mode<synchronous>, transform_indices = @transform_2, window_bounds = array<i64: 32, 16>}, {pipeline_mode = #tpu.pipeline_mode<synchronous>, transform_indices = @transform_3, window_bounds = array<i64: 1, 16>}, {transform_indices = @transform_4, window_bounds = array<i64: 16, 16>}]} {
    %c0 = arith.constant 0 : index
    %c0_0 = arith.constant 0 : index
    %0 = vector.load %arg1[%c0, %c0_0] : memref<16x32xbf16, #tpu.memory_space<vmem>>, vector<16x32xbf16>
    %c0_1 = arith.constant 0 : index
    %c0_2 = arith.constant 0 : index
    %1 = vector.load %arg2[%c0_1, %c0_2] : memref<16x1xbf16, #tpu.memory_space<vmem>>, vector<16x1xbf16>
    %2 = vector.broadcast %1 : vector<16x1xbf16> to vector<16x32xbf16>
    %3 = arith.mulf %0, %2 : vector<16x32xbf16>
    %c0_3 = arith.constant 0 : index
    %c0_4 = arith.constant 0 : index
    %4 = vector.load %arg3[%c0_3, %c0_4] : memref<32x16xbf16, #tpu.memory_space<vmem>>, vector<32x16xbf16>
    %cst = arith.constant dense<0.000000e+00> : vector<16x16xf32>
    %5 = tpu.matmul %3, %4, %cst {dimension_numbers = #tpu.dot_dimension_numbers<[1], [0], [0], [1], [0, 0, 1, 1], [], []>} : vector<16x32xbf16>, vector<32x16xbf16>, vector<16x16xf32> -> vector<16x16xf32>
    %c0_5 = arith.constant 0 : index
    %c0_6 = arith.constant 0 : index
    %6 = vector.load %arg4[%c0_5, %c0_6] : memref<1x16xf32, #tpu.memory_space<vmem>>, vector<1x16xf32>
    %7 = vector.broadcast %6 : vector<1x16xf32> to vector<16x16xf32>
    %8 = arith.addf %5, %7 : vector<16x16xf32>
    %9 = arith.extf %1 : vector<16x1xbf16> to vector<16x1xf32>
    %10 = vector.broadcast %9 : vector<16x1xf32> to vector<16x16xf32>
    %11 = arith.mulf %8, %10 : vector<16x16xf32>
    %c0_7 = arith.constant 0 : index
    %c0_8 = arith.constant 0 : index
    %12 = vector.load %arg5[%c0_7, %c0_8] : memref<16x16xf32, #tpu.memory_space<vmem>>, vector<16x16xf32>
    tpu.vector_store %arg5[%c0_7, %c0_8], %11 {strides = array<i32>} : memref<16x16xf32, #tpu.memory_space<vmem>>, vector<16x16xf32>,
    return
  }
  func.func @transform_0(%arg0: i32) -> (i32, i32) {
    %c0_i32 = arith.constant 0 : i32
    %c0_i32_0 = arith.constant 0 : i32
    return %arg0, %c0_i32 : i32, i32
  }
  func.func @transform_1(%arg0: i32) -> (i32, i32) {
    %c0_i32 = arith.constant 0 : i32
    %c0_i32_0 = arith.constant 0 : i32
    return %arg0, %c0_i32 : i32, i32
  }
  func.func @transform_2(%arg0: i32) -> (i32, i32) {
    %c0_i32 = arith.constant 0 : i32
    %c0_i32_0 = arith.constant 0 : i32
    %c0_i32_1 = arith.constant 0 : i32
    return %c0_i32, %c0_i32_0 : i32, i32
  }
  func.func @transform_3(%arg0: i32) -> (i32, i32) {
    %c0_i32 = arith.constant 0 : i32
    %c0_i32_0 = arith.constant 0 : i32
    %c0_i32_1 = arith.constant 0 : i32
    return %c0_i32, %c0_i32_0 : i32, i32
  }
  func.func @transform_4(%arg0: i32) -> (i32, i32) {
    %c0_i32 = arith.constant 0 : i32
    %c0_i32_0 = arith.constant 0 : i32
    return %arg0, %c0_i32 : i32, i32
  }
}

module attributes {stable_mosaic.version = 11 : i64} {
  func.func @_mm_res_ln_kernel(%arg0: i32, %arg1: memref<16x64xbf16, #tpu.memory_space<vmem>>, %arg2: memref<16x1xbf16, #tpu.memory_space<vmem>>, %arg3: memref<16x32xbf16, #tpu.memory_space<vmem>>, %arg4: memref<64x32xbf16, #tpu.memory_space<vmem>>, %arg5: memref<1x32xf32, #tpu.memory_space<vmem>>, %arg6: memref<1x32xf32, #tpu.memory_space<vmem>>, %arg7: memref<1x32xf32, #tpu.memory_space<vmem>>, %arg8: memref<16x32xbf16, #tpu.memory_space<vmem>>) attributes {dimension_semantics = [#tpu.dimension_semantics<parallel>], iteration_bounds = array<i64: 1>, scalar_prefetch = 0 : i64, scratch_operands = 0 : i64, tpu.core_type = #tpu.core_type<tc>, window_params = [{transform_indices = @transform_0, window_bounds = array<i64: 16, 64>}, {transform_indices = @transform_1, window_bounds = array<i64: 16, 1>}, {transform_indices = @transform_2, window_bounds = array<i64: 16, 32>}, {pipeline_mode = #tpu.pipeline_mode<synchronous>, transform_indices = @transform_3, window_bounds = array<i64: 64, 32>}, {pipeline_mode = #tpu.pipeline_mode<synchronous>, transform_indices = @transform_4, window_bounds = array<i64: 1, 32>}, {pipeline_mode = #tpu.pipeline_mode<synchronous>, transform_indices = @transform_5, window_bounds = array<i64: 1, 32>}, {pipeline_mode = #tpu.pipeline_mode<synchronous>, transform_indices = @transform_6, window_bounds = array<i64: 1, 32>}, {transform_indices = @transform_7, window_bounds = array<i64: 16, 32>}]} {
    %c0 = arith.constant 0 : index
    %c0_0 = arith.constant 0 : index
    %0 = vector.load %arg1[%c0, %c0_0] : memref<16x64xbf16, #tpu.memory_space<vmem>>, vector<16x64xbf16>
    %c0_1 = arith.constant 0 : index
    %c0_2 = arith.constant 0 : index
    %1 = vector.load %arg2[%c0_1, %c0_2] : memref<16x1xbf16, #tpu.memory_space<vmem>>, vector<16x1xbf16>
    %2 = vector.broadcast %1 : vector<16x1xbf16> to vector<16x64xbf16>
    %3 = arith.mulf %0, %2 : vector<16x64xbf16>
    %c0_3 = arith.constant 0 : index
    %c0_4 = arith.constant 0 : index
    %4 = vector.load %arg4[%c0_3, %c0_4] : memref<64x32xbf16, #tpu.memory_space<vmem>>, vector<64x32xbf16>
    %cst = arith.constant dense<0.000000e+00> : vector<16x32xf32>
    %5 = tpu.matmul %3, %4, %cst {dimension_numbers = #tpu.dot_dimension_numbers<[1], [0], [0], [1], [0, 0, 1, 1], [], []>} : vector<16x64xbf16>, vector<64x32xbf16>, vector<16x32xf32> -> vector<16x32xf32>
    %c0_5 = arith.constant 0 : index
    %c0_6 = arith.constant 0 : index
    %6 = vector.load %arg5[%c0_5, %c0_6] : memref<1x32xf32, #tpu.memory_space<vmem>>, vector<1x32xf32>
    %7 = vector.broadcast %6 : vector<1x32xf32> to vector<16x32xf32>
    %8 = arith.addf %5, %7 : vector<16x32xf32>
    %9 = arith.extf %1 : vector<16x1xbf16> to vector<16x1xf32>
    %10 = vector.broadcast %9 : vector<16x1xf32> to vector<16x32xf32>
    %11 = arith.mulf %8, %10 : vector<16x32xf32>
    %c0_7 = arith.constant 0 : index
    %c0_8 = arith.constant 0 : index
    %12 = vector.load %arg3[%c0_7, %c0_8] : memref<16x32xbf16, #tpu.memory_space<vmem>>, vector<16x32xbf16>
    %13 = arith.extf %12 : vector<16x32xbf16> to vector<16x32xf32>
    %14 = arith.addf %13, %11 : vector<16x32xf32>
    %cst_9 = arith.constant dense<0.000000e+00> : vector<16xf32>
    %15 = vector.multi_reduction <add>, %14, %cst_9 [1] : vector<16x32xf32> to vector<16xf32>
    %16 = vector.shape_cast %15 : vector<16xf32> to vector<16x1xf32>
    %cst_10 = arith.constant 3.200000e+01 : f32
    %17 = vector.broadcast %cst_10 : f32 to vector<16x1xf32>
    %18 = arith.divf %16, %17 : vector<16x1xf32>
    %19 = vector.broadcast %18 : vector<16x1xf32> to vector<16x32xf32>
    %20 = arith.subf %14, %19 : vector<16x32xf32>
    %21 = arith.mulf %20, %20 : vector<16x32xf32>
    %cst_11 = arith.constant dense<0.000000e+00> : vector<16xf32>
    %22 = vector.multi_reduction <add>, %21, %cst_11 [1] : vector<16x32xf32> to vector<16xf32>
    %23 = vector.shape_cast %22 : vector<16xf32> to vector<16x1xf32>
    %cst_12 = arith.constant 3.200000e+01 : f32
    %24 = vector.broadcast %cst_12 : f32 to vector<16x1xf32>
    %25 = arith.divf %23, %24 : vector<16x1xf32>
    %cst_13 = arith.constant 9.99999974E-6 : f32
    %26 = vector.broadcast %cst_13 : f32 to vector<16x1xf32>
    %27 = arith.addf %25, %26 : vector<16x1xf32>
    %28 = math.rsqrt %27 : vector<16x1xf32>
    %29 = vector.broadcast %28 : vector<16x1xf32> to vector<16x32xf32>
    %30 = arith.mulf %20, %29 : vector<16x32xf32>
    %c0_14 = arith.constant 0 : index
    %c0_15 = arith.constant 0 : index
    %31 = vector.load %arg6[%c0_14, %c0_15] : memref<1x32xf32, #tpu.memory_space<vmem>>, vector<1x32xf32>
    %32 = vector.broadcast %31 : vector<1x32xf32> to vector<16x32xf32>
    %33 = arith.mulf %30, %32 : vector<16x32xf32>
    %c0_16 = arith.constant 0 : index
    %c0_17 = arith.constant 0 : index
    %34 = vector.load %arg7[%c0_16, %c0_17] : memref<1x32xf32, #tpu.memory_space<vmem>>, vector<1x32xf32>
    %35 = vector.broadcast %34 : vector<1x32xf32> to vector<16x32xf32>
    %36 = arith.addf %33, %35 : vector<16x32xf32>
    %37 = arith.truncf %36 : vector<16x32xf32> to vector<16x32xbf16>
    %c0_18 = arith.constant 0 : index
    %c0_19 = arith.constant 0 : index
    %38 = vector.load %arg8[%c0_18, %c0_19] : memref<16x32xbf16, #tpu.memory_space<vmem>>, vector<16x32xbf16>
    tpu.vector_store %arg8[%c0_18, %c0_19], %37 {strides = array<i32>} : memref<16x32xbf16, #tpu.memory_space<vmem>>, vector<16x32xbf16>,
    return
  }
  func.func @transform_0(%arg0: i32) -> (i32, i32) {
    %c0_i32 = arith.constant 0 : i32
    %c0_i32_0 = arith.constant 0 : i32
    return %arg0, %c0_i32 : i32, i32
  }
  func.func @transform_1(%arg0: i32) -> (i32, i32) {
    %c0_i32 = arith.constant 0 : i32
    %c0_i32_0 = arith.constant 0 : i32
    return %arg0, %c0_i32 : i32, i32
  }
  func.func @transform_2(%arg0: i32) -> (i32, i32) {
    %c0_i32 = arith.constant 0 : i32
    %c0_i32_0 = arith.constant 0 : i32
    return %arg0, %c0_i32 : i32, i32
  }
  func.func @transform_3(%arg0: i32) -> (i32, i32) {
    %c0_i32 = arith.constant 0 : i32
    %c0_i32_0 = arith.constant 0 : i32
    %c0_i32_1 = arith.constant 0 : i32
    return %c0_i32, %c0_i32_0 : i32, i32
  }
  func.func @transform_4(%arg0: i32) -> (i32, i32) {
    %c0_i32 = arith.constant 0 : i32
    %c0_i32_0 = arith.constant 0 : i32
    %c0_i32_1 = arith.constant 0 : i32
    return %c0_i32, %c0_i32_0 : i32, i32
  }
  func.func @transform_5(%arg0: i32) -> (i32, i32) {
    %c0_i32 = arith.constant 0 : i32
    %c0_i32_0 = arith.constant 0 : i32
    %c0_i32_1 = arith.constant 0 : i32
    return %c0_i32, %c0_i32_0 : i32, i32
  }
  func.func @transform_6(%arg0: i32) -> (i32, i32) {
    %c0_i32 = arith.constant 0 : i32
    %c0_i32_0 = arith.constant 0 : i32
    %c0_i32_1 = arith.constant 0 : i32
    return %c0_i32, %c0_i32_0 : i32, i32
  }
  func.func @transform_7(%arg0: i32) -> (i32, i32) {
    %c0_i32 = arith.constant 0 : i32
    %c0_i32_0 = arith.constant 0 : i32
    return %arg0, %c0_i32 : i32, i32
  }
}

</mosaic_0001>

<bundles_post_ra>
// kernel: text_encoder_forward.15
= control target key start
LH: loop header
LB: loop body
LE: loop exit
PB: predicated region body
PF: predicated region fallthrough
CT: control target
= control target key end

     0   :  { %v203_v0 = vmov 0.0   ;;  %vm204_vm0 = vmmov 0   ;;  %vm57_vm1 = vcmask 261120   ;;  %vm161_vm2 = vcmask 257024   ;;  %s277_s1 = inlined_call_operand.vmem [shape: bf16[16,1], index: 1, kind: input, shape index: {}]   ;;  %s278_s3 = inlined_call_operand.vmem [shape: bf16[32,32], index: 3, kind: input, shape index: {}]   ;;  %s279_s0 = inlined_call_operand.vmem [shape: bf16[16,32], index: 0, kind: input, shape index: {}]   ;;  %s280_s2 = inlined_call_operand.vmem [shape: bf16[16,32], index: 2, kind: input, shape index: {}]   ;;  %s281_s4 = inlined_call_operand.vmem [shape: f32[1,32], index: 4, kind: input, shape index: {}]   ;;  %s282_s5 = inlined_call_operand.vmem [shape: f32[1,32], index: 5, kind: input, shape index: {}]   ;;  %s283_s6 = inlined_call_operand.vmem [shape: f32[1,32], index: 6, kind: input, shape index: {}]   ;;  %s284_s7 = inlined_call_operand.vmem [shape: bf16[16,32], index: 7, kind: output, shape index: {}]  }
   0x1   :  { %186 = vmatprep.subr.bf16.mxu0 %v203_v0  ;;  %v196_v1 = vld [vmem:[%s278_s3] sm:$0xff]   ;;  %190 = vmatprep.mubr.msk.bf16.mxu0 %vm204_vm0, %v203_v0  ;;  %v197_v2 = vld [vmem:[%s278_s3 + $0x8] sm:$0xff]  }
   0x2   :  { %187 = vmatpush3.bf16.msra.mxu0 %v196_v1  ;;  %v198_v3 = vld [vmem:[%s279_s0] sm:$0xff]  }
   0x3   :  { %188 = vmatprep.subr.bf16.mxu0 %v203_v0  ;;  %v180_v4 = vld [vmem:[%s280_s2] sm:$0xff]  }
   0x4   :  { %v168_v5 = vld [vmem:[%s281_s4] ss:$0 sm:$0xff]  ;;  %v181_v6 = vunpack.c.l.bf16 %v180_v4  ;;  %v182_v10 = vunpack.c.h.bf16 %v180_v4 }
   0x5   :  { %v173_v35 = vld [vmem:[%s282_s5] ss:$0 sm:$0xff] }
   0x6   :  { %189 = vmatpush3.bf16.msra.mxu0 %v197_v2  ;;  %v174_v37 = vld [vmem:[%s283_s6] ss:$0 sm:$0xff] }
   0x9   :  { %191 = vmatmul.mubr.msk.bf16.vlgmr.msra.gmra.mrb[0].mxu0 %vm57_vm1, %v198_v3 }
  0xdc   :  { %v95_v7 = vpop.f32.mrb[0].mxu0 }
  0xdd   :  { %v96_v8 = vadd.f32 %v168_v5, %v95_v7  ;;  %v192_v9 = vpop.f32.mrb[1].mxu0 }
  0xde   :  { %v98_v11 = vpop.f32.mrb[2].mxu0 }
  0xdf   :  { %v99_v12 = vadd.f32 %v168_v5, %v98_v11  ;;  %v193_v13 = vpop.f32.mrb[3].mxu0  ;;  %v106_v14 = vadd.f32 %v181_v6, %v96_v8 }
  0xe1   :  { %v108_v15 = vsel %vm57_vm1, %v106_v14, 0.0  ;;  %v107_v16 = vadd.f32 %v182_v10, %v99_v12 }
  0xe2   :  { %109 = vadd.xlane.f32.xlu0 %v108_v15 }
  0xe3   :  { %v111_v17 = vsel %vm57_vm1, %v107_v16, 0.0 }
  0xe6   :  { %112 = vadd.xlane.f32.xlu0 %v111_v17 }
 0x16f   :  { %v110_v18 = vpop.xlane.xlu0 %109 }
 0x170   :  { %v115_v19 = vmul.f32 0.03125, %v110_v18 }
 0x172   :  { %v117_v20 = vsub.f32 %v106_v14, %v115_v19 }
 0x173   :  { %v113_v21 = vpop.xlane.xlu0 %112 }
 0x174   :  { %v116_v22 = vmul.f32 0.03125, %v113_v21  ;;  %v119_v23 = vmul.f32 %v117_v20, %v117_v20 }
 0x176   :  { %v118_v24 = vsub.f32 %v107_v16, %v116_v22  ;;  %v121_v25 = vsel %vm57_vm1, %v119_v23, 0.0 }
 0x177   :  { %122 = vadd.xlane.f32.xlu1 %v121_v25 }
 0x178   :  { %v120_v26 = vmul.f32 %v118_v24, %v118_v24 }
 0x17a   :  { %v124_v27 = vsel %vm57_vm1, %v120_v26, 0.0 }
 0x17b   :  { %125 = vadd.xlane.f32.xlu1 %v124_v27 }
 0x204   :  { %v123_v28 = vpop.xlane.xlu1 %122 }
 0x205   :  { %v127_v29 = vmul.f32 0.03125, %v123_v28 }
 0x207   :  { %v129_v30 = vadd.f32 1e-05, %v127_v29 }
 0x208   :  { %v126_v31 = vpop.xlane.xlu1 %125 }
 0x209   :  { %199 = vrsqrt.f32 %v129_v30  ;;  %v128_v32 = vmul.f32 0.03125, %v126_v31 }
 0x20b   :  { %v130_v33 = vadd.f32 1e-05, %v128_v32 }
 0x20d   :  { %201 = vrsqrt.f32 %v130_v33 }
 0x213   :  { %v200_v34 = vpop.eup %199 }
 0x214   :  { %v133_v36 = vmul.f32 %v200_v34, %v117_v20 }
 0x216   :  { %v142_v38 = vmul.f32 %v173_v35, %v133_v36 }
 0x217   :  { %v202_v39 = vpop.eup %201 }
 0x218   :  { %v151_v40 = vadd.f32 %v174_v37, %v142_v38  ;;  %v134_v41 = vmul.f32 %v202_v39, %v118_v24 }
 0x21a   :  { %v177_v42 = vpack.c.bf16 %v151_v40, %v151_v40  ;;  %v143_v43 = vmul.f32 %v173_v35, %v134_v41 }
 0x21c   :  { %162 = vst.msk [vmem:[%s284_s7] sm:$0xf] %vm161_vm2, %v177_v42  ;;  %v152_v44 = vadd.f32 %v174_v37, %v143_v43 }
 0x21e   :  { %v178_v45 = vpack.c.bf16 %v152_v44, %v152_v44 }
 0x220   :  { %163 = vst.msk [vmem:[%s284_s7 + $0x4] sm:$0xf] %vm161_vm2, %v178_v45 }

// kernel: text_encoder_forward.13
= control target key start
LH: loop header
LB: loop body
LE: loop exit
PB: predicated region body
PF: predicated region fallthrough
CT: control target
= control target key end

     0   :  { %v130_v0 = vmov 0.0   ;;  %vm131_vm0 = vmmov 0   ;;  %vm45_vm1 = vcmask 261120   ;;  %vm98_vm2 = vcmask 781312   ;;  %s170_s1 = inlined_call_operand.vmem [shape: bf16[32,96], index: 1, kind: input, shape index: {}]   ;;  %s171_s0 = inlined_call_operand.vmem [shape: bf16[16,32], index: 0, kind: input, shape index: {}]   ;;  %s172_s2 = inlined_call_operand.vmem [shape: f32[1,96], index: 2, kind: input, shape index: {}]   ;;  %s173_s3 = inlined_call_operand.vmem [shape: bf16[16,96], index: 3, kind: output, shape index: {}]  }
   0x1   :  { %117 = vmatprep.subr.bf16.mxu0 %v130_v0  ;;  %v127_v1 = vld [vmem:[%s170_s1] sm:$0xff]   ;;  %121 = vmatprep.mubr.msk.bf16.mxu0 %vm131_vm0, %v130_v0  ;;  %v128_v2 = vld [vmem:[%s170_s1 + $0x8] sm:$0xff]  }
   0x2   :  { %118 = vmatpush3.bf16.msra.mxu0 %v127_v1  ;;  %v129_v3 = vld [vmem:[%s171_s0] sm:$0xff]  }
   0x3   :  { %119 = vmatprep.subr.bf16.mxu0 %v130_v0  ;;  %v105_v4 = vld [vmem:[%s172_s2] ss:$0 sm:$0xff] }
   0x6   :  { %120 = vmatpush3.bf16.msra.mxu0 %v128_v2 }
   0x9   :  { %122 = vmatmul.mubr.msk.bf16.vlgmr.msra.gmra.mrb[0].mxu0 %vm45_vm1, %v129_v3 }
  0xdc   :  { %v83_v5 = vpop.f32.mrb[0].mxu0 }
  0xdd   :  { %v84_v6 = vadd.f32 %v105_v4, %v83_v5  ;;  %v123_v7 = vpop.f32.mrb[1].mxu0 }
  0xde   :  { %v86_v8 = vpop.f32.mrb[2].mxu0 }
  0xdf   :  { %v112_v9 = vpack.c.bf16 %v84_v6, %v84_v6  ;;  %v87_v10 = vadd.f32 %v105_v4, %v86_v8  ;;  %v124_v11 = vpop.f32.mrb[3].mxu0 }
  0xe1   :  { %99 = vst.msk [vmem:[%s173_s3] sm:$0xf] %vm98_vm2, %v112_v9  ;;  %v113_v12 = vpack.c.bf16 %v87_v10, %v87_v10 }
  0xe3   :  { %100 = vst.msk [vmem:[%s173_s3 + $0x4] sm:$0xf] %vm98_vm2, %v113_v12 }

// kernel: text_encoder_forward.12
= control target key start
LH: loop header
LB: loop body
LE: loop exit
PB: predicated region body
PF: predicated region fallthrough
CT: control target
= control target key end

     0   :  { %vm51_vm0 = vcmask 1043456   ;;  %v181_v0 = vmov 0.0   ;;  %vm182_vm1 = vmmov 0   ;;  %v183_v3 = vmov 0   ;;  %s238_s3 = inlined_call_operand.vmem [shape: bf16[24,32], index: 3, kind: input, shape index: {}]   ;;  %s239_s2 = inlined_call_operand.vmem [shape: bf16[16,1], index: 2, kind: input, shape index: {}]   ;;  %s240_s0 = inlined_call_operand.vmem [shape: bf16[16,24], index: 0, kind: input, shape index: {}]   ;;  %s241_s1 = inlined_call_operand.vmem [shape: bf16[16,32], index: 1, kind: input, shape index: {}]   ;;  %s242_s4 = inlined_call_operand.vmem [shape: f32[1,32], index: 4, kind: input, shape index: {}]   ;;  %s243_s5 = inlined_call_operand.vmem [shape: bf16[16,32], index: 5, kind: output, shape index: {}]  }
   0x1   :  { %161 = vmatprep.subr.bf16.mxu0 %v181_v0  ;;  %v178_v1 = vld [vmem:[%s238_s3] sm:$0xff]   ;;  %165 = vmatprep.mubr.msk.bf16.mxu0 %vm182_vm1, %v181_v0  ;;  %v179_v2 = vld [vmem:[%s238_s3 + $0x8] ss:$0 sps:$4 sm:$0xff]   ;;  %vm47_vm2 = vcmask 195584   ;;  %vm134_vm5 = vcmask 257024  }
   0x2   :  { %172 = vset.pattern.permute.xlu0 %v183_v3  ;;  %162 = vmatpush3.bf16.msra.mxu0 %v178_v1  ;;  %v155_v4 = vld [vmem:[%s239_s2] sm:$0xff]   ;;  %v53_v5 = vsel %vm51_vm0, %v179_v2, 0 }
   0x3   :  { %163 = vmatprep.subr.bf16.mxu0 %v181_v0  ;;  %v156_v6 = vunpack.c.l.bf16 %v155_v4  ;;  %v157_v7 = vunpack.c.h.bf16 %v155_v4  ;;  %v180_v8 = vld [vmem:[%s240_s0] sm:$0xff]  }
   0x4   :  { %v151_v10 = vld [vmem:[%s241_s1] sm:$0xff]  }
   0x5   :  { %v173_v9 = vpack.i.bf16 %v157_v7, %v156_v6  ;;  %v141_v11 = vld [vmem:[%s242_s4] ss:$0 sm:$0xff]  ;;  %v152_v12 = vunpack.c.l.bf16 %v151_v10  ;;  %v153_v16 = vunpack.c.h.bf16 %v151_v10 }
   0x6   :  { %164 = vmatpush3.bf16.msra.mxu0 %v53_v5 }
   0x7   :  { %174 = vperm.xlu0 %172, %v173_v9  }
   0x9   :  { %166 = vmatmul.mubr.msk.bf16.vlgmr.msra.gmra.mrb[0].mxu0 %vm47_vm2, %v180_v8 }
  0x86   :  { %v175_v21 = vpop.permute.xlu0 %174 }
  0x87   :  { %v176_v24 = vunpack.i.l.bf16 %v175_v21  ;;  %v177_v27 = vunpack.i.h.bf16 %v175_v21 }
  0xdc   :  { %v89_v13 = vpop.f32.mrb[0].mxu0 }
  0xdd   :  { %v90_v14 = vadd.f32 %v141_v11, %v89_v13  ;;  %v167_v15 = vpop.f32.mrb[1].mxu0 }
  0xde   :  { %v92_v17 = vpop.f32.mrb[2].mxu0 }
  0xdf   :  { %v100_v18 = vadd.f32 %v152_v12, %v90_v14  ;;  %v93_v19 = vadd.f32 %v141_v11, %v92_v17  ;;  %v168_v20 = vpop.f32.mrb[3].mxu0 }
  0xe1   :  { %v102_v22 = vmul.f32 5.656854, %v100_v18  ;;  %v101_v23 = vadd.f32 %v153_v16, %v93_v19 }
  0xe3   :  { %v106_v25 = vmul.f32 0.1, %v102_v22  ;;  %v103_v26 = vmul.f32 5.656854, %v101_v23  ;;  %vm104_vm3 = vcmp.ge.f32.partialorder %v102_v22, 0.0 }
  0xe5   :  { %v107_v28 = vmul.f32 0.1, %v103_v26  ;;  %vm105_vm4 = vcmp.ge.f32.partialorder %v103_v26, 0.0  ;;  %v108_v29 = vsel %vm104_vm3, %v102_v22, %v106_v25 }
  0xe6   :  { %v124_v30 = vmul.f32 %v176_v24, %v108_v29 }
  0xe7   :  { %v109_v31 = vsel %vm105_vm4, %v103_v26, %v107_v28 }
  0xe8   :  { %v125_v32 = vmul.f32 %v177_v27, %v109_v31  ;;  %v148_v33 = vpack.c.bf16 %v124_v30, %v124_v30 }
  0xea   :  { %v149_v34 = vpack.c.bf16 %v125_v32, %v125_v32  ;;  %135 = vst.msk [vmem:[%s243_s5] sm:$0xf] %vm134_vm5, %v148_v33 }
  0xec   :  { %136 = vst.msk [vmem:[%s243_s5 + $0x4] sm:$0xf] %vm134_vm5, %v149_v34 }

// kernel: text_encoder_forward.16
= control target key start
LH: loop header
LB: loop body
LE: loop exit
PB: predicated region body
PF: predicated region fallthrough
CT: control target
= control target key end

     0   :  { %v165_v0 = vmov 0   ;;  %v166_v4 = vmov 0.0   ;;  %vm167_vm0 = vmmov 0   ;;  %v168_v6 = vmov 839922192   ;;  %s221_s1 = inlined_call_operand.vmem [shape: bf16[16,1], index: 1, kind: input, shape index: {}]   ;;  %s222_s2 = inlined_call_operand.vmem [shape: bf16[32,64], index: 2, kind: input, shape index: {}]   ;;  %s223_s0 = inlined_call_operand.vmem [shape: bf16[16,32], index: 0, kind: input, shape index: {}]   ;;  %s224_s3 = inlined_call_operand.vmem [shape: f32[1,64], index: 3, kind: input, shape index: {}]   ;;  %s225_s4 = inlined_call_operand.vmem [shape: bf16[16,64], index: 4, kind: output, shape index: {}]  }
   0x1   :  { %162 = vset.pattern.permute.xlu0 %v165_v0  ;;  %v20_v1 = vld [vmem:[%s221_s1] sm:$0xf]  ;;  %v21_v2 = vld [vmem:[%s221_s1 + $0x4] sm:$0xf]  ;;  %150 = vmatprep.subr.bf16.mxu0 %v166_v4  ;;  %v164_v5 = vld [vmem:[%s222_s2 + $0x8] sm:$0xff]   ;;  %v28_v7 = vunpack.c.l.s4 %v168_v6  ;;  %v30_v8 = vlaneseq  ;;  %vm76_vm1 = vcmask 261120  }
   0x2   :  { %24 = vperm.xlu0 %162, %v20_v1   ;;  %v163_v3 = vld [vmem:[%s222_s2] sm:$0xff]   ;;  %154 = vmatprep.mubr.msk.bf16.mxu0 %vm167_vm0, %v166_v4  ;;  %vm131_vm2 = vcmask 519168  }
   0x3   :  { %151 = vmatpush3.bf16.msra.mxu0 %v163_v3  ;;  %v29_v9 = vunpack.c.0.s8 %v28_v7  ;;  %v31_v10 = vshrl.u32 %v30_v8, 7  ;;  %v18_v14 = vld [vmem:[%s223_s0] sm:$0xf]  ;;  %v19_v16 = vld [vmem:[%s223_s0 + $0x4] sm:$0xf] }
   0x4   :  { %152 = vmatprep.subr.bf16.mxu0 %v166_v4  ;;  %v138_v21 = vld [vmem:[%s224_s3] ss:$0 sm:$0xff] }
   0x5   :  { %v32_v11 = vsub.s32 %v29_v9, %v31_v10 }
   0x6   :  { %36 = vperm.xlu0 %162, %v21_v2  }
   0x7   :  { %153 = vmatpush3.bf16.msra.mxu0 %v164_v5 }
  0x81   :  { %v25_v12 = vpop.permute.xlu0 %24 }
  0x82   :  { %v33_v13 = vrot.slane %v25_v12, %v32_v11 }
  0x84   :  { %v46_v18 = vmul.bf16 %v33_v13, %v18_v14 }
  0x85   :  { %v37_v15 = vpop.permute.xlu0 %36 }
  0x86   :  { %v45_v17 = vrot.slane %v37_v15, %v32_v11 }
  0x88   :  { %v47_v19 = vmul.bf16 %v45_v17, %v19_v16 }
  0x8a   :  { %v139_v20 = vcombine.low %v46_v18, %v47_v19 }
  0x8c   :  { %155 = vmatmul.mubr.msk.bf16.vlgmr.msra.gmra.mrb[0].mxu0 %vm76_vm1, %v139_v20 }
 0x15f   :  { %v114_v22 = vpop.f32.mrb[0].mxu0 }
 0x160   :  { %v115_v23 = vadd.f32 %v138_v21, %v114_v22  ;;  %v156_v24 = vpop.f32.mrb[1].mxu0 }
 0x161   :  { %v117_v25 = vpop.f32.mrb[2].mxu0 }
 0x162   :  { %v121_v26 = vmax.f32 %v115_v23, 0.0  ;;  %v118_v27 = vadd.f32 %v138_v21, %v117_v25  ;;  %v157_v28 = vpop.f32.mrb[3].mxu0 }
 0x164   :  { %v145_v29 = vpack.c.bf16 %v121_v26, %v121_v26  ;;  %v122_v30 = vmax.f32 %v118_v27, 0.0 }
 0x166   :  { %132 = vst.msk [vmem:[%s225_s4] sm:$0xf] %vm131_vm2, %v145_v29  ;;  %v146_v31 = vpack.c.bf16 %v122_v30, %v122_v30 }
 0x168   :  { %133 = vst.msk [vmem:[%s225_s4 + $0x4] sm:$0xf] %vm131_vm2, %v146_v31 }

// kernel: text_encoder_forward.23
= control target key start
LH: loop header
LB: loop body
LE: loop exit
PB: predicated region body
PF: predicated region fallthrough
CT: control target
= control target key end

     0   :  { %v171_v0 = vmov 0   ;;  %v172_v4 = vmov 0.0   ;;  %vm173_vm0 = vmmov 0   ;;  %v174_v9 = vmov 839922192   ;;  %s227_s1 = inlined_call_operand.vmem [shape: bf16[16,1], index: 1, kind: input, shape index: {}]   ;;  %s228_s2 = inlined_call_operand.vmem [shape: bf16[32,16], index: 2, kind: input, shape index: {}]   ;;  %s229_s0 = inlined_call_operand.vmem [shape: bf16[16,32], index: 0, kind: input, shape index: {}]   ;;  %s230_s3 = inlined_call_operand.vmem [shape: f32[1,16], index: 3, kind: input, shape index: {}]   ;;  %s231_s4 = inlined_call_operand.vmem [shape: f32[16,16], index: 4, kind: output, shape index: {}]  }
   0x1   :  { %162 = vset.pattern.permute.xlu0 %v171_v0  ;;  %v20_v1 = vld [vmem:[%s227_s1] sm:$0xf]  ;;  %163 = vset.pattern.permute.xlu1 %v171_v0  ;;  %v21_v2 = vld [vmem:[%s227_s1 + $0x4] sm:$0xf]  ;;  %v170_v5 = vld [vmem:[%s228_s2 + $0x8] sm:$0xff]   ;;  %v28_v10 = vunpack.c.l.s4 %v174_v9  ;;  %v30_v11 = vlaneseq  ;;  %vm76_vm1 = vcmask 261120  }
   0x2   :  { %24 = vperm.xlu0 %162, %v20_v1   ;;  %v169_v3 = vld [vmem:[%s228_s2] sm:$0xff]   ;;  %150 = vmatprep.subr.bf16.mxu0 %v172_v4  ;;  %v121_v6 = vunpack.c.l.bf16 %v20_v1  ;;  %v122_v7 = vunpack.c.l.bf16 %v21_v2  ;;  %vm135_vm2 = vcmask 130048  }
   0x3   :  { %151 = vmatpush3.bf16.msra.mxu0 %v169_v3  ;;  %154 = vmatprep.mubr.msk.bf16.mxu0 %vm173_vm0, %v172_v4  ;;  %v29_v12 = vunpack.c.0.s8 %v28_v10  ;;  %v31_v13 = vshrl.u32 %v30_v11, 7  ;;  %v18_v17 = vld [vmem:[%s229_s0] sm:$0xf]  ;;  %v19_v19 = vld [vmem:[%s229_s0 + $0x4] sm:$0xf] }
   0x4   :  { %152 = vmatprep.subr.bf16.mxu0 %v172_v4  ;;  %v164_v8 = vpack.i.bf16 %v122_v7, %v121_v6  ;;  %v142_v25 = vld [vmem:[%s230_s3] ss:$0 sm:$0xff] }
   0x5   :  { %v32_v14 = vsub.s32 %v29_v12, %v31_v13 }
   0x6   :  { %36 = vperm.xlu0 %162, %v21_v2   ;;  %165 = vperm.xlu1 %163, %v164_v8  }
   0x7   :  { %153 = vmatpush3.bf16.msra.mxu0 %v170_v5 }
  0x81   :  { %v25_v15 = vpop.permute.xlu0 %24 }
  0x82   :  { %v33_v16 = vrot.slane %v25_v15, %v32_v14 }
  0x84   :  { %v46_v21 = vmul.bf16 %v33_v16, %v18_v17 }
  0x85   :  { %v37_v18 = vpop.permute.xlu0 %36  ;;  %v166_v24 = vpop.permute.xlu1 %165 }
  0x86   :  { %v45_v20 = vrot.slane %v37_v18, %v32_v14  ;;  %v167_v26 = vunpack.i.l.bf16 %v166_v24  ;;  %v168_v28 = vunpack.i.h.bf16 %v166_v24 }
  0x88   :  { %v47_v22 = vmul.bf16 %v45_v20, %v19_v19 }
  0x8a   :  { %v143_v23 = vcombine.low %v46_v21, %v47_v22 }
  0x8c   :  { %155 = vmatmul.mubr.msk.bf16.vlgmr.msra.gmra.mrb[0].mxu0 %vm76_vm1, %v143_v23 }
 0x15f   :  { %v114_v27 = vpop.f32.mrb[0].mxu0 }
 0x160   :  { %v115_v29 = vadd.f32 %v142_v25, %v114_v27  ;;  %v156_v30 = vpop.f32.mrb[1].mxu0 }
 0x161   :  { %v117_v31 = vpop.f32.mrb[2].mxu0 }
 0x162   :  { %v133_v32 = vmul.f32 %v167_v26, %v115_v29  ;;  %v118_v33 = vadd.f32 %v142_v25, %v117_v31  ;;  %v157_v34 = vpop.f32.mrb[3].mxu0 }
 0x164   :  { %136 = vst.msk [vmem:[%s231_s4] sm:$0xff] %vm135_vm2, %v133_v32  ;;  %v134_v35 = vmul.f32 %v168_v28, %v118_v33 }
 0x166   :  { %137 = vst.msk [vmem:[%s231_s4 + $0x8] sm:$0xff] %vm135_vm2, %v134_v35 }

// kernel: text_encoder_forward.17
= control target key start
LH: loop header
LB: loop body
LE: loop exit
PB: predicated region body
PF: predicated region fallthrough
CT: control target
= control target key end

     0   :  { %v280_v0 = vmov 0   ;;  %v281_v2 = vmov 0.0   ;;  %vm282_vm0 = vmmov 0   ;;  %v283_v11 = vmov 839922192   ;;  %s370_s1 = inlined_call_operand.vmem [shape: bf16[16,1], index: 1, kind: input, shape index: {}]   ;;  %s371_s3 = inlined_call_operand.vmem [shape: bf16[64,32], index: 3, kind: input, shape index: {}]   ;;  %s372_s0 = inlined_call_operand.vmem [shape: bf16[16,64], index: 0, kind: input, shape index: {}]   ;;  %s373_s4 = inlined_call_operand.vmem [shape: f32[1,32], index: 4, kind: input, shape index: {}]   ;;  %s374_s2 = inlined_call_operand.vmem [shape: bf16[16,32], index: 2, kind: input, shape index: {}]   ;;  %s375_s5 = inlined_call_operand.vmem [shape: f32[1,32], index: 5, kind: input, shape index: {}]   ;;  %s376_s6 = inlined_call_operand.vmem [shape: f32[1,32], index: 6, kind: input, shape index: {}]   ;;  %s377_s7 = inlined_call_operand.vmem [shape: bf16[16,32], index: 7, kind: output, shape index: {}]  }
   0x1   :  { %265 = vset.pattern.permute.xlu0 %v280_v0  ;;  %v29_v1 = vld [vmem:[%s370_s1] sm:$0xf]  ;;  %249 = vmatprep.subr.bf16.mxu0 %v281_v2  ;;  %v30_v4 = vld [vmem:[%s370_s1 + $0x4] sm:$0xf]  ;;  %v273_v5 = vld [vmem:[%s371_s3 + $0x8] sm:$0xff]   ;;  %v37_v12 = vunpack.c.l.s4 %v283_v11  ;;  %v39_v13 = vlaneseq  ;;  %vm101_vm1 = vcmask 523264  }
   0x2   :  { %33 = vperm.xlu0 %265, %v29_v1   ;;  %v272_v3 = vld [vmem:[%s371_s3] sm:$0xff]   ;;  %266 = vset.pattern.permute.xlu1 %v280_v0  ;;  %v146_v6 = vunpack.c.l.bf16 %v29_v1  ;;  %v147_v7 = vunpack.c.l.bf16 %v30_v4  ;;  %v274_v8 = vld [vmem:[%s371_s3 + $0x10] sm:$0xff]   ;;  %v275_v9 = vld [vmem:[%s371_s3 + $0x18] sm:$0xff]   ;;  %vm166_vm2 = vcmask 261120   ;;  %vm220_vm3 = vcmask 257024  }
   0x3   :  { %250 = vmatpush3.bf16.msra.mxu0 %v272_v3  ;;  %257 = vmatprep.mubr.msk.bf16.mxu0 %vm282_vm0, %v281_v2  ;;  %v38_v14 = vunpack.c.0.s8 %v37_v12  ;;  %v40_v15 = vshrl.u32 %v39_v13, 7  ;;  %v27_v19 = vld [vmem:[%s372_s0] sm:$0xf]  ;;  %v28_v21 = vld [vmem:[%s372_s0 + $0x4] sm:$0xf] }
   0x4   :  { %251 = vmatprep.subr.bf16.mxu0 %v281_v2  ;;  %v267_v10 = vpack.i.bf16 %v147_v7, %v146_v6  ;;  %v227_v27 = vld [vmem:[%s373_s4] ss:$0 sm:$0xff] }
   0x5   :  { %v41_v16 = vsub.s32 %v38_v14, %v40_v15  ;;  %v241_v28 = vld [vmem:[%s374_s2] sm:$0xff]  }
   0x6   :  { %45 = vperm.xlu0 %265, %v30_v4   ;;  %268 = vperm.xlu1 %266, %v267_v10   ;;  %v242_v34 = vunpack.c.l.bf16 %v241_v28  ;;  %v243_v39 = vunpack.c.h.bf16 %v241_v28  ;;  %v234_v62 = vld [vmem:[%s375_s5] ss:$0 sm:$0xff] }
   0x7   :  { %252 = vmatpush3.bf16.msra.mxu0 %v273_v5  ;;  %v235_v1 = vld [vmem:[%s376_s6] ss:$0 sm:$0xff] }
   0x8   :  { %253 = vmatprep.subr.bf16.mxu0 %v281_v2 }
   0xb   :  { %254 = vmatpush3.bf16.msra.mxu0 %v274_v8 }
   0xc   :  { %255 = vmatprep.subr.bf16.mxu0 %v281_v2 }
   0xf   :  { %256 = vmatpush3.bf16.msra.mxu0 %v275_v9 }
  0x81   :  { %v34_v17 = vpop.permute.xlu0 %33 }
  0x82   :  { %v42_v18 = vrot.slane %v34_v17, %v41_v16 }
  0x84   :  { %v55_v23 = vmul.bf16 %v42_v18, %v27_v19 }
  0x85   :  { %v46_v20 = vpop.permute.xlu0 %45  ;;  %v269_v26 = vpop.permute.xlu1 %268 }
  0x86   :  { %v54_v22 = vrot.slane %v46_v20, %v41_v16  ;;  %v270_v29 = vunpack.i.l.bf16 %v269_v26  ;;  %v271_v31 = vunpack.i.h.bf16 %v269_v26 }
  0x88   :  { %v56_v24 = vmul.bf16 %v54_v22, %v28_v21 }
  0x8a   :  { %v228_v25 = vcombine.low %v55_v23, %v56_v24 }
  0x8c   :  { %258 = vmatmul.mubr.msk.bf16.vlgmr.msra.gmra.mrb[0].mxu0 %vm101_vm1, %v228_v25 }
 0x15f   :  { %v139_v30 = vpop.f32.mrb[0].mxu0 }
 0x160   :  { %v140_v32 = vadd.f32 %v227_v27, %v139_v30  ;;  %v259_v33 = vpop.f32.mrb[1].mxu0 }
 0x161   :  { %v142_v35 = vpop.f32.mrb[2].mxu0 }
 0x162   :  { %v158_v36 = vmul.f32 %v270_v29, %v140_v32  ;;  %v143_v37 = vadd.f32 %v227_v27, %v142_v35  ;;  %v260_v38 = vpop.f32.mrb[3].mxu0 }
 0x164   :  { %v159_v40 = vmul.f32 %v271_v31, %v143_v37  ;;  %v164_v41 = vadd.f32 %v242_v34, %v158_v36 }
 0x166   :  { %v167_v42 = vsel %vm166_vm2, %v164_v41, 0.0  ;;  %v165_v43 = vadd.f32 %v243_v39, %v159_v40 }
 0x167   :  { %168 = vadd.xlane.f32.xlu1 %v167_v42 }
 0x168   :  { %v170_v44 = vsel %vm166_vm2, %v165_v43, 0.0 }
 0x169   :  { %171 = vadd.xlane.f32.xlu0 %v170_v44 }
 0x1f4   :  { %v169_v45 = vpop.xlane.xlu1 %168 }
 0x1f5   :  { %v174_v46 = vmul.f32 0.03125, %v169_v45 }
 0x1f6   :  { %v172_v47 = vpop.xlane.xlu0 %171 }
 0x1f7   :  { %v176_v48 = vsub.f32 %v164_v41, %v174_v46  ;;  %v175_v49 = vmul.f32 0.03125, %v172_v47 }
 0x1f9   :  { %v177_v50 = vsub.f32 %v165_v43, %v175_v49  ;;  %v178_v51 = vmul.f32 %v176_v48, %v176_v48 }
 0x1fb   :  { %v180_v52 = vsel %vm166_vm2, %v178_v51, 0.0  ;;  %v179_v53 = vmul.f32 %v177_v50, %v177_v50 }
 0x1fc   :  { %181 = vadd.xlane.f32.xlu0 %v180_v52 }
 0x1fd   :  { %v183_v54 = vsel %vm166_vm2, %v179_v53, 0.0 }
 0x1fe   :  { %184 = vadd.xlane.f32.xlu1 %v183_v54 }
 0x289   :  { %v182_v55 = vpop.xlane.xlu0 %181 }
 0x28a   :  { %v186_v56 = vmul.f32 0.03125, %v182_v55 }
 0x28b   :  { %v185_v57 = vpop.xlane.xlu1 %184 }
 0x28c   :  { %v188_v58 = vadd.f32 1e-05, %v186_v56  ;;  %v187_v59 = vmul.f32 0.03125, %v185_v57 }
 0x28e   :  { %276 = vrsqrt.f32 %v188_v58  ;;  %v189_v60 = vadd.f32 1e-05, %v187_v59 }
 0x290   :  { %278 = vrsqrt.f32 %v189_v60 }
 0x298   :  { %v277_v61 = vpop.eup %276 }
 0x299   :  { %v192_v63 = vmul.f32 %v277_v61, %v176_v48 }
 0x29a   :  { %v279_v0 = vpop.eup %278 }
 0x29b   :  { %v201_v2 = vmul.f32 %v234_v62, %v192_v63  ;;  %v193_v3 = vmul.f32 %v279_v0, %v177_v50 }
 0x29d   :  { %v210_v4 = vadd.f32 %v235_v1, %v201_v2  ;;  %v202_v5 = vmul.f32 %v234_v62, %v193_v3 }
 0x29f   :  { %v238_v6 = vpack.c.bf16 %v210_v4, %v210_v4  ;;  %v211_v7 = vadd.f32 %v235_v1, %v202_v5 }
 0x2a1   :  { %221 = vst.msk [vmem:[%s377_s7] sm:$0xf] %vm220_vm3, %v238_v6  ;;  %v239_v8 = vpack.c.bf16 %v211_v7, %v211_v7 }
 0x2a3   :  { %222 = vst.msk [vmem:[%s377_s7 + $0x4] sm:$0xf] %vm220_vm3, %v239_v8 }

// kernel: text_encoder_forward.14
= control target key start
LH: loop header
LB: loop body
LE: loop exit
PB: predicated region body
PF: predicated region fallthrough
CT: control target
= control target key end

     0   :  { %s1421_s18 = smov 0   ;;  %s1423_s19 = smov 0   ;;  %s1829_s0 = inlined_call_operand.vmem [shape: bf16[2,8,96], index: 0, kind: input, shape index: {}, may-alias: {0,1}]   ;;  %s1830_s1 = inlined_call_operand.vmem [shape: bf16[2,8,96], index: 1, kind: input, shape index: {}, may-alias: {0,1}]   ;;  %s1831_s2 = inlined_call_operand.vmem [shape: f32[2,1,8], index: 2, kind: input, shape index: {}]   ;;  %s1832_s3 = inlined_call_operand.vmem [shape: bf16[21,16], index: 3, kind: input, shape index: {}]   ;;  %s1833_s4 = inlined_call_operand.vmem [shape: bf16[21,16], index: 4, kind: input, shape index: {}]   ;;  %s1834_s5 = inlined_call_operand.vmem [shape: bf16[2,8,32], index: 5, kind: output, shape index: {}]  }
   0x1   :  { %s1425_s20 = smov 0  }
   0x2 LB: > { %s27_s21 = sadd.s32 1, %s1361_s19  ;;  %p1177_p0 = scmp.ge.s32.totalorder %s1365_s20, 1  ;;  %s1365_s20 = sphi %s1425_s20, %s15_s20   ;;  %s1361_s19 = sphi %s1423_s19, %s1857_s19   ;;  %s1357_s18 = sphi %s1421_s18, %s1856_s18  }
   0x3   : > { %p29_p1 = scmp.ge.s32.totalorder %s27_s21, 2  ;;  %p222_p2 = scmp.lt.s32.totalorder %s1365_s20, 3 }
   0x5   : > { %s1859_s21 = smov (%p29_p1, %s27_s21), 0  ;;  %p223_p3 = pnand %p1177_p0, %p222_p2 }
   0x6   : > { %v1331_v0 = vld [vmem:[%s1832_s3] sm:$0xff] (!%p223_p3)   ;;  %v1367_v1 = vmov (!%p223_p3), 0.0   ;;  %vm311_vm0 = vcmask (!%p223_p3), 130048   ;;  %p261_p4 = scmp.lt.s32.totalorder (!%p223_p3), %s1357_s18, 1  ;;  %vm1368_vm1 = vmmov (!%p223_p3), 0   ;;  %v1369_v4 = vmov (!%p223_p3), 4  }
   0x7   : > { %226 = sbr.rel (%p223_p3) target bundleno = 1656 (0x678), region = 40  ;;  %1213 = vmatprep.subr.bf16.mxu0 (!%p223_p3), %v1367_v1  ;;  %1221 = vmatprep.subr.bf16.mxu1 (!%p223_p3), %v1367_v1  ;;  %v316_v2 = vsel (!%p223_p3), %vm311_vm0, %v1331_v0, 0  ;;  %v1332_v3 = vld [vmem:[%s1832_s3 + $0x8] ss:$0 sps:$4 sm:$0x77] (!%p223_p3)   ;;  %v1370_v5 = vmov (!%p223_p3), 3   ;;  %v295_v29 = vlaneseq (!%p223_p3) }
   0x8   : > { %1214 = vmatpush3.bf16.xpose.msra.mxu0 (!%p223_p3), %v316_v2  ;;  %1217 = vmatprep.mubr.msk.bf16.mxu0 (!%p223_p3), %vm1368_vm1, %v1367_v1  ;;  %v319_v6 = vsel (!%p223_p3), %vm311_vm0, %v1332_v3, 0  ;;  %s1371_s30 = smov (!%p223_p3), 96   ;;  %v1372_v15 = vmov (!%p223_p3), 5   ;;  %v1373_v16 = vmov (!%p223_p3), 7   ;;  %v1374_v17 = vmov (!%p223_p3), 6   ;;  %s1385_s9 = smov (!%p223_p3), 112  }
   0x9   : > { %1215 = vmatprep.subr.bf16.mxu0 (!%p223_p3), %v1367_v1  ;;  %1223 = vmatprep.mubr.msk.bf16.mxu1 (!%p223_p3), %vm1368_vm1, %v1367_v1  ;;  %v1375_v18 = vmov (!%p223_p3), 10   ;;  %v1376_v19 = vmov (!%p223_p3), 8   ;;  %v1377_v20 = vmov (!%p223_p3), 13   ;;  %v1378_v21 = vmov (!%p223_p3), 9   ;;  %s1387_s13 = smov (!%p223_p3), 64   ;;  %s1388_s14 = smov (!%p223_p3), 80  }
   0xa   : > { %1302 = vset.pattern.permute.xlu1 (!%p223_p3), %v1369_v4  ;;  %1301 = vset.pattern.permute.xlu0 (!%p223_p3), %v1370_v5  ;;  %v1379_v22 = vmov (!%p223_p3), 16   ;;  %v1380_v23 = vmov (!%p223_p3), 11   ;;  %v1381_v24 = vmov (!%p223_p3), 12   ;;  %v1382_v25 = vmov (!%p223_p3), 14   ;;  %s1389_s15 = smov (!%p223_p3), 48  }
   0xb   : > { %v1383_v26 = vmov (!%p223_p3), 15   ;;  %v1384_v27 = vmov (!%p223_p3), 17   ;;  %v1495_v33 = vshrl.u32 (!%p223_p3), %v295_v29, 7  ;;  %v301_v34 = vand.u32 (!%p223_p3), 127, %v295_v29 }
   0xd   : > { %v1498_v36 = vsub.s32 (!%p223_p3), %v301_v34, %v1495_v33 }
   0xe   : > { %s1861_s18 = smov (!%p261_p4, %s1357_s18), 1 }
   0xf   : > { %s1456_s26 = sshll.u32 %s1861_s18, 2  ;;  %vm361_vm2 = vcmp.eq.s32.totalorder %v1498_v36, 4294967289  ;;  %vm416_vm3 = vcmp.eq.s32.totalorder %v1498_v36, 4294967290  ;;  %vm423_vm4 = vcmp.eq.s32.totalorder %v1498_v36, 4294967291  ;;  %vm430_vm5 = vcmp.eq.s32.totalorder %v1498_v36, 4294967292  ;;  %s274_s12 = scalar_lea.vmem %s1831_s2, %s1861_s18 }
  0x10   : > { %s271_s29 = scalar_lea.vmem %s1830_s1, %s1456_s26  ;;  %1216 = vmatpush3.bf16.xpose.msra.mxu0 %v319_v6  ;;  %s267_s8 = scalar_lea.vmem %s1829_s0, %s1456_s26  ;;  %vm437_vm6 = vcmp.eq.s32.totalorder %v1498_v36, 4294967293  ;;  %vm444_vm7 = vcmp.eq.s32.totalorder %v1498_v36, 4294967294  ;;  %vm1839_vm8 = vcmp.eq.s32.totalorder %v1498_v36, 4294967295  ;;  %vm458_vm9 = vcmp.eq.s32.totalorder %v1498_v36, 0 }
  0x11   : > { %v1465_v7 = vld [vmem:[%s271_s29] ss:$0 sps:$4 sm:$0xff]   ;;  %1233 = vmatprep.subr.bf16.mxu0 %v1367_v1  ;;  %vm465_vm10 = vcmp.eq.s32.totalorder %v1498_v36, 1  ;;  %vm1835_vm11 = vcmp.eq.s32.totalorder %v1498_v36, 2  ;;  %vm1837_vm12 = vcmp.eq.s32.totalorder %v1498_v36, 3  ;;  %vm1836_vm13 = vcmp.eq.s32.totalorder %v1498_v36, 4  ;;  %s281_s25 = scalar_lea.vmem %s1834_s5, %s1456_s26 }
  0x12   : > { %371 = vrot.lane.b32.xlu0 %v1465_v7, %s1371_s30  ;;  %v283_v8 = vld [vmem:[%s267_s8] sm:$0xf]  ;;  %vm493_vm15 = vcmp.eq.s32.totalorder %v1498_v36, 5  ;;  %s1390_s26 = smov 16  }
  0x13   : > { %v1187_v28 = vcombine.low %v283_v8, %v283_v8 }
  0x17   : > { %1218 = vmatmul.mubr.msk.bf16.vlgmr.msra.gmra.mrb[0].mxu0 %vm311_vm0, %v283_v8 }
  0x18   : > { %1234 = vmatpush3.bf16.xpose.msra.mxu0 %v316_v2  ;;  %1237 = vmatprep.mubr.msk.bf16.mxu0 %vm1368_vm1, %v1367_v1 }
  0x19   : > { %1235 = vmatprep.subr.bf16.mxu0 %v1367_v1 }
  0x20   : > { %1236 = vmatpush3.bf16.xpose.msra.mxu0 %v319_v6  ;;  %v285_v6 = vld [vmem:[%s274_s12] sm:$0x1] }
  0x21   : > { %vm514_vm14 = vcmp.eq.f32.partialorder %v285_v6, 0.0 }
  0x84   : > { %v372_v9 = vpop.permute.xlu0 %371 }
  0x85   : > { %v374_v10 = vsel %vm311_vm0, %v372_v9, 0 }
  0x86   : > { %1222 = vmatpush3.bf16.xpose.msra.mxu1 %v374_v10 }
  0x87   : > { %1227 = vmatprep.subr.bf16.mxu1 %v1367_v1 }
  0x8d   : > { %1224 = vmatmul.mubr.msk.bf16.vlgmr.msra.gmra.mrb[0].mxu1 %vm311_vm0, %v283_v8 }
  0x8e   : > { %1229 = vmatprep.mubr.msk.bf16.mxu1 %vm1368_vm1, %v1367_v1 }
  0xea   : > { %v355_v11 = vpop.f32.mrb[0].mxu0 }
  0xeb   : > { %418 = vperm.xlu1 %1302, %v355_v11   ;;  %364 = vperm.xlu0 %1301, %v355_v11   ;;  %v1219_v12 = vpop.f32.mrb[1].mxu0 }
  0xec   : > { %v358_v13 = vpop.f32.mrb[2].mxu0 }
  0xed   : > { %v1220_v14 = vpop.f32.mrb[3].mxu0  ;;  %v1542_v13 = vsub.s32 0, %v1495_v33 }
  0xee   : > { %v1386_v14 = vmov 0  }
  0xef   : > { %1303 = vset.pattern.permute.xlu1 %v1372_v15  ;;  %1305 = vset.pattern.permute.xlu0 %v1373_v16 }
  0xf0   : > { %425 = vperm.xlu1 %1303, %v355_v11   ;;  %439 = vperm.xlu0 %1305, %v355_v11  }
  0xf4   : > { %1304 = vset.pattern.permute.xlu1 %v1374_v17  ;;  %1308 = vset.pattern.permute.xlu0 %v1375_v18 }
  0xf5   : > { %432 = vperm.xlu1 %1304, %v355_v11   ;;  %460 = vperm.xlu0 %1308, %v355_v11  }
  0xf9   : > { %1306 = vset.pattern.permute.xlu1 %v1376_v19  ;;  %1311 = vset.pattern.permute.xlu0 %v1377_v20 }
  0xfa   : > { %446 = vperm.xlu1 %1306, %v355_v11   ;;  %481 = vperm.xlu0 %1311, %v355_v11  }
  0xfe   : > { %1307 = vset.pattern.permute.xlu1 %v1378_v21  ;;  %1314 = vset.pattern.permute.xlu0 %v1379_v22 }
  0xff   : > { %453 = vperm.xlu1 %1307, %v355_v11   ;;  %502 = vperm.xlu0 %1314, %v355_v11  }
 0x103   : > { %1309 = vset.pattern.permute.xlu1 %v1380_v23  ;;  %1318 = vset.pattern.permute.xlu0 %v1372_v15  ;;  %v515_v15 = vsel %vm514_vm14, 1, %v1386_v14  ;;  %vm1838_vm14 = vcmp.eq.s32.totalorder %v1498_v36, 7 }
 0x104   : > { %467 = vperm.xlu1 %1309, %v355_v11   ;;  %739 = vrot.lane.b32.xlu0 %v1187_v28, %s1385_s9  ;;  %v519_v34 = vrot.slane %v515_v15, %v1542_v13 }
 0x108   : > { %1310 = vset.pattern.permute.xlu1 %v1381_v24 }
 0x109   : > { %474 = vperm.xlu1 %1310, %v355_v11  }
 0x10d   : > { %1312 = vset.pattern.permute.xlu1 %v1382_v25 }
 0x10e   : > { %488 = vperm.xlu1 %1312, %v355_v11  }
 0x112   : > { %1313 = vset.pattern.permute.xlu1 %v1383_v26 }
 0x113   : > { %495 = vperm.xlu1 %1313, %v355_v11  }
 0x117   : > { %1315 = vset.pattern.permute.xlu1 %v1384_v27 }
 0x118   : > { %509 = vperm.xlu1 %1315, %v355_v11  }
 0x11c   : > { %1316 = vset.pattern.permute.xlu1 %v1370_v5 }
 0x160   : > { %v410_v30 = vpop.f32.mrb[0].mxu1 }
 0x161   : > { %v1225_v31 = vpop.f32.mrb[1].mxu1 }
 0x162   : > { %v413_v32 = vpop.f32.mrb[2].mxu1 }
 0x163   : > { %v1226_v35 = vpop.f32.mrb[3].mxu1 }
 0x16a   : > { %v419_v37 = vpop.permute.xlu1 %418  ;;  %v365_v38 = vpop.permute.xlu0 %364 }
 0x16b   : > { %v367_v39 = vsel %vm361_vm2, %v365_v38, 0.0  ;;  %v421_v41 = vsel %vm416_vm3, %v419_v37, 0.0 }
 0x16c   : > { %v411_v40 = vadd.f32 %v410_v30, %v367_v39 }
 0x16e   : > { %v422_v43 = vadd.f32 %v421_v41, %v411_v40 }
 0x16f   : > { %v426_v42 = vpop.permute.xlu1 %425  ;;  %v440_v48 = vpop.permute.xlu0 %439 }
 0x170   : > { %v428_v44 = vsel %vm423_vm4, %v426_v42, 0.0  ;;  %v442_v50 = vsel %vm437_vm6, %v440_v48, 0.0 }
 0x171   : > { %v429_v45 = vadd.f32 %v428_v44, %v422_v43 }
 0x174   : > { %v433_v46 = vpop.permute.xlu1 %432  ;;  %v461_v57 = vpop.permute.xlu0 %460 }
 0x175   : > { %v435_v47 = vsel %vm430_vm5, %v433_v46, 0.0  ;;  %v463_v59 = vsel %vm458_vm9, %v461_v57, 0.0 }
 0x176   : > { %v436_v49 = vadd.f32 %v435_v47, %v429_v45 }
 0x178   : > { %v443_v52 = vadd.f32 %v442_v50, %v436_v49 }
 0x179   : > { %v447_v51 = vpop.permute.xlu1 %446  ;;  %v482_v63 = vpop.permute.xlu0 %481 }
 0x17a   : > { %v449_v53 = vsel %vm444_vm7, %v447_v51, 0.0  ;;  %v484_v8 = vsel %vm1837_vm12, %v482_v63, 0.0  ;;  %vm522_vm12 = vcmask 64512  }
 0x17b   : > { %v450_v54 = vadd.f32 %v449_v53, %v443_v52 }
 0x17e   : > { %v454_v55 = vpop.permute.xlu1 %453  ;;  %v503_v9 = vpop.permute.xlu0 %502 }
 0x17f   : > { %v456_v56 = vsel %vm1839_vm8, %v454_v55, 0.0 }
 0x180   : > { %v457_v58 = vadd.f32 %v456_v56, %v450_v54 }
 0x182   : > { %v464_v61 = vadd.f32 %v463_v59, %v457_v58  ;;  %v1544_v28 = vpop.permute.xlu0 %739 }
 0x183   : > { %v468_v60 = vpop.permute.xlu1 %467  ;;  %1238 = vmatmul.mubr.msk.bf16.vlgmr.msra.gmra.mrb[4].mxu0 %vm311_vm0, %v1544_v28 }
 0x184   : > { %v470_v62 = vsel %vm465_vm10, %v468_v60, 0.0 }
 0x185   : > { %v471_v0 = vadd.f32 %v470_v62, %v464_v61 }
 0x188   : > { %v475_v2 = vpop.permute.xlu1 %474 }
 0x189   : > { %v477_v3 = vsel %vm1835_vm11, %v475_v2, 0.0  ;;  %vm500_vm11 = vcmp.eq.s32.totalorder %v1498_v36, 6 }
 0x18a   : > { %v478_v5 = vadd.f32 %v477_v3, %v471_v0  ;;  %v505_v35 = vsel %vm500_vm11, %v503_v9, 0.0 }
 0x18c   : > { %v485_v11 = vadd.f32 %v484_v8, %v478_v5 }
 0x18d   : > { %v489_v10 = vpop.permute.xlu1 %488 }
 0x18e   : > { %v491_v12 = vsel %vm1836_vm13, %v489_v10, 0.0  ;;  %vm1557_vm13 = vcmp.eq.s32.totalorder %v519_v34, 1 }
 0x18f   : > { %v492_v29 = vadd.f32 %v491_v12, %v485_v11 }
 0x192   : > { %v496_v30 = vpop.permute.xlu1 %495 }
 0x193   : > { %v498_v31 = vsel %vm493_vm15, %v496_v30, 0.0 }
 0x194   : > { %v499_v32 = vadd.f32 %v498_v31, %v492_v29 }
 0x196   : > { %v506_v37 = vadd.f32 %v505_v35, %v499_v32 }
 0x197   : > { %v510_v38 = vpop.permute.xlu1 %509 }
 0x198   : > { %v512_v39 = vsel %vm1838_vm14, %v510_v38, 0.0  ;;  %vm549_vm14 = vcmask 1043456  }
 0x199   : > { %v513_v41 = vadd.f32 %v512_v39, %v506_v37 }
 0x19b   : > { %v521_v42 = vsel %vm1557_vm13, -10000.0, %v513_v41 }
 0x19c   : > { %v523_v43 = vsel %vm522_vm12, %v521_v42, -inf }
 0x19d   : > { %524 = vmax.xlane.f32.xlu1 %v523_v43 }
 0x1ae   : > { %544 = vrot.lane.b32.xlu1 %v1465_v7, %s1387_s13 }
 0x22a   : > { %v525_v44 = vpop.xlane.xlu1 %524 }
 0x22b   : > { %v526_v45 = vsub.f32 %v521_v42, %v525_v44 }
 0x22d   : > { %v527_v46 = vmul.f32 1.442695, %v526_v45 }
 0x22e   : > { %v545_v49 = vpop.permute.xlu1 %544 }
 0x22f   : > { %1335 = vpow2.f32 %v527_v46  ;;  %v551_v50 = vsel %vm549_vm14, %v545_v49, 0 }
 0x230   : > { %1228 = vmatpush3.bf16.msra.mxu1 %v551_v50 }
 0x231   : > { %1241 = vmatprep.subr.bf16.mxu1 %v1367_v1 }
 0x239   : > { %v1336_v47 = vpop.eup %1335 }
 0x23a   : > { %v529_v48 = vsel %vm522_vm12, %v1336_v47, 0.0 }
 0x23b   : > { %530 = vadd.xlane.f32.xlu0 %v529_v48 }
 0x251   : > { %790 = vrot.lane.b32.xlu0 %v1465_v7, %s1388_s14 }
 0x256   : > { %v778_v51 = vpop.f32.mrb[4].mxu0 }
 0x257   : > { %786 = vperm.xlu1 %1316, %v778_v51   ;;  %842 = vperm.xlu0 %1318, %v778_v51   ;;  %v1239_v52 = vpop.f32.mrb[5].mxu0 }
 0x258   : > { %v781_v53 = vpop.f32.mrb[6].mxu0 }
 0x259   : > { %v1240_v54 = vpop.f32.mrb[7].mxu0 }
 0x25b   : > { %1317 = vset.pattern.permute.xlu1 %v1369_v4  ;;  %1321 = vset.pattern.permute.xlu0 %v1376_v19 }
 0x25c   : > { %836 = vperm.xlu1 %1317, %v778_v51   ;;  %860 = vperm.xlu0 %1321, %v778_v51  }
 0x260   : > { %1319 = vset.pattern.permute.xlu1 %v1374_v17  ;;  %1324 = vset.pattern.permute.xlu0 %v1380_v23 }
 0x261   : > { %848 = vperm.xlu1 %1319, %v778_v51   ;;  %878 = vperm.xlu0 %1324, %v778_v51  }
 0x265   : > { %1320 = vset.pattern.permute.xlu1 %v1373_v16  ;;  %1327 = vset.pattern.permute.xlu0 %v1382_v25 }
 0x266   : > { %854 = vperm.xlu1 %1320, %v778_v51   ;;  %896 = vperm.xlu0 %1327, %v778_v51  }
 0x26a   : > { %1322 = vset.pattern.permute.xlu1 %v1378_v21  ;;  %1330 = vset.pattern.permute.xlu0 %v1384_v27 }
 0x26b   : > { %866 = vperm.xlu1 %1322, %v778_v51   ;;  %914 = vperm.xlu0 %1330, %v778_v51  }
 0x26f   : > { %1323 = vset.pattern.permute.xlu1 %v1375_v18 }
 0x270   : > { %872 = vperm.xlu1 %1323, %v778_v51  }
 0x274   : > { %1325 = vset.pattern.permute.xlu1 %v1381_v24 }
 0x275   : > { %884 = vperm.xlu1 %1325, %v778_v51  }
 0x279   : > { %1326 = vset.pattern.permute.xlu1 %v1377_v20 }
 0x27a   : > { %890 = vperm.xlu1 %1326, %v778_v51  }
 0x27e   : > { %1328 = vset.pattern.permute.xlu1 %v1383_v26 }
 0x27f   : > { %902 = vperm.xlu1 %1328, %v778_v51  }
 0x283   : > { %1329 = vset.pattern.permute.xlu1 %v1379_v22 }
 0x284   : > { %908 = vperm.xlu1 %1329, %v778_v51  }
 0x2c8   : > { %v531_v4 = vpop.xlane.xlu0 %530 }
 0x2c9   : > { %1337 = vrcp.f32 %v531_v4 }
 0x2cc   : > { %v791_v17 = vpop.permute.xlu0 %790 }
 0x2cd   : > { %v793_v18 = vsel %vm311_vm0, %v791_v17, 0 }
 0x2d3   : > { %v1338_v16 = vpop.eup %1337 }
 0x2d4   : > { %v1582_v19 = vmul.f32 %v1338_v16, %v1336_v47 }
 0x2d6   : > { %v534_v21 = vpack.c.bf16 %v1582_v19, %v1582_v19  ;;  %v787_v20 = vpop.permute.xlu1 %786  ;;  %v843_v60 = vpop.permute.xlu0 %842 }
 0x2d7   : > { %v789_v58 = vsel %vm361_vm2, %v787_v20, 0.0  ;;  %v845_v3 = vsel %vm423_vm4, %v843_v60, 0.0 }
 0x2d8   : > { %1230 = vmatmul.mubr.msk.bf16.vlgmr.msra.gmra.mrb[4].mxu1 %vm522_vm12, %v534_v21 }
 0x2d9   : > { %1242 = vmatpush3.bf16.xpose.msra.mxu1 %v793_v18  ;;  %1243 = vmatprep.mubr.msk.bf16.mxu1 %vm1368_vm1, %v1367_v1 }
 0x2da   : > { %1247 = vmatprep.subr.bf16.mxu1 %v1367_v1 }
 0x2db   : > { %v837_v22 = vpop.permute.xlu1 %836  ;;  %v861_v9 = vpop.permute.xlu0 %860 }
 0x2dc   : > { %v863_v14 = vsel %vm444_vm7, %v861_v9, 0.0  ;;  %v633_v9 = vsel %vm444_vm7, %v1582_v19, 0.0 }
 0x2e0   : > { %1244 = vmatmul.mubr.msk.bf16.vlgmr.msra.gmra.mrb[8].mxu1 %vm311_vm0, %v1544_v28  ;;  %v849_v23 = vpop.permute.xlu1 %848  ;;  %v879_v30 = vpop.permute.xlu0 %878  ;;  %vm1842_vm0 = vcmp.eq.s32.totalorder %v1498_v36, 2 }
 0x2e1   : > { %1249 = vmatprep.mubr.msk.bf16.mxu1 %vm1368_vm1, %v1367_v1  ;;  %v839_v1 = vsel %vm416_vm3, %v837_v22, 0.0  ;;  %v851_v8 = vsel %vm430_vm5, %v849_v23, 0.0  ;;  %v881_v35 = vsel %vm465_vm10, %v879_v30, 0.0  ;;  %vm1843_vm1 = vcmp.eq.s32.totalorder %v1498_v36, 3 }
 0x2e5   : > { %v855_v24 = vpop.permute.xlu1 %854  ;;  %v897_v41 = vpop.permute.xlu0 %896 }
 0x2e6   : > { %v857_v11 = vsel %vm437_vm6, %v855_v24, 0.0 }
 0x2ea   : > { %v867_v26 = vpop.permute.xlu1 %866  ;;  %v915_v49 = vpop.permute.xlu0 %914 }
 0x2eb   : > { %v869_v29 = vsel %vm1839_vm8, %v867_v26, 0.0  ;;  %vm1844_vm8 = vcmp.eq.s32.totalorder %v1498_v36, 4 }
 0x2ec   : > { %v899_v45 = vsel %vm1844_vm8, %v897_v41, 0.0  ;;  %v713_v41 = vsel %vm500_vm11, %v1582_v19, 0.0 }
 0x2ef   : > { %v873_v57 = vpop.permute.xlu1 %872 }
 0x2f0   : > { %v875_v32 = vsel %vm458_vm9, %v873_v57, 0.0 }
 0x2f4   : > { %v885_v5 = vpop.permute.xlu1 %884 }
 0x2f5   : > { %v887_v39 = vsel %vm1842_vm0, %v885_v5, 0.0  ;;  %vm1845_vm0 = vcmp.eq.s32.totalorder %v1498_v36, 7 }
 0x2f6   : > { %v917_v53 = vsel %vm1845_vm0, %v915_v49, 0.0  ;;  %vm1846_vm8 = vmmov %vm1845_vm0 }
 0x2f9   : > { %v891_v15 = vpop.permute.xlu1 %890 }
 0x2fa   : > { %v893_v43 = vsel %vm1843_vm1, %v891_v15, 0.0 }
 0x2fe   : > { %v903_v37 = vpop.permute.xlu1 %902 }
 0x2ff   : > { %v905_v48 = vsel %vm493_vm15, %v903_v37, 0.0 }
 0x303   : > { %v909_v46 = vpop.permute.xlu1 %908 }
 0x304   : > { %v911_v51 = vsel %vm500_vm11, %v909_v46, 0.0 }
 0x3ab   : > { %v1595_v25 = vpop.f32.mrb[4].mxu1 }
 0x3ac   : > { %v1231_v27 = vpop.f32.mrb[5].mxu1 }
 0x3ad   : > { %v590_v55 = vpop.f32.mrb[6].mxu1 }
 0x3ae   : > { %v1232_v56 = vpop.f32.mrb[7].mxu1 }
 0x3b3   : > { %v829_v59 = vpop.f32.mrb[8].mxu1 }
 0x3b4   : > { %v830_v61 = vadd.f32 %v829_v59, %v789_v58  ;;  %v1245_v62 = vpop.f32.mrb[9].mxu1 }
 0x3b5   : > { %v832_v63 = vpop.f32.mrb[10].mxu1 }
 0x3b6   : > { %v840_v0 = vadd.f32 %v839_v1, %v830_v61  ;;  %v1246_v2 = vpop.f32.mrb[11].mxu1  ;;  %v593_v1 = vsel %vm416_vm3, %v1582_v19, 0.0 }
 0x3b8   : > { %v846_v6 = vadd.f32 %v845_v3, %v840_v0  ;;  %v594_v0 = vsel %vm522_vm12, %v593_v1, 0.0  ;;  %v613_v3 = vsel %vm430_vm5, %v1582_v19, 0.0 }
 0x3ba   : > { %v852_v10 = vadd.f32 %v851_v8, %v846_v6  ;;  %v614_v6 = vsel %vm522_vm12, %v613_v3, 0.0 }
 0x3bc   : > { %v858_v12 = vadd.f32 %v857_v11, %v852_v10  ;;  %v634_v11 = vsel %vm522_vm12, %v633_v9, 0.0 }
 0x3be   : > { %v864_v28 = vadd.f32 %v863_v14, %v858_v12  ;;  %v653_v14 = vsel %vm458_vm9, %v1582_v19, 0.0 }
 0x3c0   : > { %v870_v31 = vadd.f32 %v869_v29, %v864_v28  ;;  %v654_v28 = vsel %vm522_vm12, %v653_v14, 0.0 }
 0x3c2   : > { %v876_v34 = vadd.f32 %v875_v32, %v870_v31 }
 0x3c4   : > { %v882_v38 = vadd.f32 %v881_v35, %v876_v34 }
 0x3c6   : > { %v888_v42 = vadd.f32 %v887_v39, %v882_v38 }
 0x3c8   : > { %v894_v44 = vadd.f32 %v893_v43, %v888_v42  ;;  %v714_v43 = vsel %vm522_vm12, %v713_v41, 0.0 }
 0x3ca   : > { %v900_v47 = vadd.f32 %v899_v45, %v894_v44 }
 0x3cc   : > { %v906_v50 = vadd.f32 %v905_v48, %v900_v47 }
 0x3ce   : > { %v912_v52 = vadd.f32 %v911_v51, %v906_v50 }
 0x3d0   : > { %v918_v54 = vadd.f32 %v917_v53, %v912_v52  ;;  %v535_v53 = vsel %vm361_vm2, %v1582_v19, 0.0 }
 0x3d2   : > { %v919_v4 = vsel %vm1557_vm13, -10000.0, %v918_v54  ;;  %vm1851_vm13 = vmmov %vm1843_vm1  ;;  %v536_v54 = vsel %vm522_vm12, %v535_v53, 0.0 }
 0x3d3   : > { %v920_v16 = vsel %vm522_vm12, %v919_v4, -inf }
 0x3d4   : > { %921 = vmax.xlane.f32.xlu1 %v920_v16 }
 0x3e5   : > { %937 = vrot.lane.b32.xlu1 %v1465_v7, %s1389_s15 }
 0x461   : > { %v922_v17 = vpop.xlane.xlu1 %921 }
 0x462   : > { %v923_v18 = vsub.f32 %v919_v4, %v922_v17  ;;  %v603_v4 = vsel %vm423_vm4, %v1582_v19, 0.0  ;;  %v623_v17 = vsel %vm437_vm6, %v1582_v19, 0.0 }
 0x463   : > { %v604_v16 = vsel %vm522_vm12, %v603_v4, 0.0 }
 0x464   : > { %v924_v21 = vmul.f32 1.442695, %v923_v18  ;;  %v624_v18 = vsel %vm522_vm12, %v623_v17, 0.0 }
 0x465   : > { %v938_v23 = vpop.permute.xlu1 %937 }
 0x466   : > { %1339 = vpow2.f32 %v924_v21  ;;  %v943_v24 = vsel %vm549_vm14, %v938_v23, 0 }
 0x467   : > { %1248 = vmatpush3.bf16.msra.mxu1 %v943_v24 }
 0x470   : > { %v1340_v20 = vpop.eup %1339 }
 0x471   : > { %v926_v22 = vsel %vm522_vm12, %v1340_v20, 0.0 }
 0x472   : > { %927 = vadd.xlane.f32.xlu0 %v926_v22  ;;  %v663_v22 = vsel %vm465_vm10, %v1582_v19, 0.0 }
 0x473   : > { %v664_v23 = vsel %vm522_vm12, %v663_v22, 0.0 }
 0x4ff   : > { %v928_v40 = vpop.xlane.xlu0 %927 }
 0x500   : > { %1341 = vrcp.f32 %v928_v40 }
 0x50a   : > { %v1342_v26 = vpop.eup %1341 }
 0x50b   : > { %v1633_v27 = vmul.f32 %v1342_v26, %v1340_v20  ;;  %v703_v26 = vsel %vm493_vm15, %v1582_v19, 0.0 }
 0x50d   : > { %v1003_v7 = vsel %vm437_vm6, %v1633_v27, 0.0  ;;  %v932_v55 = vsel %vm361_vm2, %v1633_v27, 0.0  ;;  %v931_v56 = vpack.c.bf16 %v1633_v27, %v1633_v27  ;;  %v1063_v59 = vsel %vm1846_vm8, %v1633_v27, 0.0  ;;  %vm1855_vm6 = vmmov %vm1845_vm0 }
 0x50e   : > { %v1004_v57 = vsel %vm522_vm12, %v1003_v7, 0.0  ;;  %v933_v58 = vsel %vm522_vm12, %v932_v55, 0.0  ;;  %v985_v60 = vsel %vm416_vm3, %v1633_v27, 0.0  ;;  %v1064_v61 = vsel %vm522_vm12, %v1063_v59, 0.0 }
 0x50f   : > { %1005 = vadd.xlane.f32.xlu1 %v1004_v57  ;;  %934 = vadd.xlane.f32.xlu0 %v933_v58  ;;  %v986_v62 = vsel %vm522_vm12, %v985_v60, 0.0  ;;  %v991_v63 = vsel %vm423_vm4, %v1633_v27, 0.0  ;;  %v997_v5 = vsel %vm430_vm5, %v1633_v27, 0.0  ;;  %v1009_v10 = vsel %vm444_vm7, %v1633_v27, 0.0  ;;  %vm1854_vm4 = vmmov %vm1843_vm1 }
 0x510   : > { %1250 = vmatmul.mubr.msk.bf16.vlgmr.msra.gmra.mrb[12].mxu1 %vm522_vm12, %v931_v56  ;;  %v992_v2 = vsel %vm522_vm12, %v991_v63, 0.0  ;;  %v998_v8 = vsel %vm522_vm12, %v997_v5, 0.0  ;;  %v1010_v12 = vsel %vm522_vm12, %v1009_v10, 0.0  ;;  %vm1847_vm3 = vcmp.eq.s32.totalorder %v1498_v36, 4294967295  ;;  %v1196_v5 = vld [vmem:[%s1833_s4] sm:$0xff]  }
 0x511   : > { %v1015_v15 = vsel %vm1847_vm3, %v1633_v27, 0.0  ;;  %vm1848_vm5 = vcmp.eq.s32.totalorder %v1498_v36, 2  ;;  %v1021_v31 = vsel %vm458_vm9, %v1633_v27, 0.0  ;;  %vm1849_vm7 = vcmp.eq.s32.totalorder %v1498_v36, 4  ;;  %vm1853_vm2 = vmmov %vm1847_vm3 }
 0x512   : > { %v1016_v29 = vsel %vm522_vm12, %v1015_v15, 0.0  ;;  %v673_v30 = vsel %vm1848_vm5, %v1582_v19, 0.0  ;;  %v1022_v34 = vsel %vm522_vm12, %v1021_v31, 0.0  ;;  %v693_v35 = vsel %vm1849_vm7, %v1582_v19, 0.0  ;;  %vm1850_vm9 = vmmov %vm1848_vm5 }
 0x513   : > { %1065 = vadd.xlane.f32.xlu1 %v1064_v61  ;;  %987 = vadd.xlane.f32.xlu0 %v986_v62  ;;  %v674_v32 = vsel %vm522_vm12, %v673_v30, 0.0  ;;  %v1027_v37 = vsel %vm465_vm10, %v1633_v27, 0.0  ;;  %v694_v38 = vsel %vm522_vm12, %v693_v35, 0.0  ;;  %v1033_v42 = vsel %vm1850_vm9, %v1633_v27, 0.0  ;;  %vm1852_vm14 = vmmov %vm1849_vm7 }
 0x514   : > { %v1028_v39 = vsel %vm522_vm12, %v1027_v37, 0.0  ;;  %v1034_v44 = vsel %vm522_vm12, %v1033_v42, 0.0  ;;  %v1039_v45 = vsel %vm1851_vm13, %v1633_v27, 0.0  ;;  %v1045_v47 = vsel %vm1852_vm14, %v1633_v27, 0.0 }
 0x515   : > { %v1040_v46 = vsel %vm522_vm12, %v1039_v45, 0.0  ;;  %v1046_v48 = vsel %vm522_vm12, %v1045_v47, 0.0  ;;  %v1051_v49 = vsel %vm493_vm15, %v1633_v27, 0.0  ;;  %v1057_v51 = vsel %vm500_vm11, %v1633_v27, 0.0 }
 0x516   : > { %v1052_v50 = vsel %vm522_vm12, %v1051_v49, 0.0  ;;  %v1058_v52 = vsel %vm522_vm12, %v1057_v51, 0.0  ;;  %v643_v21 = vsel %vm1853_vm2, %v1582_v19, 0.0  ;;  %v683_v24 = vsel %vm1854_vm4, %v1582_v19, 0.0 }
 0x517   : > { %595 = vadd.xlane.f32.xlu1 %v594_v0  ;;  %993 = vadd.xlane.f32.xlu0 %v992_v2  ;;  %v644_v20 = vsel %vm522_vm12, %v643_v21, 0.0  ;;  %v684_v40 = vsel %vm522_vm12, %v683_v24, 0.0  ;;  %v704_v27 = vsel %vm522_vm12, %v703_v26, 0.0  ;;  %v723_v7 = vsel %vm1855_vm6, %v1582_v19, 0.0 }
 0x518   : > { %v724_v55 = vsel %vm522_vm12, %v723_v7, 0.0  ;;  %v1197_v9 = vunpack.c.l.bf16 %v1196_v5  ;;  %v541_v10 = vsub.s32 3, %v1495_v33  ;;  %v609_v15 = vsub.s32 5, %v1495_v33 }
 0x519   : > { %v629_v35 = vsub.s32 7, %v1495_v33  ;;  %v659_v49 = vsub.s32 2, %v1495_v33  ;;  %vm734_vm10 = vcmask 125952   ;;  %vm1076_vm11 = vcmask 257152  }
 0x51a   : > { %v542_v14 = vrot.slane %v1197_v9, %v541_v10  ;;  %v610_v37 = vrot.slane %v1197_v9, %v609_v15 }
 0x51b   : > { %615 = vadd.xlane.f32.xlu1 %v614_v6  ;;  %999 = vadd.xlane.f32.xlu0 %v998_v8  ;;  %v630_v45 = vrot.slane %v1197_v9, %v629_v35 }
 0x51f   : > { %635 = vadd.xlane.f32.xlu1 %v634_v11  ;;  %1011 = vadd.xlane.f32.xlu0 %v1010_v12  ;;  %v599_v12 = vsub.s32 4, %v1495_v33 }
 0x521   : > { %v600_v31 = vrot.slane %v1197_v9, %v599_v12 }
 0x523   : > { %655 = vadd.xlane.f32.xlu1 %v654_v28  ;;  %1017 = vadd.xlane.f32.xlu0 %v1016_v29  ;;  %v619_v28 = vsub.s32 6, %v1495_v33 }
 0x527   : > { %675 = vadd.xlane.f32.xlu1 %v674_v32  ;;  %1023 = vadd.xlane.f32.xlu0 %v1022_v34  ;;  %v1198_v34 = vunpack.c.h.bf16 %v1196_v5 }
 0x529   : > { %v660_v17 = vrot.slane %v1198_v34, %v659_v49  ;;  %v680_v24 = vrot.slane %v1198_v34, %v599_v12 }
 0x52b   : > { %695 = vadd.xlane.f32.xlu1 %v694_v38  ;;  %1029 = vadd.xlane.f32.xlu0 %v1028_v39  ;;  %v620_v39 = vrot.slane %v1197_v9, %v619_v28  ;;  %v700_v9 = vrot.slane %v1198_v34, %v619_v28  ;;  %v710_v28 = vrot.slane %v1198_v34, %v629_v35 }
 0x52f   : > { %715 = vadd.xlane.f32.xlu1 %v714_v43  ;;  %1035 = vadd.xlane.f32.xlu0 %v1034_v44 }
 0x533   : > { %1041 = vadd.xlane.f32.xlu0 %v1040_v46 }
 0x537   : > { %1047 = vadd.xlane.f32.xlu0 %v1046_v48  ;;  %v640_v48 = vrot.slane %v1198_v34, %v1542_v13 }
 0x53b   : > { %1053 = vadd.xlane.f32.xlu0 %v1052_v50 }
 0x53f   : > { %1059 = vadd.xlane.f32.xlu0 %v1058_v52  ;;  %v649_v52 = vsub.s32 1, %v1495_v33  ;;  %v291_v33 = vld [vmem:[%s1833_s4 + $0x8] sm:$0x7] }
 0x543   : > { %537 = vadd.xlane.f32.xlu0 %v536_v54 }
 0x547   : > { %605 = vadd.xlane.f32.xlu0 %v604_v16  ;;  %v650_v16 = vrot.slane %v1198_v34, %v649_v52 }
 0x54b   : > { %625 = vadd.xlane.f32.xlu0 %v624_v18 }
 0x54f   : > { %645 = vadd.xlane.f32.xlu0 %v644_v20 }
 0x553   : > { %665 = vadd.xlane.f32.xlu0 %v664_v23 }
 0x557   : > { %685 = vadd.xlane.f32.xlu0 %v684_v40  ;;  %v670_v40 = vrot.slane %v1198_v34, %v541_v10 }
 0x55b   : > { %705 = vadd.xlane.f32.xlu0 %v704_v27 }
 0x55f   : > { %725 = vadd.xlane.f32.xlu0 %v724_v55 }
 0x59c   : > { %v935_v56 = vpop.xlane.xlu0 %934  ;;  %v1770_v1 = vpop.xlane.xlu1 %1005 }
 0x5a0   : > { %v1758_v57 = vpop.xlane.xlu0 %987  ;;  %v1776_v63 = vpop.xlane.xlu1 %1065 }
 0x5a4   : > { %v1760_v58 = vpop.xlane.xlu0 %993  ;;  %v596_v2 = vpop.xlane.xlu1 %595 }
 0x5a5   : > { %v601_v38 = vmul.f32 %v600_v31, %v596_v2  ;;  %v936_v2 = vmul.f32 %v935_v56, %v542_v14  ;;  %v995_v56 = vmul.f32 %v1760_v58, %v610_v37 }
 0x5a8   : > { %v1762_v59 = vpop.xlane.xlu0 %999  ;;  %v616_v8 = vpop.xlane.xlu1 %615 }
 0x5a9   : > { %v621_v47 = vmul.f32 %v620_v39, %v616_v8 }
 0x5ac   : > { %v1764_v60 = vpop.xlane.xlu0 %1011  ;;  %v636_v29 = vpop.xlane.xlu1 %635 }
 0x5ad   : > { %v641_v4 = vmul.f32 %v640_v48, %v636_v29  ;;  %v690_v29 = vrot.slane %v1198_v34, %v609_v15 }
 0x5b0   : > { %v1766_v61 = vpop.xlane.xlu0 %1017  ;;  %v656_v46 = vpop.xlane.xlu1 %655 }
 0x5b1   : > { %v661_v23 = vmul.f32 %v660_v17, %v656_v46 }
 0x5b4   : > { %v1768_v62 = vpop.xlane.xlu0 %1023  ;;  %v676_v18 = vpop.xlane.xlu1 %675 }
 0x5b5   : > { %v681_v8 = vmul.f32 %v680_v24, %v676_v18 }
 0x5b8   : > { %v1772_v36 = vpop.xlane.xlu0 %1029  ;;  %v696_v5 = vpop.xlane.xlu1 %695 }
 0x5b9   : > { %v701_v49 = vmul.f32 %v700_v9, %v696_v5 }
 0x5bc   : > { %v1774_v19 = vpop.xlane.xlu0 %1035 }
 0x5c0   : > { %v1778_v0 = vpop.xlane.xlu0 %1041 }
 0x5c4   : > { %v1780_v3 = vpop.xlane.xlu0 %1047 }
 0x5c8   : > { %v1785_v6 = vpop.xlane.xlu0 %1053 }
 0x5cc   : > { %v1788_v11 = vpop.xlane.xlu0 %1059 }
 0x5d0   : > { %v538_v30 = vpop.xlane.xlu0 %537 }
 0x5d1   : > { %v543_v32 = vmul.f32 %v542_v14, %v538_v30 }
 0x5d3   : > { %v588_v41 = vadd.f32 %v1595_v25, %v543_v32 }
 0x5d4   : > { %v606_v42 = vpop.xlane.xlu0 %605 }
 0x5d5   : > { %v602_v43 = vadd.f32 %v601_v38, %v588_v41  ;;  %v611_v44 = vmul.f32 %v610_v37, %v606_v42  ;;  %v989_v38 = vmul.f32 %v1758_v57, %v600_v31  ;;  %v294_v42 = vunpack.c.l.bf16 %v291_v33 }
 0x5d7   : > { %v612_v50 = vadd.f32 %v611_v44, %v602_v43 }
 0x5d8   : > { %v626_v51 = vpop.xlane.xlu0 %625 }
 0x5d9   : > { %v622_v53 = vadd.f32 %v621_v47, %v612_v50  ;;  %v631_v54 = vmul.f32 %v630_v45, %v626_v51  ;;  %v720_v50 = vrot.slane %v294_v42, %v1542_v13  ;;  %v1001_v51 = vmul.f32 %v1762_v59, %v620_v39 }
 0x5da   : > { %v1019_v59 = vmul.f32 %v1766_v61, %v650_v16  ;;  %v1043_v61 = vmul.f32 %v1778_v0, %v690_v29 }
 0x5db   : > { %v632_v25 = vadd.f32 %v631_v54, %v622_v53  ;;  %v716_v53 = vpop.xlane.xlu1 %715 }
 0x5dc   : > { %v646_v21 = vpop.xlane.xlu0 %645  ;;  %v721_v58 = vmul.f32 %v720_v50, %v716_v53 }
 0x5dd   : > { %v642_v20 = vadd.f32 %v641_v4, %v632_v25  ;;  %v651_v22 = vmul.f32 %v650_v16, %v646_v21  ;;  %v1007_v25 = vmul.f32 %v1770_v1, %v630_v45  ;;  %v730_v21 = vrot.slane %v294_v42, %v649_v52 }
 0x5de   : > { %v1031_v45 = vmul.f32 %v1772_v36, %v670_v40 }
 0x5df   : > { %v652_v26 = vadd.f32 %v651_v22, %v642_v20  ;;  %v1013_v20 = vmul.f32 %v1764_v60, %v640_v48  ;;  %v1037_v48 = vmul.f32 %v1774_v19, %v680_v24  ;;  %v1067_v5 = vmul.f32 %v1776_v63, %v730_v21 }
 0x5e0   : > { %v666_v27 = vpop.xlane.xlu0 %665 }
 0x5e1   : > { %v662_v7 = vadd.f32 %v661_v23, %v652_v26  ;;  %v671_v55 = vmul.f32 %v670_v40, %v666_v27  ;;  %v1025_v26 = vmul.f32 %v1768_v62, %v660_v17  ;;  %v1055_v17 = vmul.f32 %v1785_v6, %v710_v28 }
 0x5e3   : > { %v672_v30 = vadd.f32 %v671_v55, %v662_v7  ;;  %v979_v32 = vpop.f32.mrb[12].mxu1  ;;  %v1049_v7 = vmul.f32 %v1780_v3, %v700_v9 }
 0x5e4   : > { %v980_v41 = vadd.f32 %v979_v32, %v936_v2  ;;  %v1251_v12 = vpop.f32.mrb[13].mxu1  ;;  %v686_v10 = vpop.xlane.xlu0 %685  ;;  %v1061_v2 = vmul.f32 %v1788_v11, %v720_v50 }
 0x5e5   : > { %v682_v43 = vadd.f32 %v681_v8, %v672_v30  ;;  %v691_v44 = vmul.f32 %v690_v29, %v686_v10  ;;  %v982_v46 = vpop.f32.mrb[14].mxu1 }
 0x5e6   : > { %v990_v14 = vadd.f32 %v989_v38, %v980_v41  ;;  %v1252_v47 = vpop.f32.mrb[15].mxu1 }
 0x5e7   : > { %v692_v15 = vadd.f32 %v691_v44, %v682_v43 }
 0x5e8   : > { %v996_v57 = vadd.f32 %v995_v56, %v990_v14  ;;  %v706_v31 = vpop.xlane.xlu0 %705 }
 0x5e9   : > { %v702_v54 = vadd.f32 %v701_v49, %v692_v15  ;;  %v711_v4 = vmul.f32 %v710_v28, %v706_v31 }
 0x5ea   : > { %v1002_v18 = vadd.f32 %v1001_v51, %v996_v57 }
 0x5eb   : > { %v712_v37 = vadd.f32 %v711_v4, %v702_v54 }
 0x5ec   : > { %v1008_v22 = vadd.f32 %v1007_v25, %v1002_v18  ;;  %v726_v13 = vpop.xlane.xlu0 %725 }
 0x5ed   : > { %v722_v34 = vadd.f32 %v721_v58, %v712_v37  ;;  %v731_v35 = vmul.f32 %v730_v21, %v726_v13 }
 0x5ee   : > { %v1014_v39 = vadd.f32 %v1013_v20, %v1008_v22 }
 0x5ef   : > { %v732_v23 = vadd.f32 %v731_v35, %v722_v34 }
 0x5f0   : > { %v1020_v27 = vadd.f32 %v1019_v59, %v1014_v39 }
 0x5f1   : > { %v733_v1 = vpack.c.bf16 %v732_v23, %v732_v23 }
 0x5f2   : > { %v1026_v60 = vadd.f32 %v1025_v26, %v1020_v27 }
 0x5f3   : > { %735 = vst.msk [vmem:[%s281_s25] sm:$0xf] %vm734_vm10, %v733_v1 }
 0x5f4   : > { %v1032_v52 = vadd.f32 %v1031_v45, %v1026_v60 }
 0x5f6   : > { %v1038_v16 = vadd.f32 %v1037_v48, %v1032_v52 }
 0x5f8   : > { %v1044_v62 = vadd.f32 %v1043_v61, %v1038_v16 }
 0x5fa   : > { %v1050_v55 = vadd.f32 %v1049_v7, %v1044_v62 }
 0x5fc   : > { %v1056_v33 = vadd.f32 %v1055_v17, %v1050_v55 }
 0x5fe   : > { %v1062_v36 = vadd.f32 %v1061_v2, %v1056_v33 }
 0x600   : > { %v1068_v40 = vadd.f32 %v1067_v5, %v1062_v36 }
 0x602   : > { %v1194_v8 = vpack.c.bf16 %v1068_v40, %v1068_v40 }
 0x604   : > { %1073 = vrot.lane.b32.xlu1 %v1194_v8, %s1390_s26 }
 0x676   : > { %v1074_v19 = vpop.permute.xlu1 %1073 }
 0x677   : > { %1077 = vst.msk [vmem:[%s281_s25] sm:$0xf] %vm1076_vm11, %v1074_v19 }
 0x678 PF: > { %s15_s20 = sadd.s32 1, %s1365_s20   ;;  %s1856_s18 = smov %s1361_s19 }
 0x679   : > { %p12_p5 = scmp.ge.s32.totalorder %s15_s20, 4   ;;  %s1857_s19 = smov %s1859_s21 }
 0x67b   :  { %14 = sbr.rel (!%p12_p5) target bundleno = 2 (0x2), region = 76 }

</bundles_post_ra>
